<compile_context>
chip_gen: v5e
topology: v5e:2x2
jax: 0.10.0
libtpu: 0.0.40
codegen_flags: <defaults>
</compile_context>

<pallas_src>
import functools

import jax
import jax.numpy as jnp
from jax.experimental import pallas as pl
from jax.experimental.pallas import tpu as pltpu


def _conv3x3_band_kernel(*refs, TH, W, Cp, apply_act, mm_dtype):
    """One H-band of a 3x3 / stride-1 / pad-1 conv, optionally preceded by a
    per-channel affine (folded BN) + ReLU on its input.

    refs (apply_act=True):
      top_ref   (1, 1, W, Cp)   row above the band (zero-masked on band 0)
      mid_ref   (1, TH, W, Cp)  the band itself
      bot_ref   (1, 1, W, Cp)   row below the band (zero-masked on last band)
      w_ref     (9*Cp, Cp)      conv weights flattened, rows ordered (kh, kw, cin)
      scale_ref (1, 1, Cp)      folded BN scale     (only when apply_act)
      shift_ref (1, 1, Cp)      folded BN shift     (only when apply_act)
      out_ref   (1, TH, W, Cp)  conv output band (intermediate dtype)
      stats_ref (1, 1, 2, Cp)   per-band [sum, sum-of-squares] of the f32 output
    """
    if apply_act:
        (top_ref, mid_ref, bot_ref, w_ref, scale_ref, shift_ref,
         out_ref, stats_ref) = refs
    else:
        top_ref, mid_ref, bot_ref, w_ref, out_ref, stats_ref = refs

    b = pl.program_id(1)
    nb = pl.num_programs(1)

    top = top_ref[0].astype(jnp.float32)      # (1, W, Cp)
    mid = mid_ref[0].astype(jnp.float32)      # (TH, W, Cp)
    bot = bot_ref[0].astype(jnp.float32)      # (1, W, Cp)

    if apply_act:
        scale = scale_ref[...]                # (1, 1, Cp) -> broadcast
        shift = shift_ref[...]
        top = jnp.maximum(top * scale + shift, 0.0)
        mid = jnp.maximum(mid * scale + shift, 0.0)
        bot = jnp.maximum(bot * scale + shift, 0.0)

    # Halo rows outside the image implement the conv's zero padding; mask AFTER
    # the affine + ReLU so those positions are exactly 0.
    top = top * jnp.where(b == 0, 0.0, 1.0)
    bot = bot * jnp.where(b == nb - 1, 0.0, 1.0)

    # Cast to the matmul dtype BEFORE building the im2col taps so the biggest
    # in-kernel buffers (the tap slabs) are half-width on the bf16 path.
    band = jnp.concatenate([top, mid, bot], axis=0).astype(mm_dtype)   # (TH+2, W, Cp)
    zcol = jnp.zeros((TH + 2, 1, Cp), mm_dtype)
    band = jnp.concatenate([zcol, band, zcol], axis=1)                 # (TH+2, W+2, Cp)

    # Three accumulating matmuls over kh (K = 3*Cp each) instead of one 9*Cp
    # slab: 3x smaller patch buffer, kh slice is a cheap leading-dim slice.
    def kh_matmul(kh):
        taps = jnp.concatenate(
            [band[kh:kh + TH, kw:kw + W, :] for kw in range(3)], axis=-1)
        return jnp.dot(taps.reshape(TH * W, 3 * Cp),
                       w_ref[kh * 3 * Cp:(kh + 1) * 3 * Cp, :],
                       preferred_element_type=jnp.float32)

    y = kh_matmul(0) + kh_matmul(1) + kh_matmul(2)        # (TH*W, Cp), f32

    out_ref[0] = y.reshape(TH, W, Cp).astype(out_ref.dtype)

    # Single-pass BN partial statistics (from the f32 accumulator).
    s = jnp.sum(y, axis=0, keepdims=True)                 # (1, Cp)
    ss = jnp.sum(y * y, axis=0, keepdims=True)            # (1, Cp)
    stats_ref[0, 0] = jnp.concatenate([s, ss], axis=0)    # (2, Cp)


def _bn_residual_relu_kernel(y_ref, x_ref, scale_ref, shift_ref, out_ref):
    """out = relu(y * scale + shift + x) over one band (y may be bf16)."""
    y = y_ref[...].astype(jnp.float32)
    out_ref[...] = jnp.maximum(
        y * scale_ref[...] + shift_ref[...] + x_ref[...], 0.0)


def basic_block_pallas(x_nchw, w1, w2, g1, b1, g2, b2, *,
                       tile_h=32, mm_dtype=jnp.bfloat16, eps=1e-5):
    """x_nchw: (N, C, H, W) f32.  w*: (3, 3, Cin, Cout) HWIO.  g*/b*: (C,)."""
    N, C, H, W = x_nchw.shape
    Cp = ((C + 127) // 128) * 128            # lane-dense channel padding

    # Largest divisor of H that is <= tile_h (exact bands -> no row masking,
    # BN partial sums stay correct).
    TH = min(tile_h, H)
    while H % TH:
        TH -= 1
    NB = H // TH

    # Intermediates follow the matmul dtype: bf16 on the fast path halves the
    # HBM round-trips of y1/y2; the f32 path stays tight vs. the reference.
    inter_dtype = mm_dtype

    # NHWC, channels zero-padded to Cp. No spatial pad (halo handled in-kernel).
    x = jnp.transpose(x_nchw, (0, 2, 3, 1)).astype(jnp.float32)
    x = jnp.pad(x, ((0, 0), (0, 0), (0, 0), (0, Cp - C)))

    def prep_w(w):  # HWIO (3,3,C,C) -> (9*Cp, Cp); rows ordered (kh, kw, cin)
        wp = jnp.pad(w.astype(jnp.float32),
                     ((0, 0), (0, 0), (0, Cp - C), (0, Cp - C)))
        return wp.reshape(9 * Cp, Cp).astype(mm_dtype)

    w1r, w2r = prep_w(w1), prep_w(w2)

    def pad_vec(v, fill):
        return jnp.concatenate(
            [v.astype(jnp.float32), jnp.full((Cp - C,), fill, jnp.float32)])

    g1p, b1p = pad_vec(g1, 1.0), pad_vec(b1, 0.0)
    g2p, b2p = pad_vec(g2, 1.0), pad_vec(b2, 0.0)

    grid = (N, NB)
    cparams = pltpu.CompilerParams(
        dimension_semantics=("parallel", "parallel"),   # megacore split on v7x
        vmem_limit_bytes=48 * 1024 * 1024)              # headroom under 64 MiB

    band_spec = pl.BlockSpec((1, TH, W, Cp), lambda n, b: (n, b, 0, 0))
    top_spec = pl.BlockSpec(
        (1, 1, W, Cp), lambda n, b: (n, jnp.maximum(b * TH - 1, 0), 0, 0))
    bot_spec = pl.BlockSpec(
        (1, 1, W, Cp), lambda n, b: (n, jnp.minimum((b + 1) * TH, H - 1), 0, 0))
    w_spec = pl.BlockSpec((9 * Cp, Cp), lambda n, b: (0, 0))
    vec_spec = pl.BlockSpec((1, 1, Cp), lambda n, b: (0, 0, 0))
    stats_spec = pl.BlockSpec((1, 1, 2, Cp), lambda n, b: (n, b, 0, 0))

    conv_out_shapes = (jax.ShapeDtypeStruct((N, H, W, Cp), inter_dtype),
                       jax.ShapeDtypeStruct((N, NB, 2, Cp), jnp.float32))

    w_bytes = 9 * Cp * Cp * jnp.dtype(mm_dtype).itemsize
    conv_cost = pl.CostEstimate(
        flops=2 * N * H * W * 9 * Cp * Cp,
        transcendentals=0,
        bytes_accessed=(N * H * W * Cp * 4                                  # input
                        + N * NB * w_bytes                                  # weights
                        + N * H * W * Cp * jnp.dtype(inter_dtype).itemsize  # output
                        + N * NB * 2 * Cp * 4))                             # stats

    # ---- conv1 (+ per-band BN1 partial stats) ----
    y1, st1 = pl.pallas_call(
        functools.partial(_conv3x3_band_kernel, TH=TH, W=W, Cp=Cp,
                          apply_act=False, mm_dtype=mm_dtype),
        grid=grid,
        in_specs=[top_spec, band_spec, bot_spec, w_spec],
        out_specs=(band_spec, stats_spec),
        out_shape=conv_out_shapes,
        compiler_params=cparams,
        cost_estimate=conv_cost,
    )(x, x, x, w1r)

    def bn_scale_shift(st, gamma, beta):
        cnt = jnp.float32(N * H * W)
        s = jnp.sum(st[:, :, 0, :], axis=(0, 1))
        ss = jnp.sum(st[:, :, 1, :], axis=(0, 1))
        mean = s / cnt
        var = jnp.maximum(ss / cnt - mean * mean, 0.0)    # biased, clamped >= 0
        inv = gamma * jax.lax.rsqrt(var + eps)
        return inv.reshape(1, 1, Cp), (beta - mean * inv).reshape(1, 1, Cp)

    scale1, shift1 = bn_scale_shift(st1, g1p, b1p)

    # ---- BN1-affine + ReLU + conv2 (+ per-band BN2 partial stats) ----
    y2, st2 = pl.pallas_call(
        functools.partial(_conv3x3_band_kernel, TH=TH, W=W, Cp=Cp,
                          apply_act=True, mm_dtype=mm_dtype),
        grid=grid,
        in_specs=[top_spec, band_spec, bot_spec, w_spec, vec_spec, vec_spec],
        out_specs=(band_spec, stats_spec),
        out_shape=conv_out_shapes,
        compiler_params=cparams,
        cost_estimate=conv_cost,
    )(y1, y1, y1, w2r, scale1, shift1)

    scale2, shift2 = bn_scale_shift(st2, g2p, b2p)

    # ---- BN2-affine + residual add (f32 x) + ReLU ----
    out = pl.pallas_call(
        _bn_residual_relu_kernel,
        grid=grid,
        in_specs=[band_spec, band_spec, vec_spec, vec_spec],
        out_specs=band_spec,
        out_shape=jax.ShapeDtypeStruct((N, H, W, Cp), jnp.float32),
        compiler_params=cparams,
    )(y2, x, scale2, shift2)

    return jnp.transpose(out[..., :C], (0, 3, 1, 2))   # back to NCHW


def basic_block_ref(x_nchw, w1, w2, g1, b1, g2, b2, eps=1e-5):
    """Pure-JAX reference (NCHW), matching PyTorch training-mode BN semantics."""
    def conv3x3(x, w_hwio):
        w_oihw = jnp.transpose(w_hwio, (3, 2, 0, 1))
        return jax.lax.conv_general_dilated(
            x, w_oihw, window_strides=(1, 1), padding=((1, 1), (1, 1)),
            dimension_numbers=('NCHW', 'OIHW', 'NCHW'))

    def bn(x, g, b):
        m = jnp.mean(x, axis=(0, 2, 3), keepdims=True)
        v = jnp.mean((x - m) ** 2, axis=(0, 2, 3), keepdims=True)
        return ((x - m) * jax.lax.rsqrt(v + eps)
                * g.reshape(1, -1, 1, 1) + b.reshape(1, -1, 1, 1))

    out = jax.nn.relu(bn(conv3x3(x_nchw, w1), g1, b1))
    out = bn(conv3x3(out, w2), g2, b2)
    return jax.nn.relu(out + x_nchw)


if __name__ == "__main__":
    key = jax.random.PRNGKey(0)
    k_x, k_w1, k_w2, k_g1, k_b1, k_g2, k_b2 = jax.random.split(key, 7)

    # Small block: inplanes = planes = 4, stride = 1, no downsample.
    N, C, H, W = 2, 4, 16, 16
    x = jax.random.normal(k_x, (N, C, H, W), jnp.float32)

    w1 = 0.1 * jax.random.normal(k_w1, (3, 3, C, C), jnp.float32)   # conv1 HWIO
    w2 = 0.1 * jax.random.normal(k_w2, (3, 3, C, C), jnp.float32)   # conv2 HWIO
    g1 = 1.0 + 0.1 * jax.random.normal(k_g1, (C,), jnp.float32)     # bn1 gamma
    b1 = 0.1 * jax.random.normal(k_b1, (C,), jnp.float32)           # bn1 beta
    g2 = 1.0 + 0.1 * jax.random.normal(k_g2, (C,), jnp.float32)     # bn2 gamma
    b2 = 0.1 * jax.random.normal(k_b2, (C,), jnp.float32)           # bn2 beta

    ref = basic_block_ref(x, w1, w2, g1, b1, g2, b2)

    # f32 MXU / f32 intermediates: tight match to the f32 reference.
    out_f32 = jax.block_until_ready(
        basic_block_pallas(x, w1, w2, g1, b1, g2, b2, mm_dtype=jnp.float32))
    assert out_f32.shape == (N, C, H, W) and out_f32.dtype == jnp.float32
    err32 = float(jnp.max(jnp.abs(out_f32 - ref)))
    assert jnp.allclose(out_f32, ref, atol=2e-3, rtol=2e-3), \
        f"f32 path max abs err {err32}"

    # bf16 MXU + bf16 intermediates (v6e/v7x fast path): looser tolerance,
    # matmul inputs AND the y1/y2 HBM round-trips are bf16-rounded.
    out_bf16 = jax.block_until_ready(
        basic_block_pallas(x, w1, w2, g1, b1, g2, b2, mm_dtype=jnp.bfloat16))
    errbf = float(jnp.max(jnp.abs(out_bf16 - ref)))
    assert jnp.allclose(out_bf16, ref, atol=1e-1, rtol=1e-1), \
        f"bf16 path max abs err {errbf}"

    print("KERNEL_OK")
</pallas_src>

<mosaic_0001>
module attributes {stable_mosaic.version = 11 : i64} {
  func.func @_conv3x3_band_kernel(%arg0: i32, %arg1: i32, %arg2: memref<1x1x16x128xf32, #tpu.memory_space<vmem>>, %arg3: memref<1x16x16x128xf32, #tpu.memory_space<vmem>>, %arg4: memref<1x1x16x128xf32, #tpu.memory_space<vmem>>, %arg5: memref<1152x128xf32, #tpu.memory_space<vmem>>, %arg6: memref<1x16x16x128xf32, #tpu.memory_space<vmem>>, %arg7: memref<1x1x2x128xf32, #tpu.memory_space<vmem>>) attributes {dimension_semantics = [#tpu.dimension_semantics<parallel>, #tpu.dimension_semantics<parallel>], iteration_bounds = array<i64: 2, 1>, scalar_prefetch = 0 : i64, scratch_operands = 0 : i64, tpu.core_type = #tpu.core_type<tc>, window_params = [{transform_indices = @transform_0, window_bounds = array<i64: 1, 1, 16, 128>}, {transform_indices = @transform_1, window_bounds = array<i64: 1, 16, 16, 128>}, {transform_indices = @transform_2, window_bounds = array<i64: 1, 1, 16, 128>}, {pipeline_mode = #tpu.pipeline_mode<synchronous>, transform_indices = @transform_3, window_bounds = array<i64: 1152, 128>}, {transform_indices = @transform_4, window_bounds = array<i64: 1, 16, 16, 128>}, {transform_indices = @transform_5, window_bounds = array<i64: 1, 1, 2, 128>}]} {
    %c0 = arith.constant 0 : index
    %c0_0 = arith.constant 0 : index
    %c0_1 = arith.constant 0 : index
    %c0_2 = arith.constant 0 : index
    %0 = vector.load %arg2[%c0, %c0_0, %c0_1, %c0_2] : memref<1x1x16x128xf32, #tpu.memory_space<vmem>>, vector<1x1x16x128xf32>
    %1 = vector.shape_cast %0 : vector<1x1x16x128xf32> to vector<1x16x128xf32>
    %c0_3 = arith.constant 0 : index
    %c0_4 = arith.constant 0 : index
    %c0_5 = arith.constant 0 : index
    %c0_6 = arith.constant 0 : index
    %2 = vector.load %arg3[%c0_3, %c0_4, %c0_5, %c0_6] : memref<1x16x16x128xf32, #tpu.memory_space<vmem>>, vector<1x16x16x128xf32>
    %3 = vector.shape_cast %2 : vector<1x16x16x128xf32> to vector<16x16x128xf32>
    %c0_7 = arith.constant 0 : index
    %c0_8 = arith.constant 0 : index
    %c0_9 = arith.constant 0 : index
    %c0_10 = arith.constant 0 : index
    %4 = vector.load %arg4[%c0_7, %c0_8, %c0_9, %c0_10] : memref<1x1x16x128xf32, #tpu.memory_space<vmem>>, vector<1x1x16x128xf32>
    %5 = vector.shape_cast %4 : vector<1x1x16x128xf32> to vector<1x16x128xf32>
    %c0_i32 = arith.constant 0 : i32
    %6 = arith.cmpi eq, %arg1, %c0_i32 : i32
    %cst = arith.constant 0.000000e+00 : f32
    %cst_11 = arith.constant 1.000000e+00 : f32
    %7 = arith.select %6, %cst, %cst_11 : f32
    %8 = vector.broadcast %7 : f32 to vector<1x16x128xf32>
    %9 = arith.mulf %1, %8 : vector<1x16x128xf32>
    %c0_i32_12 = arith.constant 0 : i32
    %10 = arith.cmpi eq, %arg1, %c0_i32_12 : i32
    %cst_13 = arith.constant 0.000000e+00 : f32
    %cst_14 = arith.constant 1.000000e+00 : f32
    %11 = arith.select %10, %cst_13, %cst_14 : f32
    %12 = vector.broadcast %11 : f32 to vector<1x16x128xf32>
    %13 = arith.mulf %5, %12 : vector<1x16x128xf32>
    %14 = tpu.concatenate %9, %3, %13 in 0 : vector<1x16x128xf32>, vector<16x16x128xf32>, vector<1x16x128xf32> -> vector<18x16x128xf32>
    %cst_15 = arith.constant 0.000000e+00 : f32
    %15 = vector.broadcast %cst_15 : f32 to vector<18x1x128xf32>
    %16 = tpu.concatenate %15, %14, %15 in 1 : vector<18x1x128xf32>, vector<18x16x128xf32>, vector<18x1x128xf32> -> vector<18x18x128xf32>
    %17 = vector.extract_strided_slice %16 {offsets = [0, 0, 0], sizes = [16, 16, 128], strides = [1, 1, 1]} : vector<18x18x128xf32> to vector<16x16x128xf32>
    %18 = vector.extract_strided_slice %16 {offsets = [0, 1, 0], sizes = [16, 16, 128], strides = [1, 1, 1]} : vector<18x18x128xf32> to vector<16x16x128xf32>
    %19 = vector.extract_strided_slice %16 {offsets = [0, 2, 0], sizes = [16, 16, 128], strides = [1, 1, 1]} : vector<18x18x128xf32> to vector<16x16x128xf32>
    %20 = tpu.concatenate %17, %18, %19 in 2 : vector<16x16x128xf32>, vector<16x16x128xf32>, vector<16x16x128xf32> -> vector<16x16x384xf32>
    %21 = vector.shape_cast %20 : vector<16x16x384xf32> to vector<256x384xf32>
    %c0_16 = arith.constant 0 : index
    %c0_17 = arith.constant 0 : index
    %22 = vector.load %arg5[%c0_16, %c0_17] : memref<1152x128xf32, #tpu.memory_space<vmem>>, vector<384x128xf32>
    %cst_18 = arith.constant dense<0.000000e+00> : vector<256x128xf32>
    %23 = tpu.matmul %21, %22, %cst_18 {dimension_numbers = #tpu.dot_dimension_numbers<[1], [0], [0], [1], [0, 0, 1, 1], [], []>} : vector<256x384xf32>, vector<384x128xf32>, vector<256x128xf32> -> vector<256x128xf32>
    %24 = vector.extract_strided_slice %16 {offsets = [1, 0, 0], sizes = [16, 16, 128], strides = [1, 1, 1]} : vector<18x18x128xf32> to vector<16x16x128xf32>
    %25 = vector.extract_strided_slice %16 {offsets = [1, 1, 0], sizes = [16, 16, 128], strides = [1, 1, 1]} : vector<18x18x128xf32> to vector<16x16x128xf32>
    %26 = vector.extract_strided_slice %16 {offsets = [1, 2, 0], sizes = [16, 16, 128], strides = [1, 1, 1]} : vector<18x18x128xf32> to vector<16x16x128xf32>
    %27 = tpu.concatenate %24, %25, %26 in 2 : vector<16x16x128xf32>, vector<16x16x128xf32>, vector<16x16x128xf32> -> vector<16x16x384xf32>
    %28 = vector.shape_cast %27 : vector<16x16x384xf32> to vector<256x384xf32>
    %c384 = arith.constant 384 : index
    %c0_19 = arith.constant 0 : index
    %29 = vector.load %arg5[%c384, %c0_19] : memref<1152x128xf32, #tpu.memory_space<vmem>>, vector<384x128xf32>
    %cst_20 = arith.constant dense<0.000000e+00> : vector<256x128xf32>
    %30 = tpu.matmul %28, %29, %cst_20 {dimension_numbers = #tpu.dot_dimension_numbers<[1], [0], [0], [1], [0, 0, 1, 1], [], []>} : vector<256x384xf32>, vector<384x128xf32>, vector<256x128xf32> -> vector<256x128xf32>
    %31 = arith.addf %23, %30 : vector<256x128xf32>
    %32 = vector.extract_strided_slice %16 {offsets = [2, 0, 0], sizes = [16, 16, 128], strides = [1, 1, 1]} : vector<18x18x128xf32> to vector<16x16x128xf32>
    %33 = vector.extract_strided_slice %16 {offsets = [2, 1, 0], sizes = [16, 16, 128], strides = [1, 1, 1]} : vector<18x18x128xf32> to vector<16x16x128xf32>
    %34 = vector.extract_strided_slice %16 {offsets = [2, 2, 0], sizes = [16, 16, 128], strides = [1, 1, 1]} : vector<18x18x128xf32> to vector<16x16x128xf32>
    %35 = tpu.concatenate %32, %33, %34 in 2 : vector<16x16x128xf32>, vector<16x16x128xf32>, vector<16x16x128xf32> -> vector<16x16x384xf32>
    %36 = vector.shape_cast %35 : vector<16x16x384xf32> to vector<256x384xf32>
    %c768 = arith.constant 768 : index
    %c0_21 = arith.constant 0 : index
    %37 = vector.load %arg5[%c768, %c0_21] : memref<1152x128xf32, #tpu.memory_space<vmem>>, vector<384x128xf32>
    %cst_22 = arith.constant dense<0.000000e+00> : vector<256x128xf32>
    %38 = tpu.matmul %36, %37, %cst_22 {dimension_numbers = #tpu.dot_dimension_numbers<[1], [0], [0], [1], [0, 0, 1, 1], [], []>} : vector<256x384xf32>, vector<384x128xf32>, vector<256x128xf32> -> vector<256x128xf32>
    %39 = arith.addf %31, %38 : vector<256x128xf32>
    %40 = vector.shape_cast %39 : vector<256x128xf32> to vector<16x16x128xf32>
    %c0_23 = arith.constant 0 : index
    %c0_24 = arith.constant 0 : index
    %c0_25 = arith.constant 0 : index
    %c0_26 = arith.constant 0 : index
    %41 = vector.load %arg6[%c0_23, %c0_24, %c0_25, %c0_26] : memref<1x16x16x128xf32, #tpu.memory_space<vmem>>, vector<1x16x16x128xf32>
    %42 = vector.shape_cast %41 : vector<1x16x16x128xf32> to vector<16x16x128xf32>
    %43 = vector.shape_cast %40 : vector<16x16x128xf32> to vector<1x16x16x128xf32>
    tpu.vector_store %arg6[%c0_23, %c0_24, %c0_25, %c0_26], %43 {strides = array<i32>} : memref<1x16x16x128xf32, #tpu.memory_space<vmem>>, vector<1x16x16x128xf32>,
    %cst_27 = arith.constant dense<0.000000e+00> : vector<128xf32>
    %44 = vector.multi_reduction <add>, %39, %cst_27 [0] : vector<256x128xf32> to vector<128xf32>
    %45 = vector.shape_cast %44 : vector<128xf32> to vector<1x128xf32>
    %46 = arith.mulf %39, %39 : vector<256x128xf32>
    %cst_28 = arith.constant dense<0.000000e+00> : vector<128xf32>
    %47 = vector.multi_reduction <add>, %46, %cst_28 [0] : vector<256x128xf32> to vector<128xf32>
    %48 = vector.shape_cast %47 : vector<128xf32> to vector<1x128xf32>
    %49 = tpu.concatenate %45, %48 in 0 : vector<1x128xf32>, vector<1x128xf32> -> vector<2x128xf32>
    %c0_29 = arith.constant 0 : index
    %c0_30 = arith.constant 0 : index
    %c0_31 = arith.constant 0 : index
    %c0_32 = arith.constant 0 : index
    %50 = vector.load %arg7[%c0_29, %c0_30, %c0_31, %c0_32] : memref<1x1x2x128xf32, #tpu.memory_space<vmem>>, vector<1x1x2x128xf32>
    %51 = vector.shape_cast %50 : vector<1x1x2x128xf32> to vector<2x128xf32>
    %52 = vector.shape_cast %49 : vector<2x128xf32> to vector<1x1x2x128xf32>
    tpu.vector_store %arg7[%c0_29, %c0_30, %c0_31, %c0_32], %52 {strides = array<i32>} : memref<1x1x2x128xf32, #tpu.memory_space<vmem>>, vector<1x1x2x128xf32>,
    return
  }
  func.func @transform_0(%arg0: i32, %arg1: i32) -> (i32, i32, i32, i32) {
    %c16_i32 = arith.constant 16 : i32
    %0 = arith.muli %arg1, %c16_i32 : i32
    %c1_i32 = arith.constant 1 : i32
    %1 = arith.subi %0, %c1_i32 : i32
    %c0_i32 = arith.constant 0 : i32
    %2 = arith.maxsi %1, %c0_i32 : i32
    %c0_i32_0 = arith.constant 0 : i32
    %c0_i32_1 = arith.constant 0 : i32
    %c0_i32_2 = arith.constant 0 : i32
    return %arg0, %2, %c0_i32_0, %c0_i32_1 : i32, i32, i32, i32
  }
  func.func @transform_1(%arg0: i32, %arg1: i32) -> (i32, i32, i32, i32) {
    %c0_i32 = arith.constant 0 : i32
    %c0_i32_0 = arith.constant 0 : i32
    %c0_i32_1 = arith.constant 0 : i32
    return %arg0, %arg1, %c0_i32, %c0_i32_0 : i32, i32, i32, i32
  }
  func.func @transform_2(%arg0: i32, %arg1: i32) -> (i32, i32, i32, i32) {
    %c1_i32 = arith.constant 1 : i32
    %0 = arith.addi %arg1, %c1_i32 : i32
    %c16_i32 = arith.constant 16 : i32
    %1 = arith.muli %0, %c16_i32 : i32
    %c15_i32 = arith.constant 15 : i32
    %2 = arith.minsi %1, %c15_i32 : i32
    %c0_i32 = arith.constant 0 : i32
    %c0_i32_0 = arith.constant 0 : i32
    %c0_i32_1 = arith.constant 0 : i32
    return %arg0, %2, %c0_i32, %c0_i32_0 : i32, i32, i32, i32
  }
  func.func @transform_3(%arg0: i32, %arg1: i32) -> (i32, i32) {
    %c0_i32 = arith.constant 0 : i32
    %c0_i32_0 = arith.constant 0 : i32
    %c0_i32_1 = arith.constant 0 : i32
    return %c0_i32, %c0_i32_0 : i32, i32
  }
  func.func @transform_4(%arg0: i32, %arg1: i32) -> (i32, i32, i32, i32) {
    %c0_i32 = arith.constant 0 : i32
    %c0_i32_0 = arith.constant 0 : i32
    %c0_i32_1 = arith.constant 0 : i32
    return %arg0, %arg1, %c0_i32, %c0_i32_0 : i32, i32, i32, i32
  }
  func.func @transform_5(%arg0: i32, %arg1: i32) -> (i32, i32, i32, i32) {
    %c0_i32 = arith.constant 0 : i32
    %c0_i32_0 = arith.constant 0 : i32
    %c0_i32_1 = arith.constant 0 : i32
    return %arg0, %arg1, %c0_i32, %c0_i32_0 : i32, i32, i32, i32
  }
}

</mosaic_0001>

<bundles_post_ra>
// kernel: tpu_custom_call.1
= control target key start
LH: loop header
LB: loop body
LE: loop exit
PB: predicated region body
PF: predicated region fallthrough
CT: control target
= control target key end

     0   :  { %s4397_s0 = inlined_call_operand.hbm [shape: f32[2,16,16,128], index: 0, kind: input, shape index: {}]   ;;  %s4398_s1 = inlined_call_operand.hbm [shape: f32[2,16,16,128], index: 1, kind: input, shape index: {}]   ;;  %s4399_s2 = inlined_call_operand.hbm [shape: f32[2,16,16,128], index: 2, kind: input, shape index: {}]   ;;  %s4400_s3 = inlined_call_operand.hbm [shape: f32[1152,128], index: 3, kind: input, shape index: {}]   ;;  %s4401_s4 = inlined_call_operand.hbm [shape: f32[2,16,16,128], index: 4, kind: output, shape index: {0}]   ;;  %s4402_s5 = inlined_call_operand.hbm [shape: f32[2,1,2,128], index: 5, kind: output, shape index: {1}]  }
   0x1   :  { %4503 = sst [smem:[#allocation101_spill]] %s4397_s0 }
   0x2   :  { %4504 = sst [smem:[#allocation102_spill]] %s4398_s1 }
   0x3   :  { %4505 = sst [smem:[#allocation103_spill]] %s4400_s3 }
   0x4   :  { %11 = vsyncpa [#allocation3], 0 }
   0x5   :  { %13 = vsyncpa [#allocation3 + $0x1], 0 }
   0x6   :  { %14 = vsyncpa [#allocation6], 0 }
   0x7   :  { %16 = vsyncpa [#allocation6 + $0x1], 0 }
   0x8   :  { %17 = vsyncpa [#allocation9], 0 }
   0x9   :  { %18 = vsyncpa [#allocation4], 0 }
   0xa   :  { %20 = vsyncpa [#allocation4 + $0x1], 0 }
   0xb   :  { %21 = vsyncpa [#allocation12], 0 }
   0xc   :  { %23 = vsyncpa [#allocation12 + $0x1], 0  ;;  %s3032_s18 = smov 0   ;;  %s3034_s19 = smov 0  }
   0xd   :  { %s3036_s20 = smov 0   ;;  %s3038_s21 = smov 0  }
   0xe   :  { %s3040_s22 = smov 0   ;;  %s3042_s23 = smov 0  }
   0xf LB: > { %4506 = sst [smem:[#allocation18_spill]] %s2983_s20  ;;  %s41_s24 = sadd.s32 1, %s2991_s22  ;;  %s2995_s23 = sphi %s3042_s23, %s29_s23   ;;  %s2991_s22 = sphi %s3040_s22, %s4723_s22   ;;  %s2987_s21 = sphi %s3038_s21, %s4722_s21   ;;  %s2983_s20 = sphi %s3036_s20, %s4721_s20   ;;  %s2979_s19 = sphi %s3034_s19, %s4725_s19   ;;  %s2975_s18 = sphi %s3032_s18, %s4724_s18  }
  0x10   : > { %4507 = sst [smem:[#allocation19_spill]] %s2991_s22  ;;  %s58_s25 = sadd.s32 1, %s2983_s20 }
  0x11   : > { %p43_p0 = scmp.ge.s32.totalorder %s41_s24, 2  ;;  %p65_p1 = scmp.ne.s32.totalorder %s2983_s20, %s2979_s19 }
  0x12   : > { %p66_p2 = scmp.eq.s32.totalorder %s2995_s23, 0  ;;  %p2487_p4 = scmp.ge.s32.totalorder %s2995_s23, 2 }
  0x13   : > { %s4727_s24 = smov (%p43_p0, %s41_s24), 0  ;;  %p2697_p6 = scmp.lt.s32.totalorder %s2995_s23, 2 }
  0x14   : > { %4508 = sst [smem:[#allocation20_spill]] %s4727_s24  ;;  %p67_p3 = por %p66_p2, %p65_p1 }
  0x15   : > { %s53_s26 = ssub.s32 %s2991_s22, %s4727_s24  ;;  %s3077_s27 = sand.u32 1, %s2983_s20  }
  0x16   : > { %p56_p5 = scmp.eq.s32.totalorder %s53_s26, 0  ;;  %s3080_s28 = sshll.u32 %s2991_s22, 8 }
  0x17   : > { %p3085_p7 = pnand %p2697_p6, %p67_p3  ;;  %s278_s6 = sand.u32 1, %s2995_s23  }
  0x18   : > { %s3083_s29 = scalar_select %p56_p5, %s2983_s20, %s58_s25  }
  0x19   : > { %s2491_s7 = sshll.u32 %s3077_s27, 8  ;;  %s4511_s1 = sld [smem:[#allocation102_spill]] }
  0x1a   : > { %4509 = sst [smem:[#allocation21_spill]] %s3083_s29  ;;  %s282_s11 = scalar_lea.vmem [#allocation5], %s2491_s7 }
  0x1b   : > { %s293_s12 = sshll.u32 %s282_s11, 4  ;;  %s3095_s14 = scalar_lea.sflag [#allocation6], %s278_s6  ;;  %s294_s12 = int_to_ptr.vmem [resolvable:$true] %s293_s12 }
  0x1c   : > { %s4403_s15 = smov 128   ;;  %s4405_s16 = smov 8  }
  0x1d   : > { %s3104_s17 = sadd.s32 4294967295, %s2995_s23   ;;  %s2484_s25 = sadd.s32 4294967294, %s2995_s23  }
  0x1e   : > { %p71_p8 = scmp.ne.s32.totalorder %s2979_s19, %s2975_s18  ;;  %p72_p9 = scmp.eq.s32.totalorder %s3104_s17, 0 }
  0x1f   : > { %s290_s10 = scalar_lea.hbm %s4511_s1, %s3080_s28  ;;  %p182_p10 = scmp.eq.s32.totalorder %s3104_s17, 1 }
  0x20   : > { %s291_s13 = sshll.u32 %s290_s10, 4  ;;  %p188_p11 = scmp.eq.s32.totalorder %s2484_s25, 1  ;;  %s292_s13 = int_to_ptr.hbm [resolvable:$true] %s291_s13 }
  0x21   : > { %2685 = dma.hbm_to_vmem [thread:$0]  (!%p3085_p7), %s292_s13, 4096, %s294_s12, %s3095_s14, %s4403_s15, %s4403_s15, %s4405_s16  }
  0x22   : > { %p2485_p12 = scmp.ge.s32.totalorder %s2995_s23, 1  ;;  %p3114_p13 = por %p72_p9, %p71_p8 }
  0x23   : > { %p3121_p0 = por %p182_p10, %p65_p1  ;;  %p3125_p2 = por %p188_p11, %p71_p8 }
  0x24   : > { %p223_p3 = scmp.lt.s32.totalorder %s2995_s23, 3  ;;  %s4515_s3 = sld [smem:[#allocation103_spill]] }
  0x25   : > { %s2999_s12 = smov [#allocation8]   ;;  %s2488_s25 = sshll.u32 %s3077_s27, 4 }
  0x26   : > { %p3133_p5 = pnand %p2485_p12, %p223_p3  ;;  %s236_s13 = sshll.u32 %s2999_s12, 4  ;;  %s237_s13 = int_to_ptr.vmem [resolvable:$true] %s236_s13 }
  0x27   : > { %s4517_s0 = sld [smem:[#allocation101_spill]]  ;;  %s254_s16 = scalar_lea.vmem [#allocation2], %s2488_s25 }
  0x28   : > { %p2675_p1 = pneg %p3133_p5  ;;  %s268_s1 = sshll.u32 %s254_s16, 4  ;;  %s269_s1 = int_to_ptr.vmem [resolvable:$true] %s268_s1 }
  0x29   : > { %s4518_s24 = smov 8   ;;  %s4519_s22 = smov 128  }
  0x2a   : > { %s234_s10 = sshll.u32 %s4515_s3, 4  ;;  %p2676_p6 = pnand %p2675_p1, %p72_p9  ;;  %s235_s10 = int_to_ptr.hbm [resolvable:$true] %s234_s10 }
  0x2b   : > { %s251_s12 = scalar_lea.sflag [#allocation3], %s3077_s27  ;;  %s2610_s29 = sadd.s32 240, %s3080_s28 }
  0x2c   : > { %2678 = dma.hbm_to_vmem [thread:$0]  (!%p2676_p6), %s235_s10, 18432, %s237_s13, [#allocation9], %s4519_s22, %s4519_s22, %s4518_s24  }
  0x2d   : > { %s265_s9 = scalar_lea.hbm %s4517_s0, %s3080_s28  ;;  %s307_s15 = scalar_lea.vmem [#allocation7], %s2488_s25 }
  0x2e   : > { %s266_s3 = sshll.u32 %s265_s9, 4  ;;  %s321_s8 = sshll.u32 %s307_s15, 4  ;;  %s267_s3 = int_to_ptr.hbm [resolvable:$true] %s266_s3  ;;  %s322_s8 = int_to_ptr.vmem [resolvable:$true] %s321_s8 }
  0x2f   : > { %2682 = dma.hbm_to_vmem [thread:$0]  (!%p3085_p7), %s267_s3, 256, %s269_s1, %s251_s12, %s4519_s22, %s4519_s22, %s4518_s24  }
  0x30   : > { %s318_s16 = scalar_lea.hbm %s4399_s2, %s2610_s29  ;;  %333 = sbr.rel (%p3133_p5) target bundleno = 821 (0x335), region = 36 }
  0x31   : > { %s319_s9 = sshll.u32 %s318_s16, 4  ;;  %s320_s9 = int_to_ptr.hbm [resolvable:$true] %s319_s9 }
  0x32   : > { %2688 = dma.hbm_to_vmem [thread:$0]  (!%p3085_p7), %s320_s9, 256, %s322_s8, %s3095_s14, %s4519_s22, %s4519_s22, %s4518_s24  }
  0x35   : > { %s3168_s1 = sand.u32 1, %s2979_s19  }
  0x36   : > { %s2498_s3 = sshll.u32 %s3168_s1, 4  ;;  %s336_s0 = scalar_lea.sflag [#allocation3], %s3168_s1 }
  0x37   : > { %s3172_s20 = scalar_lea.vmem [#allocation2], %s2498_s3 }
  0x38   : > { %2954 = dma.done.wait (%p3114_p13), %s336_s0, 256  }
  0x39   : > { %2956 = vsyncadd (%p3114_p13), %s336_s0, 4294967040  ;;  %s345_s22 = sand.u32 1, %s3104_s17   ;;  %s2499_s24 = sshll.u32 %s3168_s1, 8 }
  0x3a   : > { %s346_s27 = scalar_lea.sflag [#allocation6], %s345_s22  ;;  %s3182_s28 = scalar_lea.vmem [#allocation5], %s2499_s24 }
  0x3b   : > { %2958 = dma.done.wait (%p3114_p13), %s346_s27, 4352  }
  0x3c   : > { %2960 = vsyncadd (%p3114_p13), %s346_s27, 4294962944  ;;  %s3188_s29 = scalar_lea.vmem [#allocation7], %s2498_s3 }
  0x3d   : > { %2962 = dma.done.wait (%p72_p9), [#allocation9], 18432  }
  0x3e   : > { %2964 = vsyncadd (%p72_p9), [#allocation9], 4294948864  ;;  %v978_v0 = vld [vmem:[#allocation8 + $0x1f8] sm:$0xff]  ;;  %v977_v1 = vld [vmem:[#allocation8 + $0x1f0] sm:$0xff]  ;;  %vm496_vm0 = vcmask 1040384   ;;  %vm673_vm2 = vcmask 1046528  }
  0x3f   : > { %2613 = vmatpush.msra.mxu1 %v978_v0  ;;  %2614 = vmatpush.msra.mxu2 %v978_v0  ;;  %v976_v2 = vld [vmem:[#allocation8 + $0x1e8] sm:$0xff]  ;;  %v975_v3 = vld [vmem:[#allocation8 + $0x1e0] sm:$0xff]  ;;  %v974_v4 = vld [vmem:[#allocation8 + $0x1d8] sm:$0xff]  ;;  %vm786_vm3 = vcmask 1045504   ;;  %s4202_s30 = scalar_lea.vmem [#allocation10], %s2499_s24  ;;  %s2611_s14 = sshll.u32 %s2987_s21, 8 }
  0x40   : > { %2615 = vmatpush.msra.mxu3 %v978_v0  ;;  %1011 = vmatpush.msra.mxu0 %v978_v0  ;;  %v973_v5 = vld [vmem:[#allocation8 + $0x1d0] sm:$0xff]  ;;  %v972_v6 = vld [vmem:[#allocation8 + $0x1c8] sm:$0xff]  ;;  %v971_v7 = vld [vmem:[#allocation8 + $0x1c0] sm:$0xff]  ;;  %s2284_s10 = scalar_lea.hbm %s4401_s4, %s2611_s14  ;;  %s2285_s11 = sshll.u32 %s4202_s30, 4  ;;  %s2286_s11 = int_to_ptr.vmem [resolvable:$true] %s2285_s11 }
  0x41   : > { %2616 = vmatpush.msra.mxu1 %v977_v1  ;;  %2617 = vmatpush.msra.mxu2 %v977_v1  ;;  %v970_v8 = vld [vmem:[#allocation8 + $0x1b8] sm:$0xff]  ;;  %v969_v9 = vld [vmem:[#allocation8 + $0x1b0] sm:$0xff]  ;;  %v968_v10 = vld [vmem:[#allocation8 + $0x1a8] sm:$0xff]  ;;  %s2287_s13 = sshll.u32 %s2284_s10, 4  ;;  %s2265_s25 = scalar_lea.sflag [#allocation4], %s3168_s1  ;;  %s2288_s13 = int_to_ptr.hbm [resolvable:$true] %s2287_s13 }
  0x42   : > { %2618 = vmatpush.msra.mxu3 %v977_v1  ;;  %1012 = vmatpush.msra.mxu0 %v977_v1  ;;  %v967_v11 = vld [vmem:[#allocation8 + $0x1a0] sm:$0xff]  ;;  %v966_v12 = vld [vmem:[#allocation8 + $0x198] sm:$0xff]  ;;  %v965_v13 = vld [vmem:[#allocation8 + $0x190] sm:$0xff]  ;;  %s2887_s12 = sshra.s32 %s2288_s13, 4  ;;  %s2893_s9 = scalar_lea.hbm %s4401_s4, 512  ;;  %s2888_s12 = int_to_ptr.hbm [resolvable:$true] %s2887_s12 }
  0x43   : > { %2619 = vmatpush.msra.mxu1 %v976_v2  ;;  %2620 = vmatpush.msra.mxu2 %v976_v2  ;;  %v427_v14 = vld [vmem:[%s3182_s28 + $0x40] sm:$0xff]  ;;  %v964_v15 = vld [vmem:[#allocation8 + $0x188] sm:$0xff]  ;;  %vm3200_vm1 = vmneg %vm496_vm0  ;;  %s2889_s15 = scalar_lea.hbm %s2888_s12, 256  ;;  %p2894_p10 = scmp.lt.s32.totalorder %s2888_s12, %s4401_s4 }
  0x44   : > { %2621 = vmatpush.msra.mxu3 %v976_v2  ;;  %1013 = vmatpush.msra.mxu0 %v976_v2  ;;  %v435_v16 = vld [vmem:[%s3182_s28 + $0x80] sm:$0xff]  ;;  %v3197_v19 = vrot.slane %v427_v14, 7  ;;  %v1010_v23 = vld [vmem:[#allocation8 + $0x2f8] sm:$0xff]  ;;  %v3210_v25 = vld [vmem:[%s3182_s28 + $0x48] sm:$0xff]  ;;  %p2890_p7 = scmp.ne.s32.totalorder %s2888_s12, %s2889_s15  ;;  %p2895_p11 = scmp.lt.s32.totalorder %s2893_s9, %s2889_s15 }
  0x45   : > { %2622 = vmatpush.msra.mxu1 %v975_v3  ;;  %2623 = vmatpush.msra.mxu2 %v975_v3  ;;  %v443_v17 = vld [vmem:[%s3182_s28 + $0xc0] sm:$0xff]  ;;  %v3204_v21 = vrot.slane %v435_v16, 7  ;;  %v914_v26 = vld [vmem:[#allocation8 + $0x78] sm:$0xff]  ;;  %v3213_v27 = vld [vmem:[%s3182_s28 + $0x88] sm:$0xff]  ;;  %v4421_v33 = vrot.slane %v3210_v25, 7 }
  0x46   : > { %2624 = vmatpush.msra.mxu3 %v975_v3  ;;  %1014 = vmatpush.msra.mxu0 %v975_v3  ;;  %v963_v18 = vld [vmem:[#allocation8 + $0x180] sm:$0xff]  ;;  %4520 = vst [vmem:[#allocation22_spill] sm:$0xff] %v3197_v19  ;;  %v3206_v22 = vrot.slane %v443_v17, 7  ;;  %v3216_v28 = vld [vmem:[%s3182_s28 + $0xc8] sm:$0xff]  ;;  %v994_v29 = vld [vmem:[#allocation8 + $0x278] sm:$0xff]  ;;  %v4416_v34 = vrot.slane %v3213_v27, 7  ;;  %p2891_p8 = pnand %p2890_p7, %p3121_p0  ;;  %p2896_p12 = por %p2895_p11, %p2894_p10 }
  0x47   : > { %2625 = vmatpush.msra.mxu1 %v974_v4  ;;  %2626 = vmatpush.msra.mxu2 %v974_v4  ;;  %v419_v24 = vld [vmem:[%s3182_s28] sm:$0xff]  ;;  %v1009_v30 = vld [vmem:[#allocation8 + $0x2f0] sm:$0xff]  ;;  %v4412_v35 = vrot.slane %v3216_v28, 7  ;;  %v1008_v37 = vld [vmem:[#allocation8 + $0x2e8] sm:$0xff]  ;;  %v3242_v42 = vsel %vm496_vm0, %v3197_v19, %v4421_v33 }
  0x48   : > { %2627 = vmatpush.msra.mxu3 %v974_v4  ;;  %1015 = vmatpush.msra.mxu0 %v974_v4  ;;  %v913_v31 = vld [vmem:[#allocation8 + $0x70] sm:$0xff]  ;;  %v3227_v32 = vrot.slane %v419_v24, 7  ;;  %v912_v38 = vld [vmem:[#allocation8 + $0x68] sm:$0xff]  ;;  %v930_v40 = vld [vmem:[#allocation8 + $0xf8] sm:$0xff]  ;;  %4523 = vst [vmem:[#allocation23_spill] sm:$0xff] %v3242_v42  ;;  %v3248_v44 = vsel %vm496_vm0, %v3204_v21, %v4416_v34  ;;  %p2892_p9 = pneg %p2891_p8 }
  0x49   : > { %2628 = vmatpush.msra.mxu1 %v973_v5  ;;  %2629 = vmatpush.msra.mxu2 %v973_v5  ;;  %v993_v36 = vld [vmem:[#allocation8 + $0x270] sm:$0xff]  ;;  %v3233_v39 = vld [vmem:[%s3182_s28 + $0x8] sm:$0xff]  ;;  %v1007_v43 = vld [vmem:[#allocation8 + $0x2e0] sm:$0xff]  ;;  %v3254_v45 = vsel %vm496_vm0, %v3206_v22, %v4412_v35 }
  0x4a   : > { %2630 = vmatpush.msra.mxu3 %v973_v5  ;;  %1016 = vmatpush.msra.mxu0 %v973_v5  ;;  %v992_v41 = vld [vmem:[#allocation8 + $0x268] sm:$0xff]  ;;  %v501_v46 = vrot.slane %v3233_v39, 7  ;;  %v911_v47 = vld [vmem:[#allocation8 + $0x60] sm:$0xff]  ;;  %v929_v48 = vld [vmem:[#allocation8 + $0xf0] sm:$0xff]  ;;  %p2897_p13 = pnand %p2896_p12, %p2892_p9 }
  0x4b   : > { %2631 = vmatpush.msra.mxu1 %v972_v6  ;;  %2632 = vmatpush.msra.mxu2 %v972_v6  ;;  %v1006_v49 = vld [vmem:[#allocation8 + $0x2d8] sm:$0xff]  ;;  %v991_v50 = vld [vmem:[#allocation8 + $0x260] sm:$0xff]  ;;  %v429_v51 = vld [vmem:[%s3182_s28 + $0x50] sm:$0xff] }
  0x4c   : > { %2633 = vmatpush.msra.mxu3 %v972_v6  ;;  %1017 = vmatpush.msra.mxu0 %v972_v6  ;;  %v910_v52 = vld [vmem:[#allocation8 + $0x58] sm:$0xff]  ;;  %v928_v53 = vld [vmem:[#allocation8 + $0xe8] sm:$0xff]  ;;  %v3265_v54 = vsel %vm496_vm0, %v3227_v32, %v501_v46  ;;  %v437_v55 = vld [vmem:[%s3182_s28 + $0x90] sm:$0xff]  ;;  %v3269_v60 = vrot.slane %v429_v51, 7 }
  0x4d   : > { %2634 = vmatpush.msra.mxu1 %v971_v7  ;;  %2635 = vmatpush.msra.mxu2 %v971_v7  ;;  %v445_v56 = vld [vmem:[%s3182_s28 + $0xd0] sm:$0xff]  ;;  %v927_v59 = vld [vmem:[#allocation8 + $0xe0] sm:$0xff]  ;;  %v990_v61 = vld [vmem:[#allocation8 + $0x258] sm:$0xff]  ;;  %v3272_v63 = vrot.slane %v437_v55, 7 }
  0x4e   : > { %2636 = vmatpush.msra.mxu3 %v971_v7  ;;  %1018 = vmatpush.msra.mxu0 %v971_v7  ;;  %v1005_v57 = vld [vmem:[#allocation8 + $0x2d0] sm:$0xff]  ;;  %4524 = vst [vmem:[#allocation24_spill] sm:$0xff] %v3269_v60  ;;  %v1004_v62 = vld [vmem:[#allocation8 + $0x2c8] sm:$0xff]  ;;  %v3274_v0 = vrot.slane %v445_v56, 7  ;;  %v3278_v3 = vld [vmem:[%s3182_s28 + $0x58] sm:$0xff] }
  0x4f   : > { %2637 = vmatpush.msra.mxu1 %v970_v8  ;;  %2638 = vmatpush.msra.mxu2 %v970_v8  ;;  %v909_v58 = vld [vmem:[#allocation8 + $0x50] sm:$0xff]  ;;  %v908_v1 = vld [vmem:[#allocation8 + $0x48] sm:$0xff]  ;;  %v3281_v4 = vld [vmem:[%s3182_s28 + $0x98] sm:$0xff] }
  0x50   : > { %2639 = vmatpush.msra.mxu3 %v970_v8  ;;  %1019 = vmatpush.msra.mxu0 %v970_v8  ;;  %v421_v2 = vld [vmem:[%s3182_s28 + $0x10] sm:$0xff]  ;;  %v3284_v5 = vld [vmem:[%s3182_s28 + $0xd8] sm:$0xff]  ;;  %v1003_v8 = vld [vmem:[#allocation8 + $0x2c0] sm:$0xff]  ;;  %v4414_v14 = vrot.slane %v3281_v4, 7 }
  0x51   : > { %2640 = vmatpush.msra.mxu1 %v969_v9  ;;  %2641 = vmatpush.msra.mxu2 %v969_v9  ;;  %v926_v6 = vld [vmem:[#allocation8 + $0xd8] sm:$0xff]  ;;  %v989_v7 = vld [vmem:[#allocation8 + $0x250] sm:$0xff]  ;;  %v987_v24 = vld [vmem:[#allocation8 + $0x240] sm:$0xff] }
  0x52   : > { %2642 = vmatpush.msra.mxu3 %v969_v9  ;;  %1020 = vmatpush.msra.mxu0 %v969_v9  ;;  %v907_v9 = vld [vmem:[#allocation8 + $0x40] sm:$0xff]  ;;  %v1002_v16 = vld [vmem:[#allocation8 + $0x2b8] sm:$0xff]  ;;  %v921_v56 = vld [vmem:[#allocation8 + $0xb0] sm:$0xff] }
  0x53   : > { %2643 = vmatpush.msra.mxu1 %v968_v10  ;;  %2644 = vmatpush.msra.mxu2 %v968_v10  ;;  %v3301_v17 = vld [vmem:[%s3182_s28 + $0x18] sm:$0xff]  ;;  %v439_v51 = vld [vmem:[%s3182_s28 + $0xa0] sm:$0xff] }
  0x54   : > { %2645 = vmatpush.msra.mxu3 %v968_v10  ;;  %1021 = vmatpush.msra.mxu0 %v968_v10  ;;  %v3295_v10 = vrot.slane %v421_v2, 7  ;;  %v903_v55 = vld [vmem:[#allocation8 + $0x20] sm:$0xff] }
  0x55   : > { %2646 = vmatpush.msra.mxu1 %v967_v11  ;;  %2647 = vmatpush.msra.mxu2 %v967_v11  ;;  %v423_v2 = vld [vmem:[%s3182_s28 + $0x20] sm:$0xff] }
  0x56   : > { %2648 = vmatpush.msra.mxu3 %v967_v11  ;;  %1022 = vmatpush.msra.mxu0 %v967_v11  ;;  %v4420_v11 = vrot.slane %v3278_v3, 7 }
  0x57   : > { %2649 = vmatpush.msra.mxu1 %v966_v12  ;;  %2650 = vmatpush.msra.mxu2 %v966_v12 }
  0x58   : > { %2651 = vmatpush.msra.mxu3 %v966_v12  ;;  %1023 = vmatpush.msra.mxu0 %v966_v12  ;;  %v925_v12 = vld [vmem:[#allocation8 + $0xd0] sm:$0xff] }
  0x59   : > { %2652 = vmatpush.msra.mxu1 %v965_v13  ;;  %2653 = vmatpush.msra.mxu2 %v965_v13 }
  0x5a   : > { %2654 = vmatpush.msra.mxu3 %v965_v13  ;;  %1024 = vmatpush.msra.mxu0 %v965_v13  ;;  %v988_v13 = vld [vmem:[#allocation8 + $0x248] sm:$0xff] }
  0x5b   : > { %2655 = vmatpush.msra.mxu1 %v964_v15  ;;  %2656 = vmatpush.msra.mxu2 %v964_v15 }
  0x5c   : > { %2657 = vmatpush.msra.mxu3 %v964_v15  ;;  %1025 = vmatpush.msra.mxu0 %v964_v15  ;;  %v4411_v15 = vrot.slane %v3284_v5, 7 }
  0x5d   : > { %2658 = vmatpush.msra.mxu1 %v963_v18  ;;  %2659 = vmatpush.msra.mxu2 %v963_v18 }
  0x5e   : > { %2660 = vmatpush.msra.mxu3 %v963_v18  ;;  %2513 = vmatmul.msk.f32.vlgmr.msra.gmra.mxu1 %vm3200_vm1, %v3197_v19 }
  0x5f   : > { %2521 = vmatmul.msk.f32.vlgmr.msra.gmra.mxu2 %vm3200_vm1, %v3204_v21  ;;  %2529 = vmatmul.msk.f32.vlgmr.msra.gmra.mxu3 %vm3200_vm1, %v3206_v22 }
  0x60   : > { %1237 = vmatpush.msrb.mxu2 %v1010_v23  ;;  %1350 = vmatpush.msrb.mxu3 %v914_v26  ;;  %v924_v23 = vld [vmem:[#allocation8 + $0xc8] sm:$0xff]  ;;  %v1001_v26 = vld [vmem:[#allocation8 + $0x2b0] sm:$0xff] }
  0x61   : > { %1026 = vmatpush.msra.mxu0 %v963_v18  ;;  %1124 = vmatpush.msrb.mxu1 %v994_v29  ;;  %v906_v18 = vld [vmem:[#allocation8 + $0x38] sm:$0xff]  ;;  %v3310_v29 = vsel %vm496_vm0, %v3269_v60, %v4420_v11  ;;  %v793_v11 = vrot.slane %v3265_v54, 2 }
  0x62   : > { %1238 = vmatpush.msrb.mxu2 %v1009_v30  ;;  %1351 = vmatpush.msrb.mxu3 %v913_v31  ;;  %4525 = vst [vmem:[#allocation25_spill] sm:$0xff] %v3310_v29  ;;  %v905_v30 = vld [vmem:[#allocation8 + $0x30] sm:$0xff]  ;;  %v3316_v31 = vsel %vm496_vm0, %v3272_v63, %v4414_v14 }
  0x63   : > { %2505 = vmatmul.msk.f32.vlgmr.msra.gmra.mxu0 %vm3200_vm1, %v3227_v32  ;;  %1125 = vmatpush.msrb.mxu1 %v993_v36  ;;  %v3322_v36 = vsel %vm496_vm0, %v3274_v0, %v4411_v15 }
  0x64   : > { %1239 = vmatpush.msrb.mxu2 %v1008_v37  ;;  %1352 = vmatpush.msrb.mxu3 %v912_v38  ;;  %v4424_v37 = vrot.slane %v3301_v17, 7  ;;  %v923_v38 = vld [vmem:[#allocation8 + $0xc0] sm:$0xff] }
  0x65   : > { %1463 = vmatpush.msrb.mxu0 %v930_v40  ;;  %1126 = vmatpush.msrb.mxu1 %v992_v41  ;;  %v986_v40 = vld [vmem:[#allocation8 + $0x238] sm:$0xff]  ;;  %v1000_v41 = vld [vmem:[#allocation8 + $0x2a8] sm:$0xff] }
  0x66   : > { %1054 = vmatmul.f32.gmra.mxu1 %v3242_v42  ;;  %1240 = vmatpush.msrb.mxu2 %v1007_v43  ;;  %v904_v43 = vld [vmem:[#allocation8 + $0x28] sm:$0xff] }
  0x67   : > { %1078 = vmatmul.f32.gmra.mxu2 %v3248_v44  ;;  %1102 = vmatmul.f32.gmra.mxu3 %v3254_v45 }
  0x68   : > { %1353 = vmatpush.msrb.mxu3 %v911_v47  ;;  %1464 = vmatpush.msrb.mxu0 %v929_v48  ;;  %v431_v47 = vld [vmem:[%s3182_s28 + $0x60] sm:$0xff]  ;;  %v922_v48 = vld [vmem:[#allocation8 + $0xb8] sm:$0xff] }
  0x69   : > { %1241 = vmatpush.msrb.mxu2 %v1006_v49  ;;  %1127 = vmatpush.msrb.mxu1 %v991_v50  ;;  %v985_v49 = vld [vmem:[#allocation8 + $0x230] sm:$0xff]  ;;  %v3333_v50 = vsel %vm496_vm0, %v3295_v10, %v4424_v37 }
  0x6a   : > { %1354 = vmatpush.msrb.mxu3 %v910_v52  ;;  %1465 = vmatpush.msrb.mxu0 %v928_v53  ;;  %4526 = vst [vmem:[#allocation26_spill] sm:$0xff] %v3333_v50  ;;  %v447_v52 = vld [vmem:[%s3182_s28 + $0xe0] sm:$0xff] }
  0x6b   : > { %1030 = vmatmul.f32.gmra.mxu0 %v3265_v54  ;;  %1242 = vmatpush.msrb.mxu2 %v1005_v57  ;;  %v999_v53 = vld [vmem:[#allocation8 + $0x2a0] sm:$0xff]  ;;  %v3337_v57 = vrot.slane %v431_v47, 7  ;;  %v918_v47 = vld [vmem:[#allocation8 + $0x98] sm:$0xff] }
  0x6c   : > { %1355 = vmatpush.msrb.mxu3 %v909_v58  ;;  %1466 = vmatpush.msrb.mxu0 %v927_v59  ;;  %v984_v58 = vld [vmem:[#allocation8 + $0x228] sm:$0xff]  ;;  %v998_v59 = vld [vmem:[#allocation8 + $0x298] sm:$0xff] }
  0x6d   : > { %1128 = vmatpush.msrb.mxu1 %v990_v61  ;;  %1243 = vmatpush.msrb.mxu2 %v1004_v62  ;;  %4527 = vst [vmem:[#allocation27_spill] sm:$0xff] %v3337_v57  ;;  %v3340_v61 = vrot.slane %v439_v51, 7  ;;  %v3342_v62 = vrot.slane %v447_v52, 7  ;;  %v899_v52 = vld [vmem:[#allocation8] sm:$0xff] }
  0x6e   : > { %2515 = vmatmul.msk.f32.gmra.mxu1 %vm3200_vm1, %v3269_v60  ;;  %1356 = vmatpush.msrb.mxu3 %v908_v1  ;;  %v902_v1 = vld [vmem:[#allocation8 + $0x18] sm:$0xff] }
  0x6f   : > { %2523 = vmatmul.msk.f32.gmra.mxu2 %vm3200_vm1, %v3272_v63  ;;  %2531 = vmatmul.msk.f32.gmra.mxu3 %vm3200_vm1, %v3274_v0 }
  0x70   : > { %1467 = vmatpush.msrb.mxu0 %v926_v6  ;;  %1129 = vmatpush.msrb.mxu1 %v989_v7  ;;  %v3346_v6 = vld [vmem:[%s3182_s28 + $0x68] sm:$0xff] }
  0x71   : > { %1244 = vmatpush.msrb.mxu2 %v1003_v8  ;;  %1357 = vmatpush.msrb.mxu3 %v907_v9  ;;  %v3349_v7 = vld [vmem:[%s3182_s28 + $0xa8] sm:$0xff] }
  0x72   : > { %1468 = vmatpush.msrb.mxu0 %v925_v12  ;;  %1130 = vmatpush.msrb.mxu1 %v988_v13  ;;  %v3352_v8 = vld [vmem:[%s3182_s28 + $0xe8] sm:$0xff]  ;;  %v983_v12 = vld [vmem:[#allocation8 + $0x220] sm:$0xff]  ;;  %v997_v13 = vld [vmem:[#allocation8 + $0x290] sm:$0xff] }
  0x73   : > { %2507 = vmatmul.msk.f32.gmra.mxu0 %vm3200_vm1, %v3295_v10  ;;  %1245 = vmatpush.msrb.mxu2 %v1002_v16  ;;  %v920_v9 = vld [vmem:[#allocation8 + $0xa8] sm:$0xff]  ;;  %v901_v16 = vld [vmem:[#allocation8 + $0x10] sm:$0xff] }
  0x74   : > { %1358 = vmatpush.msrb.mxu3 %v906_v18  ;;  %1469 = vmatpush.msrb.mxu0 %v924_v23  ;;  %v3363_v18 = vrot.slane %v423_v2, 7  ;;  %v4418_v23 = vrot.slane %v3346_v6, 7  ;;  %v1736_v2 = vld [vmem:[#allocation8 + $0x3f8] sm:$0xff] }
  0x75   : > { %1131 = vmatpush.msrb.mxu1 %v987_v24  ;;  %1246 = vmatpush.msrb.mxu2 %v1001_v26  ;;  %v919_v24 = vld [vmem:[#allocation8 + $0xa0] sm:$0xff]  ;;  %v982_v26 = vld [vmem:[#allocation8 + $0x218] sm:$0xff] }
  0x76   : > { %1060 = vmatmul.f32.gmra.mxu1 %v3310_v29  ;;  %1359 = vmatpush.msrb.mxu3 %v905_v30  ;;  %4528 = vst [vmem:[#allocation28_spill] sm:$0xff] %v3363_v18  ;;  %v4413_v30 = vrot.slane %v3349_v7, 7  ;;  %v3378_v51 = vsel %vm496_vm0, %v3337_v57, %v4418_v23  ;;  %v1751_v23 = vld [vmem:[#allocation8 + $0x470] sm:$0xff] }
  0x77   : > { %1084 = vmatmul.f32.gmra.mxu2 %v3316_v31  ;;  %1108 = vmatmul.f32.gmra.mxu3 %v3322_v36  ;;  %4529 = vst [vmem:[#allocation29_spill] sm:$0xff] %v3378_v51 }
  0x78   : > { %1470 = vmatpush.msrb.mxu0 %v923_v38  ;;  %1132 = vmatpush.msrb.mxu1 %v986_v40  ;;  %v4410_v38 = vrot.slane %v3352_v8, 7  ;;  %v996_v40 = vld [vmem:[#allocation8 + $0x288] sm:$0xff] }
  0x79   : > { %1247 = vmatpush.msrb.mxu2 %v1000_v41  ;;  %1360 = vmatpush.msrb.mxu3 %v904_v43  ;;  %v3369_v41 = vld [vmem:[%s3182_s28 + $0x28] sm:$0xff] }
  0x7a   : > { %1471 = vmatpush.msrb.mxu0 %v922_v48  ;;  %1133 = vmatpush.msrb.mxu1 %v985_v49  ;;  %v900_v43 = vld [vmem:[#allocation8 + $0x8] sm:$0xff]  ;;  %v981_v48 = vld [vmem:[#allocation8 + $0x210] sm:$0xff]  ;;  %v995_v49 = vld [vmem:[#allocation8 + $0x280] sm:$0xff] }
  0x7b   : > { %1036 = vmatmul.f32.gmra.mxu0 %v3333_v50  ;;  %1248 = vmatpush.msrb.mxu2 %v999_v53  ;;  %v3384_v53 = vsel %vm496_vm0, %v3340_v61, %v4413_v30  ;;  %v606_v30 = vsel %vm496_vm0, 0.0, %v3227_v32 }
  0x7c   : > { %1361 = vmatpush.msrb.mxu3 %v903_v55  ;;  %1472 = vmatpush.msrb.mxu0 %v921_v56  ;;  %v3390_v55 = vsel %vm496_vm0, %v3342_v62, %v4410_v38  ;;  %v4422_v56 = vrot.slane %v3369_v41, 7  ;;  %v3439_v38 = vld [vmem:[%s3182_s28 + $0x38] sm:$0xff] }
  0x7d   : > { %1134 = vmatpush.msrb.mxu1 %v984_v58  ;;  %1249 = vmatpush.msrb.mxu2 %v998_v59  ;;  %v917_v58 = vld [vmem:[#allocation8 + $0x90] sm:$0xff]  ;;  %v980_v59 = vld [vmem:[#allocation8 + $0x208] sm:$0xff] }
  0x7e   : > { %2517 = vmatmul.msk.f32.gmra.mxu1 %vm3200_vm1, %v3337_v57  ;;  %1362 = vmatpush.msrb.mxu3 %v902_v1  ;;  %v1720_v1 = vld [vmem:[#allocation8 + $0x378] sm:$0xff] }
  0x7f   : > { %2525 = vmatmul.msk.f32.gmra.mxu2 %vm3200_vm1, %v3340_v61  ;;  %2533 = vmatmul.msk.f32.gmra.mxu3 %vm3200_vm1, %v3342_v62 }
  0x80   : > { %1473 = vmatpush.msrb.mxu0 %v920_v9  ;;  %1135 = vmatpush.msrb.mxu1 %v983_v12  ;;  %v433_v9 = vld [vmem:[%s3182_s28 + $0x70] sm:$0xff]  ;;  %v979_v12 = vld [vmem:[#allocation8 + $0x200] sm:$0xff] }
  0x81   : > { %1250 = vmatpush.msrb.mxu2 %v997_v13  ;;  %1363 = vmatpush.msrb.mxu3 %v901_v16  ;;  %v916_v13 = vld [vmem:[#allocation8 + $0x88] sm:$0xff]  ;;  %v3401_v16 = vsel %vm496_vm0, %v3363_v18, %v4422_v56 }
  0x82   : > { %1474 = vmatpush.msrb.mxu0 %v919_v24  ;;  %1136 = vmatpush.msrb.mxu1 %v982_v26  ;;  %4530 = vst [vmem:[#allocation30_spill] sm:$0xff] %v3401_v16  ;;  %v441_v24 = vld [vmem:[%s3182_s28 + $0xb0] sm:$0xff] }
  0x83   : > { %2509 = vmatmul.msk.f32.gmra.mxu0 %vm3200_vm1, %v3363_v18  ;;  %1251 = vmatpush.msrb.mxu2 %v996_v40  ;;  %v449_v26 = vld [vmem:[%s3182_s28 + $0xf0] sm:$0xff]  ;;  %v946_v40 = vld [vmem:[#allocation8 + $0x178] sm:$0xff] }
  0x84   : > { %1364 = vmatpush.msrb.mxu3 %v900_v43  ;;  %1475 = vmatpush.msrb.mxu0 %v918_v47  ;;  %v915_v43 = vld [vmem:[#allocation8 + $0x80] sm:$0xff]  ;;  %v3405_v47 = vrot.slane %v433_v9, 7  ;;  %v418_v9 = vld [vmem:[%s3172_s20 + $0x8] sm:$0xff] }
  0x85   : > { %1137 = vmatpush.msrb.mxu1 %v981_v48  ;;  %1252 = vmatpush.msrb.mxu2 %v995_v49  ;;  %v1752_v48 = vld [vmem:[#allocation8 + $0x478] sm:$0xff]  ;;  %v3408_v49 = vrot.slane %v441_v24, 7  ;;  %v1719_v24 = vld [vmem:[#allocation8 + $0x370] sm:$0xff]  ;;  %v457_v15 = vmul.f32 0.0, %v418_v9 }
  0x86   : > { %1066 = vmatmul.f32.gmra.mxu1 %v3378_v51  ;;  %1365 = vmatpush.msrb.mxu3 %v899_v52  ;;  %4531 = vst [vmem:[#allocation31_spill] sm:$0xff] %v3405_v47  ;;  %v3410_v52 = vrot.slane %v449_v26, 7  ;;  %v1735_v26 = vld [vmem:[#allocation8 + $0x3f0] sm:$0xff] }
  0x87   : > { %1090 = vmatmul.f32.gmra.mxu2 %v3384_v53  ;;  %1114 = vmatmul.f32.gmra.mxu3 %v3390_v55  ;;  %v498_v14 = vrot.slane %v457_v15, 7  ;;  %v792_v15 = vrot.slane %v606_v30, 2 }
  0x88   : > { %1476 = vmatpush.msrb.mxu0 %v917_v58  ;;  %1138 = vmatpush.msrb.mxu1 %v980_v59  ;;  %4532 = vst [vmem:[#allocation32_spill] sm:$0xff] %v3410_v52  ;;  %v425_v58 = vld [vmem:[%s3182_s28 + $0x30] sm:$0xff]  ;;  %v3414_v59 = vld [vmem:[%s3182_s28 + $0x78] sm:$0xff] }
  0x89   : > { %1753 = vmatpush.msra.mxu2 %v1720_v1  ;;  %1866 = vmatpush.msra.mxu3 %v1736_v2  ;;  %v3417_v1 = vld [vmem:[%s3182_s28 + $0xb8] sm:$0xff]  ;;  %v3497_v39 = vsel %vm496_vm0, %v498_v14, 0.0 }
  0x8a   : > { %1139 = vmatpush.msrb.mxu1 %v979_v12  ;;  %1477 = vmatpush.msrb.mxu0 %v916_v13  ;;  %v3420_v2 = vld [vmem:[%s3182_s28 + $0xf8] sm:$0xff]  ;;  %v3432_v12 = vrot.slane %v425_v58, 7  ;;  %v4417_v13 = vrot.slane %v3414_v59, 7 }
  0x8b   : > { %1042 = vmatmul.f32.gmra.mxu0 %v3401_v16  ;;  %4533 = vst [vmem:[#allocation33_spill] sm:$0xff] %v3420_v2  ;;  %1754 = vmatpush.msra.mxu2 %v1719_v24 }
  0x8c   : > { %1576 = vmatpush.msra.mxu1 %v946_v40  ;;  %1478 = vmatpush.msrb.mxu0 %v915_v43  ;;  %4534 = vst [vmem:[#allocation34_spill] sm:$0xff] %v3432_v12  ;;  %v4415_v40 = vrot.slane %v3417_v1, 7  ;;  %v4419_v43 = vrot.slane %v3420_v2, 7  ;;  %v3448_v58 = vsel %vm496_vm0, %v3405_v47, %v4417_v13  ;;  %v945_v13 = vld [vmem:[#allocation8 + $0x170] sm:$0xff]  ;;  %v1718_v2 = vld [vmem:[#allocation8 + $0x368] sm:$0xff] }
  0x8d   : > { %1867 = vmatpush.msra.mxu3 %v1735_v26  ;;  %v4423_v26 = vrot.slane %v3439_v38, 7  ;;  %1755 = vmatpush.msra.mxu2 %v1718_v2 }
  0x8e   : > { %1979 = vmatpush.msra.mxu0 %v1752_v48  ;;  %2519 = vmatmul.msk.f32.gmra.mxu1 %vm3200_vm1, %v3405_v47  ;;  %v417_v48 = vld [vmem:[%s3172_s20] sm:$0xff]  ;;  %v3454_v24 = vsel %vm496_vm0, %v3408_v49, %v4415_v40  ;;  %v3460_v9 = vsel %vm496_vm0, %v3410_v52, %v4419_v43  ;;  %v680_v40 = vrot.slane %v3265_v54, 1 }
  0x8f   : > { %2527 = vmatmul.msk.f32.gmra.mxu2 %vm3200_vm1, %v3408_v49  ;;  %2535 = vmatmul.msk.f32.gmra.mxu3 %vm3200_vm1, %v3410_v52  ;;  %v456_v35 = vmul.f32 0.0, %v417_v48  ;;  %4535 = vst [vmem:[#allocation35_spill] sm:$0xff] %v3460_v9  ;;  %v679_v48 = vrot.slane %v606_v30, 1  ;;  %v3473_v43 = vsel %vm496_vm0, %v3432_v12, %v4423_v26  ;;  %v3485_v26 = vsel %vm786_vm3, %v792_v15, %v793_v11 }
  0x90   : > { %4536 = vst [vmem:[#allocation36_spill] sm:$0xff] %v3473_v43  ;;  %1577 = vmatpush.msra.mxu1 %v945_v13  ;;  %1980 = vmatpush.msra.mxu0 %v1751_v23  ;;  %v624_v30 = vsel %vm496_vm0, %v501_v46, 0.0 }
  0x91   : > { %v497_v34 = vrot.slane %v456_v35, 7  ;;  %v681_v56 = vsel %vm673_vm2, %v679_v48, %v680_v40  ;;  %4537 = vst [vmem:[#allocation37_spill] sm:$0xff] %v3485_v26  ;;  %v682_v37 = vrot.slane %v624_v30, 1  ;;  %v1734_v48 = vld [vmem:[#allocation8 + $0x3e8] sm:$0xff] }
  0x92   : > { %1868 = vmatpush.msra.mxu3 %v1734_v48 }
  0x93   : > { %2511 = vmatmul.msk.f32.gmra.mxu0 %vm3200_vm1, %v3432_v12  ;;  %v3477_v33 = vsel %vm496_vm0, %v497_v34, %v498_v14  ;;  %v3480_v35 = vsel %vm496_vm0, 0.0, %v497_v34  ;;  %v683_v46 = vsel %vm673_vm2, %v680_v40, %v682_v37  ;;  %v685_v14 = vrot.slane %v3333_v50, 1 }
  0x94   : > { %v675_v23 = vrot.slane %v3477_v33, 1  ;;  %v674_v13 = vrot.slane %v3480_v35, 1  ;;  %v798_v40 = vrot.slane %v3333_v50, 2 }
  0x96   : > { %1072 = vmatmul.f32.gmra.mxu1 %v3448_v58  ;;  %v676_v15 = vsel %vm673_vm2, %v674_v13, %v675_v23  ;;  %v1750_v13 = vld [vmem:[#allocation8 + $0x468] sm:$0xff] }
  0x97   : > { %1096 = vmatmul.f32.gmra.mxu2 %v3454_v24  ;;  %1120 = vmatmul.f32.gmra.mxu3 %v3460_v9  ;;  %v795_v9 = vrot.slane %v624_v30, 2  ;;  %v944_v30 = vld [vmem:[#allocation8 + $0x168] sm:$0xff] }
  0x98   : > { %1578 = vmatpush.msra.mxu1 %v944_v30  ;;  %1981 = vmatpush.msra.mxu0 %v1750_v13  ;;  %v608_v13 = vsel %vm496_vm0, 0.0, %v3363_v18 }
  0x99   : > { %v3501_v52 = vsel %vm786_vm3, %v793_v11, %v795_v9 }
  0x9a   : > { %4538 = vst [vmem:[#allocation38_spill] sm:$0xff] %v3501_v52 }
  0x9b   : > { %1048 = vmatmul.f32.gmra.mxu0 %v3473_v43 }
  0x9e   : > { %1140 = vmatmul.f32.vlgmr.msrb.gmra.mxu1 %v681_v56 }
  0x9f   : > { %1253 = vmatmul.f32.vlgmr.msrb.gmra.mxu2 %v3485_v26  ;;  %2537 = vmatmul.msk.f32.vlgmr.msrb.gmra.mxu3 %vm3200_vm1, %v497_v34  ;;  %v607_v34 = vsel %vm496_vm0, 0.0, %v3295_v10  ;;  %v677_v26 = vrot.slane %v3497_v39, 1 }
  0xa0   : > { %v684_v2 = vrot.slane %v607_v34, 1  ;;  %v797_v37 = vrot.slane %v607_v34, 2  ;;  %v1733_v34 = vld [vmem:[#allocation8 + $0x3e0] sm:$0xff] }
  0xa1   : > { %v678_v11 = vsel %vm673_vm2, %v675_v23, %v677_v26  ;;  %v1717_v23 = vld [vmem:[#allocation8 + $0x360] sm:$0xff]  ;;  %1869 = vmatpush.msra.mxu3 %v1733_v34  ;;  %v1716_v34 = vld [vmem:[#allocation8 + $0x358] sm:$0xff] }
  0xa2   : > { %v3512_v9 = vsel %vm673_vm2, %v684_v2, %v685_v14  ;;  %v3515_v48 = vsel %vm786_vm3, %v797_v37, %v798_v40  ;;  %1756 = vmatpush.msra.mxu2 %v1717_v23  ;;  %v943_v37 = vld [vmem:[#allocation8 + $0x160] sm:$0xff] }
  0xa3   : > { %1479 = vmatmul.f32.vlgmr.msrb.gmra.mxu0 %v676_v15  ;;  %4539 = vst [vmem:[#allocation39_spill] sm:$0xff] %v3515_v48  ;;  %v4540_v15 = vrot.slane %v3301_v17, 7  ;;  %1579 = vmatpush.msra.mxu1 %v943_v37 }
  0xa4   : > { %1757 = vmatpush.msra.mxu2 %v1716_v34  ;;  %v4550_v34 = vrot.slane %v3439_v38, 7 }
  0xa6   : > { %1143 = vmatmul.f32.gmra.mxu1 %v683_v46 }
  0xa7   : > { %1256 = vmatmul.f32.gmra.mxu2 %v3501_v52  ;;  %1369 = vmatmul.f32.gmra.mxu3 %v3477_v33  ;;  %v625_v52 = vsel %vm496_vm0, %v4540_v15, 0.0 }
  0xa8   : > { %v687_v26 = vrot.slane %v625_v52, 1  ;;  %v800_v2 = vrot.slane %v625_v52, 2  ;;  %v690_v52 = vrot.slane %v3401_v16, 1 }
  0xaa   : > { %v3526_v30 = vsel %vm673_vm2, %v685_v14, %v687_v26  ;;  %v3529_v17 = vsel %vm786_vm3, %v798_v40, %v800_v2  ;;  %v802_v14 = vrot.slane %v608_v13, 2  ;;  %v4545_v26 = vrot.slane %v3369_v41, 7  ;;  %v1732_v2 = vld [vmem:[#allocation8 + $0x3d8] sm:$0xff] }
  0xab   : > { %1482 = vmatmul.f32.gmra.mxu0 %v678_v11  ;;  %4541 = vst [vmem:[#allocation40_spill] sm:$0xff] %v3526_v30  ;;  %v1749_v11 = vld [vmem:[#allocation8 + $0x460] sm:$0xff]  ;;  %1870 = vmatpush.msra.mxu3 %v1732_v2  ;;  %v627_v2 = vsel %vm496_vm0, %v4550_v34, 0.0 }
  0xac   : > { %4542 = vst [vmem:[#allocation41_spill] sm:$0xff] %v3529_v17  ;;  %1982 = vmatpush.msra.mxu0 %v1749_v11  ;;  %v695_v11 = vrot.slane %v3473_v43, 1 }
  0xae   : > { %1146 = vmatmul.f32.gmra.mxu1 %v3512_v9 }
  0xaf   : > { %1259 = vmatmul.f32.gmra.mxu2 %v3515_v48  ;;  %2539 = vmatmul.msk.f32.gmra.mxu3 %vm3200_vm1, %v3227_v32  ;;  %v689_v32 = vrot.slane %v608_v13, 1 }
  0xb1   : > { %v3539_v40 = vsel %vm673_vm2, %v689_v32, %v690_v52  ;;  %v609_v32 = vsel %vm496_vm0, 0.0, %v3432_v12 }
  0xb2   : > { %4543 = vst [vmem:[#allocation42_spill] sm:$0xff] %v3539_v40  ;;  %v694_v37 = vrot.slane %v609_v32, 1 }
  0xb3   : > { %1485 = vmatmul.f32.gmra.mxu0 %v681_v56  ;;  %v803_v56 = vrot.slane %v3401_v16, 2 }
  0xb5   : > { %v3542_v15 = vsel %vm786_vm3, %v802_v14, %v803_v56  ;;  %v942_v14 = vld [vmem:[#allocation8 + $0x158] sm:$0xff] }
  0xb6   : > { %1149 = vmatmul.f32.gmra.mxu1 %v3526_v30  ;;  %4544 = vst [vmem:[#allocation43_spill] sm:$0xff] %v3542_v15 }
  0xb7   : > { %1262 = vmatmul.f32.gmra.mxu2 %v3529_v17  ;;  %1375 = vmatmul.f32.gmra.mxu3 %v3265_v54  ;;  %v626_v54 = vsel %vm496_vm0, %v4545_v26, 0.0  ;;  %v807_v26 = vrot.slane %v609_v32, 2  ;;  %v1715_v32 = vld [vmem:[#allocation8 + $0x350] sm:$0xff] }
  0xb8   : > { %v692_v23 = vrot.slane %v626_v54, 1  ;;  %v805_v13 = vrot.slane %v626_v54, 2  ;;  %v808_v54 = vrot.slane %v3473_v43, 2  ;;  %1580 = vmatpush.msra.mxu1 %v942_v14  ;;  %v810_v14 = vrot.slane %v627_v2, 2  ;;  %1758 = vmatpush.msra.mxu2 %v1715_v32  ;;  %v941_v32 = vld [vmem:[#allocation8 + $0x150] sm:$0xff] }
  0xba   : > { %v3557_v41 = vsel %vm786_vm3, %v803_v56, %v805_v13  ;;  %v3567_v56 = vsel %vm673_vm2, %v694_v37, %v695_v11  ;;  %v697_v13 = vrot.slane %v627_v2, 1  ;;  %v1731_v37 = vld [vmem:[#allocation8 + $0x3d0] sm:$0xff]  ;;  %v3586_v38 = vsel %vm786_vm3, %v808_v54, %v810_v14  ;;  %1581 = vmatpush.msra.mxu1 %v941_v32  ;;  %v1730_v32 = vld [vmem:[#allocation8 + $0x3c8] sm:$0xff] }
  0xbb   : > { %1488 = vmatmul.f32.gmra.mxu0 %v683_v46  ;;  %v3553_v46 = vsel %vm673_vm2, %v690_v52, %v692_v23  ;;  %4547 = vst [vmem:[#allocation45_spill] sm:$0xff] %v3557_v41  ;;  %v1748_v52 = vld [vmem:[#allocation8 + $0x458] sm:$0xff]  ;;  %v3571_v23 = vsel %vm786_vm3, %v807_v26, %v808_v54  ;;  %1871 = vmatpush.msra.mxu3 %v1731_v37  ;;  %v610_v26 = vsel %vm496_vm0, 0.0, %v3197_v19  ;;  %v700_v2 = vrot.slane %v3242_v42, 1 }
  0xbc   : > { %4546 = vst [vmem:[#allocation44_spill] sm:$0xff] %v3553_v46  ;;  %1983 = vmatpush.msra.mxu0 %v1748_v52  ;;  %v3582_v52 = vsel %vm673_vm2, %v695_v11, %v697_v13  ;;  %v699_v34 = vrot.slane %v610_v26, 1  ;;  %v1747_v11 = vld [vmem:[#allocation8 + $0x450] sm:$0xff]  ;;  %v812_v13 = vrot.slane %v610_v26, 2  ;;  %v813_v37 = vrot.slane %v3242_v42, 2 }
  0xbd   : > { %4548 = vst [vmem:[#allocation46_spill] sm:$0xff] %v3567_v56  ;;  %1872 = vmatpush.msra.mxu3 %v1730_v32  ;;  %v940_v32 = vld [vmem:[#allocation8 + $0x148] sm:$0xff] }
  0xbe   : > { %1152 = vmatmul.f32.gmra.mxu1 %v3539_v40  ;;  %4549 = vst [vmem:[#allocation47_spill] sm:$0xff] %v3571_v23  ;;  %1984 = vmatpush.msra.mxu0 %v1747_v11  ;;  %v3598_v14 = vsel %vm673_vm2, %v699_v34, %v700_v2  ;;  %v1714_v34 = vld [vmem:[#allocation8 + $0x348] sm:$0xff] }
  0xbf   : > { %1265 = vmatmul.f32.gmra.mxu2 %v3542_v15  ;;  %2541 = vmatmul.msk.f32.gmra.mxu3 %vm3200_vm1, %v3295_v10  ;;  %4551 = vst [vmem:[#allocation48_spill] sm:$0xff] %v3582_v52 }
  0xc0   : > { %4552 = vst [vmem:[#allocation49_spill] sm:$0xff] %v3586_v38  ;;  %1759 = vmatpush.msra.mxu2 %v1714_v34  ;;  %v705_v34 = vrot.slane %v3310_v29, 1  ;;  %1582 = vmatpush.msra.mxu1 %v940_v32 }
  0xc1   : > { %4553 = vst [vmem:[#allocation50_spill] sm:$0xff] %v3598_v14 }
  0xc3   : > { %1491 = vmatmul.f32.gmra.mxu0 %v3512_v9 }
  0xc6   : > { %1155 = vmatmul.f32.gmra.mxu1 %v3553_v46 }
  0xc7   : > { %1268 = vmatmul.f32.gmra.mxu2 %v3557_v41  ;;  %1381 = vmatmul.f32.gmra.mxu3 %v3333_v50 }
  0xcb   : > { %1494 = vmatmul.f32.gmra.mxu0 %v3526_v30  ;;  %v4587_v30 = vrot.slane %v3213_v27, 7 }
  0xce   : > { %1158 = vmatmul.f32.gmra.mxu1 %v3567_v56 }
  0xcf   : > { %1271 = vmatmul.f32.gmra.mxu2 %v3571_v23  ;;  %2543 = vmatmul.msk.f32.gmra.mxu3 %vm3200_vm1, %v3363_v18  ;;  %v4555_v23 = vrot.slane %v3210_v25, 7  ;;  %v612_v18 = vsel %vm496_vm0, 0.0, %v3337_v57 }
  0xd1   : > { %v628_v41 = vsel %vm496_vm0, %v4555_v23, 0.0 }
  0xd2   : > { %v702_v26 = vrot.slane %v628_v41, 1 }
  0xd3   : > { %1497 = vmatmul.f32.gmra.mxu0 %v3539_v40 }
  0xd6   : > { %1161 = vmatmul.f32.gmra.mxu1 %v3582_v52 }
  0xd7   : > { %1274 = vmatmul.f32.gmra.mxu2 %v3586_v38  ;;  %1387 = vmatmul.f32.gmra.mxu3 %v3401_v16  ;;  %v3602_v38 = vsel %vm786_vm3, %v812_v13, %v813_v37  ;;  %v611_v16 = vsel %vm496_vm0, 0.0, %v3269_v60 }
  0xd8   : > { %4554 = vst [vmem:[#allocation51_spill] sm:$0xff] %v3602_v38 }
  0xdb   : > { %v3595_v54 = vpop.f32.mrf.mxu1  ;;  %1500 = vmatmul.f32.gmra.mxu0 %v3553_v46  ;;  %v815_v46 = vrot.slane %v628_v41, 2  ;;  %v704_v41 = vrot.slane %v611_v16, 1 }
  0xde   : > { %1164 = vmatmul.f32.gmra.mxu1 %v3598_v14 }
  0xdf   : > { %1277 = vmatmul.f32.gmra.mxu2 %v3602_v38  ;;  %2545 = vmatmul.msk.f32.gmra.mxu3 %vm3200_vm1, %v3432_v12  ;;  %v3621_v38 = vsel %vm673_vm2, %v700_v2, %v702_v26  ;;  %v3625_v12 = vsel %vm786_vm3, %v813_v37, %v815_v46  ;;  %v1746_v2 = vld [vmem:[#allocation8 + $0x448] sm:$0xff]  ;;  %v818_v46 = vrot.slane %v3310_v29, 2 }
  0xe0   : > { %v3612_v11 = vpop.f32.mrf.mxu0  ;;  %4557 = vst [vmem:[#allocation53_spill] sm:$0xff] %v3621_v38  ;;  %1985 = vmatpush.msra.mxu0 %v1746_v2  ;;  %v1729_v2 = vld [vmem:[#allocation8 + $0x3c0] sm:$0xff] }
  0xe1   : > { %4558 = vst [vmem:[#allocation54_spill] sm:$0xff] %v3625_v12  ;;  %1873 = vmatpush.msra.mxu3 %v1729_v2  ;;  %v939_v2 = vld [vmem:[#allocation8 + $0x140] sm:$0xff] }
  0xe2   : > { %v3614_v13 = vpop.f32.mrf.mxu2  ;;  %v3616_v25 = vpop.f32.mrf.mxu3  ;;  %1583 = vmatpush.msra.mxu1 %v939_v2 }
  0xe3   : > { %4556 = vst [vmem:[#allocation52_spill] sm:$0xff] %v3616_v25  ;;  %v3618_v23 = vpop.f32.mrf.mxu1  ;;  %1503 = vmatmul.f32.gmra.mxu0 %v3567_v56  ;;  %v817_v25 = vrot.slane %v611_v16, 2  ;;  %v4563_v16 = vrot.slane %v3278_v3, 7 }
  0xe5   : > { %v629_v40 = vsel %vm496_vm0, %v4563_v16, 0.0 }
  0xe6   : > { %1167 = vmatmul.f32.gmra.mxu1 %v3621_v38  ;;  %v707_v32 = vrot.slane %v629_v40, 1 }
  0xe7   : > { %1280 = vmatmul.f32.gmra.mxu2 %v3625_v12  ;;  %1393 = vmatmul.f32.gmra.mxu3 %v3473_v43  ;;  %v3643_v12 = vsel %vm673_vm2, %v704_v41, %v705_v34  ;;  %v3647_v43 = vsel %vm786_vm3, %v817_v25, %v818_v46  ;;  %v1713_v41 = vld [vmem:[#allocation8 + $0x340] sm:$0xff] }
  0xe8   : > { %v3633_v26 = vpop.f32.mrf.mxu0  ;;  %4561 = vst [vmem:[#allocation57_spill] sm:$0xff] %v3643_v12  ;;  %1760 = vmatpush.msra.mxu2 %v1713_v41  ;;  %v710_v41 = vrot.slane %v3378_v51, 1 }
  0xe9   : > { %4562 = vst [vmem:[#allocation58_spill] sm:$0xff] %v3647_v43 }
  0xea   : > { %v3636_v37 = vpop.f32.mrf.mxu2  ;;  %v3638_v56 = vpop.f32.mrf.mxu3 }
  0xeb   : > { %4559 = vst [vmem:[#allocation55_spill] sm:$0xff] %v3636_v37  ;;  %v3640_v15 = vpop.f32.mrf.mxu1  ;;  %1506 = vmatmul.f32.gmra.mxu0 %v3582_v52  ;;  %v820_v52 = vrot.slane %v629_v40, 2  ;;  %v709_v40 = vrot.slane %v612_v18, 1 }
  0xec   : > { %4560 = vst [vmem:[#allocation56_spill] sm:$0xff] %v3638_v56 }
  0xee   : > { %1170 = vmatmul.f32.gmra.mxu1 %v3643_v12 }
  0xef   : > { %1283 = vmatmul.f32.gmra.mxu2 %v3647_v43  ;;  %2547 = vmatmul.msk.f32.gmra.mxu3 %vm3200_vm1, %v3197_v19  ;;  %v3666_v43 = vsel %vm673_vm2, %v705_v34, %v707_v32  ;;  %v3670_v19 = vsel %vm786_vm3, %v818_v46, %v820_v52  ;;  %v1745_v34 = vld [vmem:[#allocation8 + $0x440] sm:$0xff]  ;;  %v823_v52 = vrot.slane %v3378_v51, 2 }
  0xf0   : > { %v3657_v56 = vpop.f32.mrf.mxu0  ;;  %4566 = vst [vmem:[#allocation61_spill] sm:$0xff] %v3666_v43  ;;  %1986 = vmatpush.msra.mxu0 %v1745_v34  ;;  %v1728_v34 = vld [vmem:[#allocation8 + $0x3b8] sm:$0xff] }
  0xf1   : > { %4567 = vst [vmem:[#allocation62_spill] sm:$0xff] %v3670_v19  ;;  %1874 = vmatpush.msra.mxu3 %v1728_v34  ;;  %v938_v34 = vld [vmem:[#allocation8 + $0x138] sm:$0xff] }
  0xf2   : > { %v3659_v25 = vpop.f32.mrf.mxu2  ;;  %v3661_v3 = vpop.f32.mrf.mxu3  ;;  %1584 = vmatpush.msra.mxu1 %v938_v34 }
  0xf3   : > { %4564 = vst [vmem:[#allocation59_spill] sm:$0xff] %v3659_v25  ;;  %v3663_v16 = vpop.f32.mrf.mxu1  ;;  %1509 = vmatmul.f32.gmra.mxu0 %v3598_v14 }
  0xf4   : > { %4565 = vst [vmem:[#allocation60_spill] sm:$0xff] %v3661_v3  ;;  %v822_v3 = vrot.slane %v612_v18, 2  ;;  %v4572_v18 = vrot.slane %v3346_v6, 7 }
  0xf6   : > { %1173 = vmatmul.f32.gmra.mxu1 %v3666_v43  ;;  %v630_v17 = vsel %vm496_vm0, %v4572_v18, 0.0 }
  0xf7   : > { %1286 = vmatmul.f32.gmra.mxu2 %v3670_v19  ;;  %1399 = vmatmul.f32.gmra.mxu3 %v3242_v42  ;;  %v3688_v19 = vsel %vm673_vm2, %v709_v40, %v710_v41  ;;  %v3692_v42 = vsel %vm786_vm3, %v822_v3, %v823_v52  ;;  %v712_v2 = vrot.slane %v630_v17, 1  ;;  %v1712_v40 = vld [vmem:[#allocation8 + $0x338] sm:$0xff] }
  0xf8   : > { %v3678_v32 = vpop.f32.mrf.mxu0  ;;  %4570 = vst [vmem:[#allocation65_spill] sm:$0xff] %v3688_v19  ;;  %1761 = vmatpush.msra.mxu2 %v1712_v40  ;;  %v715_v40 = vrot.slane %v3448_v58, 1 }
  0xf9   : > { %4571 = vst [vmem:[#allocation66_spill] sm:$0xff] %v3692_v42 }
  0xfa   : > { %v3681_v46 = vpop.f32.mrf.mxu2  ;;  %v3683_v14 = vpop.f32.mrf.mxu3 }
  0xfb   : > { %4568 = vst [vmem:[#allocation63_spill] sm:$0xff] %v3681_v46  ;;  %v3685_v25 = vpop.f32.mrf.mxu1  ;;  %1512 = vmatmul.f32.gmra.mxu0 %v3621_v38  ;;  %v825_v38 = vrot.slane %v630_v17, 2  ;;  %v613_v46 = vsel %vm496_vm0, 0.0, %v3405_v47 }
  0xfc   : > { %4569 = vst [vmem:[#allocation64_spill] sm:$0xff] %v3683_v14  ;;  %v714_v17 = vrot.slane %v613_v46, 1 }
  0xfe   : > { %1176 = vmatmul.f32.gmra.mxu1 %v3688_v19 }
  0xff   : > { %1289 = vmatmul.f32.gmra.mxu2 %v3692_v42  ;;  %2549 = vmatmul.msk.f32.gmra.mxu3 %vm3200_vm1, %v3269_v60  ;;  %v3711_v42 = vsel %vm673_vm2, %v710_v41, %v712_v2  ;;  %v3715_v60 = vsel %vm786_vm3, %v823_v52, %v825_v38  ;;  %v1744_v41 = vld [vmem:[#allocation8 + $0x438] sm:$0xff]  ;;  %v828_v38 = vrot.slane %v3448_v58, 2 }
 0x100   : > { %v3702_v14 = vpop.f32.mrf.mxu0  ;;  %4575 = vst [vmem:[#allocation69_spill] sm:$0xff] %v3711_v42  ;;  %1987 = vmatpush.msra.mxu0 %v1744_v41  ;;  %v1727_v41 = vld [vmem:[#allocation8 + $0x3b0] sm:$0xff] }
 0x101   : > { %4576 = vst [vmem:[#allocation70_spill] sm:$0xff] %v3715_v60  ;;  %1875 = vmatpush.msra.mxu3 %v1727_v41  ;;  %v937_v41 = vld [vmem:[#allocation8 + $0x130] sm:$0xff] }
 0x102   : > { %v3704_v3 = vpop.f32.mrf.mxu2  ;;  %v3706_v6 = vpop.f32.mrf.mxu3  ;;  %1585 = vmatpush.msra.mxu1 %v937_v41 }
 0x103   : > { %4573 = vst [vmem:[#allocation67_spill] sm:$0xff] %v3704_v3  ;;  %v3708_v18 = vpop.f32.mrf.mxu1  ;;  %1515 = vmatmul.f32.gmra.mxu0 %v3643_v12 }
 0x104   : > { %4574 = vst [vmem:[#allocation68_spill] sm:$0xff] %v3706_v6  ;;  %v827_v6 = vrot.slane %v613_v46, 2  ;;  %v4580_v46 = vrot.slane %v3414_v59, 7 }
 0x106   : > { %1179 = vmatmul.f32.gmra.mxu1 %v3711_v42  ;;  %v631_v37 = vsel %vm496_vm0, %v4580_v46, 0.0 }
 0x107   : > { %1292 = vmatmul.f32.gmra.mxu2 %v3715_v60  ;;  %1405 = vmatmul.f32.gmra.mxu3 %v3310_v29  ;;  %v3733_v60 = vsel %vm673_vm2, %v714_v17, %v715_v40  ;;  %v3737_v29 = vsel %vm786_vm3, %v827_v6, %v828_v38  ;;  %v717_v34 = vrot.slane %v631_v37, 1  ;;  %v1711_v17 = vld [vmem:[#allocation8 + $0x330] sm:$0xff] }
 0x108   : > { %v3723_v2 = vpop.f32.mrf.mxu0  ;;  %4579 = vst [vmem:[#allocation73_spill] sm:$0xff] %v3737_v29  ;;  %1762 = vmatpush.msra.mxu2 %v1711_v17  ;;  %v720_v17 = vrot.slane %v3248_v44, 1 }
 0x10a   : > { %v3726_v52 = vpop.f32.mrf.mxu2  ;;  %v3728_v12 = vpop.f32.mrf.mxu3 }
 0x10b   : > { %4577 = vst [vmem:[#allocation71_spill] sm:$0xff] %v3726_v52  ;;  %v3730_v3 = vpop.f32.mrf.mxu1  ;;  %1518 = vmatmul.f32.gmra.mxu0 %v3666_v43  ;;  %v830_v43 = vrot.slane %v631_v37, 2  ;;  %v614_v52 = vsel %vm496_vm0, 0.0, %v3204_v21 }
 0x10c   : > { %4578 = vst [vmem:[#allocation72_spill] sm:$0xff] %v3728_v12  ;;  %v719_v37 = vrot.slane %v614_v52, 1 }
 0x10e   : > { %1182 = vmatmul.f32.gmra.mxu1 %v3733_v60 }
 0x10f   : > { %1295 = vmatmul.f32.gmra.mxu2 %v3737_v29  ;;  %2551 = vmatmul.msk.f32.gmra.mxu3 %vm3200_vm1, %v3337_v57  ;;  %v3756_v29 = vsel %vm673_vm2, %v715_v40, %v717_v34  ;;  %v3760_v57 = vsel %vm786_vm3, %v828_v38, %v830_v43  ;;  %v1743_v40 = vld [vmem:[#allocation8 + $0x430] sm:$0xff]  ;;  %v833_v43 = vrot.slane %v3248_v44, 2 }
 0x110   : > { %v3747_v12 = vpop.f32.mrf.mxu0  ;;  %4583 = vst [vmem:[#allocation76_spill] sm:$0xff] %v3760_v57  ;;  %1988 = vmatpush.msra.mxu0 %v1743_v40  ;;  %v1726_v40 = vld [vmem:[#allocation8 + $0x3a8] sm:$0xff] }
 0x111   : > { %1876 = vmatpush.msra.mxu3 %v1726_v40 }
 0x112   : > { %v3749_v6 = vpop.f32.mrf.mxu2  ;;  %v3751_v59 = vpop.f32.mrf.mxu3 }
 0x113   : > { %4581 = vst [vmem:[#allocation74_spill] sm:$0xff] %v3749_v6  ;;  %v3753_v46 = vpop.f32.mrf.mxu1  ;;  %1521 = vmatmul.f32.gmra.mxu0 %v3688_v19 }
 0x114   : > { %4582 = vst [vmem:[#allocation75_spill] sm:$0xff] %v3751_v59  ;;  %v832_v59 = vrot.slane %v614_v52, 2  ;;  %v632_v52 = vsel %vm496_vm0, %v4587_v30, 0.0 }
 0x115   : > { %v722_v41 = vrot.slane %v632_v52, 1 }
 0x116   : > { %1185 = vmatmul.f32.gmra.mxu1 %v3756_v29 }
 0x117   : > { %1298 = vmatmul.f32.gmra.mxu2 %v3760_v57  ;;  %1411 = vmatmul.f32.gmra.mxu3 %v3378_v51  ;;  %v3776_v57 = vsel %vm673_vm2, %v719_v37, %v720_v17  ;;  %v3780_v51 = vsel %vm786_vm3, %v832_v59, %v833_v43  ;;  %v1710_v37 = vld [vmem:[#allocation8 + $0x328] sm:$0xff]  ;;  %v3792_v48 = vsel %vm673_vm2, %v720_v17, %v722_v41 }
 0x118   : > { %v3768_v34 = vpop.f32.mrf.mxu0  ;;  %4586 = vst [vmem:[#allocation79_spill] sm:$0xff] %v3780_v51  ;;  %1763 = vmatpush.msra.mxu2 %v1710_v37  ;;  %v936_v17 = vld [vmem:[#allocation8 + $0x128] sm:$0xff] }
 0x119   : > { %v1742_v41 = vld [vmem:[#allocation8 + $0x428] sm:$0xff]  ;;  %1586 = vmatpush.msra.mxu1 %v936_v17 }
 0x11a   : > { %v3771_v38 = vpop.f32.mrf.mxu2  ;;  %v3773_v19 = vpop.f32.mrf.mxu3  ;;  %1989 = vmatpush.msra.mxu0 %v1742_v41  ;;  %v1725_v41 = vld [vmem:[#allocation8 + $0x3a0] sm:$0xff] }
 0x11b   : > { %4584 = vst [vmem:[#allocation77_spill] sm:$0xff] %v3771_v38  ;;  %v1141_v6 = vpop.f32.mrf.mxu1  ;;  %1524 = vmatmul.f32.gmra.mxu0 %v3711_v42  ;;  %v835_v42 = vrot.slane %v632_v52, 2  ;;  %1877 = vmatpush.msra.mxu3 %v1725_v41 }
 0x11c   : > { %4585 = vst [vmem:[#allocation78_spill] sm:$0xff] %v3773_v19  ;;  %v1142_v59 = vadd.f32 %v1141_v6, %v3612_v11  ;;  %v725_v6 = vrot.slane %v3316_v31, 1 }
 0x11e   : > { %1188 = vmatmul.f32.gmra.mxu1 %v3776_v57 }
 0x11f   : > { %1301 = vmatmul.f32.gmra.mxu2 %v3780_v51  ;;  %2553 = vmatmul.msk.f32.gmra.mxu3 %vm3200_vm1, %v3405_v47  ;;  %v3796_v51 = vsel %vm786_vm3, %v833_v43, %v835_v42  ;;  %v615_v47 = vsel %vm496_vm0, 0.0, %v3272_v63  ;;  %v838_v43 = vrot.slane %v3316_v31, 2 }
 0x120   : > { %v1480_v19 = vpop.f32.mrf.mxu0  ;;  %4588 = vst [vmem:[#allocation80_spill] sm:$0xff] %v3796_v51  ;;  %v724_v11 = vrot.slane %v615_v47, 1  ;;  %v837_v42 = vrot.slane %v615_v47, 2  ;;  %v4590_v47 = vrot.slane %v3281_v4, 7 }
 0x122   : > { %v1254_v27 = vpop.f32.mrf.mxu2  ;;  %v1367_v38 = vpop.f32.mrf.mxu3 }
 0x123   : > { %v1255_v30 = vadd.f32 %v1254_v27, %v1142_v59  ;;  %v1144_v50 = vpop.f32.mrf.mxu1  ;;  %1527 = vmatmul.f32.gmra.mxu0 %v3733_v60 }
 0x125   : > { %v1368_v52 = vadd.f32 %v1367_v38, %v1255_v30  ;;  %v1145_v38 = vadd.f32 %v1144_v50, %v3633_v26 }
 0x126   : > { %1191 = vmatmul.f32.gmra.mxu1 %v3792_v48 }
 0x127   : > { %v3801_v37 = vadd.f32 %v1480_v19, %v1368_v52  ;;  %1304 = vmatmul.f32.gmra.mxu2 %v3796_v51  ;;  %1417 = vmatmul.f32.gmra.mxu3 %v3448_v58  ;;  %v3809_v52 = vsel %vm673_vm2, %v724_v11, %v725_v6  ;;  %v633_v51 = vsel %vm496_vm0, %v4590_v47, 0.0  ;;  %v1709_v11 = vld [vmem:[#allocation8 + $0x320] sm:$0xff] }
 0x128   : > { %v1483_v40 = vpop.f32.mrf.mxu0  ;;  %v727_v26 = vrot.slane %v633_v51, 1  ;;  %1764 = vmatpush.msra.mxu2 %v1709_v11 }
 0x129   : > { %4589 = vst [vmem:[#allocation81_spill] sm:$0xff] %v3801_v37  ;;  %v3813_v37 = vsel %vm786_vm3, %v837_v42, %v838_v43 }
 0x12a   : > { %v1257_v59 = vpop.f32.mrf.mxu2  ;;  %v1370_v19 = vpop.f32.mrf.mxu3  ;;  %v3827_v47 = vsel %vm673_vm2, %v725_v6, %v727_v26  ;;  %v730_v6 = vrot.slane %v3384_v53, 1  ;;  %v1741_v26 = vld [vmem:[#allocation8 + $0x420] sm:$0xff] }
 0x12b   : > { %v1258_v27 = vadd.f32 %v1257_v59, %v1145_v38  ;;  %v1147_v30 = vpop.f32.mrf.mxu1  ;;  %1530 = vmatmul.f32.gmra.mxu0 %v3756_v29  ;;  %v840_v38 = vrot.slane %v633_v51, 2 }
 0x12c   : > { %v1148_v4 = vadd.f32 %v1147_v30, %v3657_v56  ;;  %v935_v30 = vld [vmem:[#allocation8 + $0x120] sm:$0xff]  ;;  %1990 = vmatpush.msra.mxu0 %v1741_v26  ;;  %v1724_v26 = vld [vmem:[#allocation8 + $0x398] sm:$0xff] }
 0x12d   : > { %v1371_v17 = vadd.f32 %v1370_v19, %v1258_v27  ;;  %1587 = vmatpush.msra.mxu1 %v935_v30  ;;  %1878 = vmatpush.msra.mxu3 %v1724_v26 }
 0x12e   : > { %1194 = vmatmul.f32.gmra.mxu1 %v3809_v52 }
 0x12f   : > { %v3819_v50 = vadd.f32 %v1483_v40, %v1371_v17  ;;  %1307 = vmatmul.f32.gmra.mxu2 %v3813_v37  ;;  %2555 = vmatmul.msk.f32.gmra.mxu3 %vm3200_vm1, %v3204_v21  ;;  %v3831_v17 = vsel %vm786_vm3, %v838_v43, %v840_v38  ;;  %v843_v38 = vrot.slane %v3384_v53, 2 }
 0x130   : > { %v1486_v42 = vpop.f32.mrf.mxu0  ;;  %4592 = vst [vmem:[#allocation83_spill] sm:$0xff] %v3831_v17 }
 0x131   : > { %4591 = vst [vmem:[#allocation82_spill] sm:$0xff] %v3819_v50  ;;  %v616_v50 = vsel %vm496_vm0, 0.0, %v3340_v61 }
 0x132   : > { %v1260_v59 = vpop.f32.mrf.mxu2  ;;  %v1373_v19 = vpop.f32.mrf.mxu3  ;;  %v729_v56 = vrot.slane %v616_v50, 1  ;;  %v842_v43 = vrot.slane %v616_v50, 2  ;;  %v4594_v50 = vrot.slane %v3349_v7, 7 }
 0x133   : > { %v1261_v27 = vadd.f32 %v1260_v59, %v1148_v4  ;;  %v1150_v40 = vpop.f32.mrf.mxu1  ;;  %1533 = vmatmul.f32.gmra.mxu0 %v3776_v57 }
 0x134   : > { %v1151_v4 = vadd.f32 %v1150_v40, %v3678_v32 }
 0x135   : > { %v1374_v51 = vadd.f32 %v1373_v19, %v1261_v27 }
 0x136   : > { %1197 = vmatmul.f32.gmra.mxu1 %v3827_v47 }
 0x137   : > { %v3836_v11 = vadd.f32 %v1486_v42, %v1374_v51  ;;  %1310 = vmatmul.f32.gmra.mxu2 %v3831_v17  ;;  %1423 = vmatmul.f32.gmra.mxu3 %v3248_v44  ;;  %v3844_v51 = vsel %vm673_vm2, %v729_v56, %v730_v6  ;;  %v634_v17 = vsel %vm496_vm0, %v4594_v50, 0.0  ;;  %v1708_v56 = vld [vmem:[#allocation8 + $0x318] sm:$0xff] }
 0x138   : > { %v1489_v41 = vpop.f32.mrf.mxu0  ;;  %v732_v40 = vrot.slane %v634_v17, 1  ;;  %1765 = vmatpush.msra.mxu2 %v1708_v56 }
 0x139   : > { %4593 = vst [vmem:[#allocation84_spill] sm:$0xff] %v3836_v11  ;;  %v3848_v11 = vsel %vm786_vm3, %v842_v43, %v843_v38 }
 0x13a   : > { %v1263_v59 = vpop.f32.mrf.mxu2  ;;  %v1376_v42 = vpop.f32.mrf.mxu3  ;;  %v3862_v50 = vsel %vm673_vm2, %v730_v6, %v732_v40  ;;  %v735_v6 = vrot.slane %v3454_v24, 1  ;;  %v1740_v40 = vld [vmem:[#allocation8 + $0x418] sm:$0xff] }
 0x13b   : > { %v1264_v19 = vadd.f32 %v1263_v59, %v1151_v4  ;;  %v1153_v27 = vpop.f32.mrf.mxu1  ;;  %1536 = vmatmul.f32.gmra.mxu0 %v3792_v48  ;;  %v845_v4 = vrot.slane %v634_v17, 2 }
 0x13c   : > { %v1154_v7 = vadd.f32 %v1153_v27, %v3702_v14  ;;  %v934_v27 = vld [vmem:[#allocation8 + $0x118] sm:$0xff]  ;;  %1991 = vmatpush.msra.mxu0 %v1740_v40  ;;  %v1723_v40 = vld [vmem:[#allocation8 + $0x390] sm:$0xff] }
 0x13d   : > { %v1377_v30 = vadd.f32 %v1376_v42, %v1264_v19  ;;  %1588 = vmatpush.msra.mxu1 %v934_v27  ;;  %1879 = vmatpush.msra.mxu3 %v1723_v40 }
 0x13e   : > { %1200 = vmatmul.f32.gmra.mxu1 %v3844_v51 }
 0x13f   : > { %v3854_v32 = vadd.f32 %v1489_v41, %v1377_v30  ;;  %1313 = vmatmul.f32.gmra.mxu2 %v3848_v11  ;;  %2557 = vmatmul.msk.f32.gmra.mxu3 %vm3200_vm1, %v3272_v63  ;;  %v3866_v30 = vsel %vm786_vm3, %v843_v38, %v845_v4  ;;  %v848_v4 = vrot.slane %v3454_v24, 2 }
 0x140   : > { %v1492_v43 = vpop.f32.mrf.mxu0  ;;  %4596 = vst [vmem:[#allocation86_spill] sm:$0xff] %v3866_v30 }
 0x141   : > { %4595 = vst [vmem:[#allocation85_spill] sm:$0xff] %v3854_v32  ;;  %v617_v32 = vsel %vm496_vm0, 0.0, %v3408_v49 }
 0x142   : > { %v1266_v59 = vpop.f32.mrf.mxu2  ;;  %v1379_v42 = vpop.f32.mrf.mxu3  ;;  %v734_v14 = vrot.slane %v617_v32, 1  ;;  %v847_v38 = vrot.slane %v617_v32, 2  ;;  %v4598_v32 = vrot.slane %v3417_v1, 7 }
 0x143   : > { %v1267_v19 = vadd.f32 %v1266_v59, %v1154_v7  ;;  %v1156_v41 = vpop.f32.mrf.mxu1  ;;  %1539 = vmatmul.f32.gmra.mxu0 %v3809_v52 }
 0x144   : > { %v1157_v7 = vadd.f32 %v1156_v41, %v3723_v2 }
 0x145   : > { %v1380_v17 = vadd.f32 %v1379_v42, %v1267_v19 }
 0x146   : > { %1203 = vmatmul.f32.gmra.mxu1 %v3862_v50 }
 0x147   : > { %v3871_v56 = vadd.f32 %v1492_v43, %v1380_v17  ;;  %1316 = vmatmul.f32.gmra.mxu2 %v3866_v30  ;;  %1429 = vmatmul.f32.gmra.mxu3 %v3316_v31  ;;  %v3879_v17 = vsel %vm673_vm2, %v734_v14, %v735_v6  ;;  %v635_v30 = vsel %vm496_vm0, %v4598_v32, 0.0  ;;  %v1707_v14 = vld [vmem:[#allocation8 + $0x310] sm:$0xff] }
 0x148   : > { %v1495_v26 = vpop.f32.mrf.mxu0  ;;  %v737_v41 = vrot.slane %v635_v30, 1  ;;  %1766 = vmatpush.msra.mxu2 %v1707_v14 }
 0x149   : > { %4597 = vst [vmem:[#allocation87_spill] sm:$0xff] %v3871_v56  ;;  %v3883_v56 = vsel %vm786_vm3, %v847_v38, %v848_v4 }
 0x14a   : > { %v1269_v59 = vpop.f32.mrf.mxu2  ;;  %v1382_v43 = vpop.f32.mrf.mxu3  ;;  %v3897_v32 = vsel %vm673_vm2, %v735_v6, %v737_v41  ;;  %v740_v6 = vrot.slane %v3254_v45, 1  ;;  %v1739_v41 = vld [vmem:[#allocation8 + $0x410] sm:$0xff] }
 0x14b   : > { %v1270_v42 = vadd.f32 %v1269_v59, %v1157_v7  ;;  %v1159_v19 = vpop.f32.mrf.mxu1  ;;  %1542 = vmatmul.f32.gmra.mxu0 %v3827_v47  ;;  %v850_v7 = vrot.slane %v635_v30, 2 }
 0x14c   : > { %v1160_v1 = vadd.f32 %v1159_v19, %v3747_v12  ;;  %v933_v19 = vld [vmem:[#allocation8 + $0x110] sm:$0xff]  ;;  %1992 = vmatpush.msra.mxu0 %v1739_v41  ;;  %v1722_v41 = vld [vmem:[#allocation8 + $0x388] sm:$0xff] }
 0x14d   : > { %v1383_v27 = vadd.f32 %v1382_v43, %v1270_v42  ;;  %1589 = vmatpush.msra.mxu1 %v933_v19  ;;  %1880 = vmatpush.msra.mxu3 %v1722_v41 }
 0x14e   : > { %1206 = vmatmul.f32.gmra.mxu1 %v3879_v17 }
 0x14f   : > { %v3889_v2 = vadd.f32 %v1495_v26, %v1383_v27  ;;  %1319 = vmatmul.f32.gmra.mxu2 %v3883_v56  ;;  %2559 = vmatmul.msk.f32.gmra.mxu3 %vm3200_vm1, %v3340_v61  ;;  %v3901_v27 = vsel %vm786_vm3, %v848_v4, %v850_v7  ;;  %v853_v7 = vrot.slane %v3254_v45, 2 }
 0x150   : > { %v1498_v38 = vpop.f32.mrf.mxu0  ;;  %4600 = vst [vmem:[#allocation89_spill] sm:$0xff] %v3901_v27 }
 0x151   : > { %4599 = vst [vmem:[#allocation88_spill] sm:$0xff] %v3889_v2  ;;  %v618_v2 = vsel %vm496_vm0, 0.0, %v3206_v22 }
 0x152   : > { %v1272_v59 = vpop.f32.mrf.mxu2  ;;  %v1385_v43 = vpop.f32.mrf.mxu3  ;;  %v739_v12 = vrot.slane %v618_v2, 1  ;;  %v852_v4 = vrot.slane %v618_v2, 2  ;;  %v4602_v2 = vrot.slane %v3216_v28, 7 }
 0x153   : > { %v1273_v42 = vadd.f32 %v1272_v59, %v1160_v1  ;;  %v1162_v26 = vpop.f32.mrf.mxu1  ;;  %1545 = vmatmul.f32.gmra.mxu0 %v3844_v51 }
 0x154   : > { %v1163_v1 = vadd.f32 %v1162_v26, %v3768_v34 }
 0x155   : > { %v1386_v30 = vadd.f32 %v1385_v43, %v1273_v42 }
 0x156   : > { %1209 = vmatmul.f32.gmra.mxu1 %v3897_v32 }
 0x157   : > { %v3906_v14 = vadd.f32 %v1498_v38, %v1386_v30  ;;  %1322 = vmatmul.f32.gmra.mxu2 %v3901_v27  ;;  %1435 = vmatmul.f32.gmra.mxu3 %v3384_v53  ;;  %v3914_v30 = vsel %vm673_vm2, %v739_v12, %v740_v6  ;;  %v636_v27 = vsel %vm496_vm0, %v4602_v2, 0.0  ;;  %v1706_v12 = vld [vmem:[#allocation8 + $0x308] sm:$0xff] }
 0x158   : > { %v1501_v40 = vpop.f32.mrf.mxu0  ;;  %v742_v26 = vrot.slane %v636_v27, 1  ;;  %1767 = vmatpush.msra.mxu2 %v1706_v12 }
 0x159   : > { %4601 = vst [vmem:[#allocation90_spill] sm:$0xff] %v3906_v14  ;;  %v3918_v14 = vsel %vm786_vm3, %v852_v4, %v853_v7 }
 0x15a   : > { %v1275_v59 = vpop.f32.mrf.mxu2  ;;  %v1388_v38 = vpop.f32.mrf.mxu3  ;;  %v3932_v2 = vsel %vm673_vm2, %v740_v6, %v742_v26  ;;  %v745_v6 = vrot.slane %v3322_v36, 1  ;;  %v1738_v26 = vld [vmem:[#allocation8 + $0x408] sm:$0xff] }
 0x15b   : > { %v1276_v43 = vadd.f32 %v1275_v59, %v1163_v1  ;;  %v1165_v42 = vpop.f32.mrf.mxu1  ;;  %1548 = vmatmul.f32.gmra.mxu0 %v3862_v50  ;;  %v855_v1 = vrot.slane %v636_v27, 2 }
 0x15c   : > { %v1166_v28 = vadd.f32 %v1165_v42, %v3595_v54  ;;  %v932_v42 = vld [vmem:[#allocation8 + $0x108] sm:$0xff]  ;;  %1993 = vmatpush.msra.mxu0 %v1738_v26  ;;  %v1721_v26 = vld [vmem:[#allocation8 + $0x380] sm:$0xff] }
 0x15d   : > { %v1389_v19 = vadd.f32 %v1388_v38, %v1276_v43  ;;  %1590 = vmatpush.msra.mxu1 %v932_v42  ;;  %1881 = vmatpush.msra.mxu3 %v1721_v26 }
 0x15e   : > { %1212 = vmatmul.f32.gmra.mxu1 %v3914_v30 }
 0x15f   : > { %v3924_v34 = vadd.f32 %v1501_v40, %v1389_v19  ;;  %1325 = vmatmul.f32.gmra.mxu2 %v3918_v14  ;;  %2561 = vmatmul.msk.f32.gmra.mxu3 %vm3200_vm1, %v3408_v49  ;;  %v3936_v19 = vsel %vm786_vm3, %v853_v7, %v855_v1  ;;  %v858_v1 = vrot.slane %v3322_v36, 2 }
 0x160   : > { %v1504_v4 = vpop.f32.mrf.mxu0  ;;  %4604 = vst [vmem:[#allocation92_spill] sm:$0xff] %v3936_v19 }
 0x161   : > { %4603 = vst [vmem:[#allocation91_spill] sm:$0xff] %v3924_v34  ;;  %v619_v34 = vsel %vm496_vm0, 0.0, %v3274_v0 }
 0x162   : > { %v1278_v59 = vpop.f32.mrf.mxu2  ;;  %v1391_v38 = vpop.f32.mrf.mxu3  ;;  %v744_v54 = vrot.slane %v619_v34, 1  ;;  %v857_v7 = vrot.slane %v619_v34, 2  ;;  %v4606_v34 = vrot.slane %v3284_v5, 7 }
 0x163   : > { %v1279_v43 = vadd.f32 %v1278_v59, %v1166_v28  ;;  %v1168_v40 = vpop.f32.mrf.mxu1  ;;  %1551 = vmatmul.f32.gmra.mxu0 %v3879_v17 }
 0x164   : > { %v1169_v28 = vadd.f32 %v1168_v40, %v3618_v23 }
 0x165   : > { %v1392_v27 = vadd.f32 %v1391_v38, %v1279_v43 }
 0x166   : > { %1215 = vmatmul.f32.gmra.mxu1 %v3932_v2 }
 0x167   : > { %v3941_v12 = vadd.f32 %v1504_v4, %v1392_v27  ;;  %1328 = vmatmul.f32.gmra.mxu2 %v3936_v19  ;;  %1441 = vmatmul.f32.gmra.mxu3 %v3454_v24  ;;  %v3949_v27 = vsel %vm673_vm2, %v744_v54, %v745_v6  ;;  %v637_v19 = vsel %vm496_vm0, %v4606_v34, 0.0  ;;  %v1705_v54 = vld [vmem:[#allocation8 + $0x300] sm:$0xff] }
 0x168   : > { %v1507_v41 = vpop.f32.mrf.mxu0  ;;  %v747_v40 = vrot.slane %v637_v19, 1  ;;  %1768 = vmatpush.msra.mxu2 %v1705_v54 }
 0x169   : > { %4605 = vst [vmem:[#allocation93_spill] sm:$0xff] %v3941_v12  ;;  %v3953_v12 = vsel %vm786_vm3, %v857_v7, %v858_v1 }
 0x16a   : > { %v1281_v59 = vpop.f32.mrf.mxu2  ;;  %v1394_v4 = vpop.f32.mrf.mxu3  ;;  %v3967_v34 = vsel %vm673_vm2, %v745_v6, %v747_v40  ;;  %v750_v6 = vrot.slane %v3390_v55, 1  ;;  %v1737_v40 = vld [vmem:[#allocation8 + $0x400] sm:$0xff] }
 0x16b   : > { %v1282_v38 = vadd.f32 %v1281_v59, %v1169_v28  ;;  %v1171_v43 = vpop.f32.mrf.mxu1  ;;  %1554 = vmatmul.f32.gmra.mxu0 %v3897_v32  ;;  %v860_v28 = vrot.slane %v637_v19, 2 }
 0x16c   : > { %v1172_v5 = vadd.f32 %v1171_v43, %v3640_v15  ;;  %v931_v43 = vld [vmem:[#allocation8 + $0x100] sm:$0xff]  ;;  %1994 = vmatpush.msra.mxu0 %v1737_v40 }
 0x16d   : > { %v1395_v42 = vadd.f32 %v1394_v4, %v1282_v38  ;;  %1591 = vmatpush.msra.mxu1 %v931_v43  ;;  %v4611_v43 = vrot.slane %v3352_v8, 7 }
 0x16e   : > { %1218 = vmatmul.f32.gmra.mxu1 %v3949_v27 }
 0x16f   : > { %v3959_v23 = vadd.f32 %v1507_v41, %v1395_v42  ;;  %1331 = vmatmul.f32.gmra.mxu2 %v3953_v12  ;;  %2563 = vmatmul.msk.f32.gmra.mxu3 %vm3200_vm1, %v3206_v22  ;;  %v3971_v42 = vsel %vm786_vm3, %v858_v1, %v860_v28  ;;  %v863_v28 = vrot.slane %v3390_v55, 2 }
 0x170   : > { %v1510_v7 = vpop.f32.mrf.mxu0  ;;  %4608 = vst [vmem:[#allocation95_spill] sm:$0xff] %v3971_v42 }
 0x171   : > { %4607 = vst [vmem:[#allocation94_spill] sm:$0xff] %v3959_v23  ;;  %v620_v23 = vsel %vm496_vm0, 0.0, %v3342_v62 }
 0x172   : > { %v1284_v59 = vpop.f32.mrf.mxu2  ;;  %v1397_v4 = vpop.f32.mrf.mxu3  ;;  %v749_v15 = vrot.slane %v620_v23, 1  ;;  %v862_v1 = vrot.slane %v620_v23, 2 }
 0x173   : > { %v1285_v38 = vadd.f32 %v1284_v59, %v1172_v5  ;;  %v1174_v41 = vpop.f32.mrf.mxu1  ;;  %1557 = vmatmul.f32.gmra.mxu0 %v3914_v30  ;;  %v787_v59 = vrot.slane %v3480_v35, 2 }
 0x174   : > { %v1175_v5 = vadd.f32 %v1174_v41, %v3663_v16  ;;  %v3990_v23 = vsel %vm786_vm3, %v862_v1, %v863_v28  ;;  %v638_v16 = vsel %vm496_vm0, %v4611_v43, 0.0 }
 0x175   : > { %v1398_v19 = vadd.f32 %v1397_v4, %v1285_v38  ;;  %4610 = vst [vmem:[#allocation97_spill] sm:$0xff] %v3990_v23  ;;  %v865_v1 = vrot.slane %v638_v16, 2 }
 0x176   : > { %1221 = vmatmul.f32.gmra.mxu1 %v3967_v34 }
 0x177   : > { %v3976_v54 = vadd.f32 %v1510_v7, %v1398_v19  ;;  %1334 = vmatmul.f32.gmra.mxu2 %v3971_v42  ;;  %1447 = vmatmul.f32.gmra.mxu3 %v3254_v45  ;;  %v4497_v7 = vrot.slane %v3477_v33, 2  ;;  %v3986_v42 = vsel %vm673_vm2, %v749_v15, %v750_v6  ;;  %v752_v15 = vrot.slane %v638_v16, 1 }
 0x178   : > { %v1513_v26 = vpop.f32.mrf.mxu0 }
 0x179   : > { %4609 = vst [vmem:[#allocation96_spill] sm:$0xff] %v3976_v54  ;;  %v3999_v35 = vsel %vm786_vm3, %v787_v59, %v4497_v7  ;;  %v4009_v59 = vsel %vm673_vm2, %v750_v6, %v752_v15 }
 0x17a   : > { %v1287_v4 = vpop.f32.mrf.mxu2  ;;  %v1400_v38 = vpop.f32.mrf.mxu3 }
 0x17b   : > { %v1288_v19 = vadd.f32 %v1287_v4, %v1175_v5  ;;  %v1177_v54 = vpop.f32.mrf.mxu1  ;;  %1560 = vmatmul.f32.gmra.mxu0 %v3932_v2 }
 0x17c   : > { %v1178_v5 = vadd.f32 %v1177_v54, %v3685_v25  ;;  %v4616_v54 = vld [vmem:[#allocation35_spill] sm:$0xff] }
 0x17d   : > { %v1401_v41 = vadd.f32 %v1400_v38, %v1288_v19  ;;  %v950_v6 = vrot.slane %v4616_v54, 1 }
 0x17e   : > { %1224 = vmatmul.f32.gmra.mxu1 %v3986_v42 }
 0x17f   : > { %v4001_v40 = vadd.f32 %v1513_v26, %v1401_v41  ;;  %1337 = vmatmul.f32.gmra.mxu2 %v3990_v23  ;;  %2565 = vmatmul.msk.f32.gmra.mxu3 %vm3200_vm1, %v3274_v0  ;;  %v4013_v26 = vsel %vm786_vm3, %v863_v28, %v865_v1  ;;  %v4614_v41 = vld [vmem:[#allocation32_spill] sm:$0xff]  ;;  %v957_v28 = vrot.slane %v4616_v54, 2 }
 0x180   : > { %v1516_v8 = vpop.f32.mrf.mxu0  ;;  %4613 = vst [vmem:[#allocation99_spill] sm:$0xff] %v4013_v26  ;;  %v621_v7 = vsel %vm496_vm0, 0.0, %v4614_v41 }
 0x181   : > { %4612 = vst [vmem:[#allocation98_spill] sm:$0xff] %v4001_v40  ;;  %v949_v25 = vrot.slane %v621_v7, 1 }
 0x182   : > { %v1290_v4 = vpop.f32.mrf.mxu2  ;;  %v1403_v38 = vpop.f32.mrf.mxu3 }
 0x183   : > { %v1291_v19 = vadd.f32 %v1290_v4, %v1178_v5  ;;  %v1180_v43 = vpop.f32.mrf.mxu1  ;;  %1563 = vmatmul.f32.gmra.mxu0 %v3949_v27  ;;  %v956_v5 = vrot.slane %v621_v7, 2 }
 0x184   : > { %v1181_v1 = vadd.f32 %v1180_v43, %v3708_v18 }
 0x185   : > { %v1404_v40 = vadd.f32 %v1403_v38, %v1291_v19 }
 0x186   : > { %1227 = vmatmul.f32.gmra.mxu1 %v4009_v59 }
 0x187   : > { %v4018_v16 = vadd.f32 %v1516_v8, %v1404_v40  ;;  %1340 = vmatmul.f32.gmra.mxu2 %v4013_v26  ;;  %1453 = vmatmul.f32.gmra.mxu3 %v3322_v36  ;;  %v4026_v40 = vsel %vm673_vm2, %v949_v25, %v950_v6  ;;  %v4030_v8 = vsel %vm786_vm3, %v956_v5, %v957_v28 }
 0x188   : > { %v1519_v15 = vpop.f32.mrf.mxu0 }
 0x189   : > { %4615 = vst [vmem:[#allocation100_spill] sm:$0xff] %v4018_v16  ;;  %v4617_v16 = vld [vmem:[#allocation33_spill] sm:$0xff] }
 0x18a   : > { %v1293_v4 = vpop.f32.mrf.mxu2  ;;  %v1406_v41 = vpop.f32.mrf.mxu3  ;;  %v4618_v26 = vrot.slane %v4617_v16, 7 }
 0x18b   : > { %v1294_v38 = vadd.f32 %v1293_v4, %v1181_v1  ;;  %v1183_v19 = vpop.f32.mrf.mxu1  ;;  %1566 = vmatmul.f32.gmra.mxu0 %v3967_v34 }
 0x18c   : > { %v639_v7 = vsel %vm496_vm0, %v4618_v26, 0.0  ;;  %v1184_v5 = vadd.f32 %v1183_v19, %v3730_v3 }
 0x18d   : > { %v1407_v23 = vadd.f32 %v1406_v41, %v1294_v38  ;;  %v952_v43 = vrot.slane %v639_v7, 1  ;;  %v959_v1 = vrot.slane %v639_v7, 2 }
 0x18e   : > { %1230 = vmatmul.f32.gmra.mxu1 %v4026_v40 }
 0x18f   : > { %v4036_v18 = vadd.f32 %v1519_v15, %v1407_v23  ;;  %1343 = vmatmul.f32.gmra.mxu2 %v4030_v8  ;;  %2567 = vmatmul.msk.f32.gmra.mxu3 %vm3200_vm1, %v3342_v62  ;;  %v4044_v41 = vsel %vm673_vm2, %v950_v6, %v952_v43  ;;  %v4048_v23 = vsel %vm786_vm3, %v957_v28, %v959_v1 }
 0x190   : > { %v1522_v25 = vpop.f32.mrf.mxu0 }
 0x192   : > { %v1296_v4 = vpop.f32.mrf.mxu2  ;;  %v1409_v16 = vpop.f32.mrf.mxu3 }
 0x193   : > { %v1297_v54 = vadd.f32 %v1296_v4, %v1184_v5  ;;  %v1186_v26 = vpop.f32.mrf.mxu1  ;;  %1569 = vmatmul.f32.gmra.mxu0 %v3986_v42 }
 0x194   : > { %v1187_v19 = vadd.f32 %v1186_v26, %v3753_v46 }
 0x195   : > { %v1410_v15 = vadd.f32 %v1409_v16, %v1297_v54 }
 0x196   : > { %1233 = vmatmul.f32.gmra.mxu1 %v4044_v41 }
 0x197   : > { %v4051_v38 = vadd.f32 %v1522_v25, %v1410_v15  ;;  %1346 = vmatmul.f32.gmra.mxu2 %v4048_v23  ;;  %1459 = vmatmul.f32.gmra.mxu3 %v3390_v55  ;;  %v790_v25 = vrot.slane %v3497_v39, 2  ;;  %v4624_v39 = vld [vmem:[#allocation40_spill] sm:$0xff] }
 0x198   : > { %v1525_v3 = vpop.f32.mrf.mxu0 }
 0x19a   : > { %v1299_v7 = vpop.f32.mrf.mxu2  ;;  %v1412_v6 = vpop.f32.mrf.mxu3 }
 0x19b   : > { %v1300_v43 = vadd.f32 %v1299_v7, %v1187_v19  ;;  %v1189_v5 = vpop.f32.mrf.mxu1  ;;  %1572 = vmatmul.f32.gmra.mxu0 %v4009_v59  ;;  %v4620_v19 = vrot.slane %v3477_v33, 2  ;;  %v4626_v33 = vld [vmem:[#allocation41_spill] sm:$0xff] }
 0x19c   : > { %v1190_v1 = vadd.f32 %v1189_v5, %v3614_v13  ;;  %v4625_v13 = vld [vmem:[#allocation55_spill] sm:$0xff] }
 0x19d   : > { %v1413_v28 = vadd.f32 %v1412_v6, %v1300_v43 }
 0x19e   : > { %1592 = vmatmul.f32.vlgmr.msra.gmra.mxu1 %v3999_v35  ;;  %v791_v35 = vsel %vm786_vm3, %v4620_v19, %v790_v25  ;;  %v4627_v19 = vld [vmem:[#allocation37_spill] sm:$0xff] }
 0x19f   : > { %v4058_v54 = vadd.f32 %v1525_v3, %v1413_v28  ;;  %2569 = vmatmul.msk.f32.vlgmr.msra.gmra.mxu2 %vm3200_vm1, %v3295_v10  ;;  %1882 = vmatmul.f32.vlgmr.msra.gmra.mxu3 %v3512_v9  ;;  %v4621_v3 = vld [vmem:[#allocation39_spill] sm:$0xff]  ;;  %v4623_v9 = vld [vmem:[#allocation26_spill] sm:$0xff] }
 0x1a0   : > { %v1528_v46 = vpop.f32.mrf.mxu0 }
 0x1a1   : > { %4619 = vst [vmem:[#allocation33_spill] sm:$0xff] %v4058_v54 }
 0x1a2   : > { %v1302_v4 = vpop.f32.mrf.mxu2  ;;  %v1415_v16 = vpop.f32.mrf.mxu3 }
 0x1a3   : > { %v1303_v26 = vadd.f32 %v1302_v4, %v1190_v1  ;;  %v1192_v15 = vpop.f32.mrf.mxu1  ;;  %1995 = vmatmul.f32.vlgmr.msra.gmra.mxu0 %v4621_v3 }
 0x1a4   : > { %v1193_v43 = vadd.f32 %v1192_v15, %v4625_v13 }
 0x1a5   : > { %v1416_v7 = vadd.f32 %v1415_v16, %v1303_v26  ;;  %v4630_v26 = vld [vmem:[#allocation42_spill] sm:$0xff] }
 0x1a6   : > { %1595 = vmatmul.f32.gmra.mxu1 %v791_v35 }
 0x1a7   : > { %v4070_v10 = vadd.f32 %v1528_v46, %v1416_v7  ;;  %1772 = vmatmul.f32.gmra.mxu2 %v4623_v9  ;;  %1885 = vmatmul.f32.gmra.mxu3 %v4624_v39  ;;  %v4629_v46 = vld [vmem:[#allocation28_spill] sm:$0xff]  ;;  %v4631_v7 = vld [vmem:[#allocation59_spill] sm:$0xff] }
 0x1a8   : > { %v1531_v6 = vpop.f32.mrf.mxu0 }
 0x1a9   : > { %4622 = vst [vmem:[#allocation39_spill] sm:$0xff] %v4070_v10 }
 0x1aa   : > { %v1305_v5 = vpop.f32.mrf.mxu2  ;;  %v1418_v28 = vpop.f32.mrf.mxu3 }
 0x1ab   : > { %v1306_v1 = vadd.f32 %v1305_v5, %v1193_v43  ;;  %v1195_v4 = vpop.f32.mrf.mxu1  ;;  %1998 = vmatmul.f32.gmra.mxu0 %v4626_v33  ;;  %v4632_v5 = vld [vmem:[#allocation43_spill] sm:$0xff] }
 0x1ac   : > { %v1196_v15 = vadd.f32 %v1195_v4, %v4631_v7 }
 0x1ad   : > { %v1419_v25 = vadd.f32 %v1418_v28, %v1306_v1  ;;  %v4633_v1 = vld [vmem:[#allocation38_spill] sm:$0xff] }
 0x1ae   : > { %1598 = vmatmul.f32.gmra.mxu1 %v4627_v19  ;;  %v4636_v19 = vld [vmem:[#allocation44_spill] sm:$0xff] }
 0x1af   : > { %v4077_v16 = vadd.f32 %v1531_v6, %v1419_v25  ;;  %2571 = vmatmul.msk.f32.gmra.mxu2 %vm3200_vm1, %v4629_v46  ;;  %1888 = vmatmul.f32.gmra.mxu3 %v4630_v26  ;;  %v4635_v25 = vld [vmem:[#allocation30_spill] sm:$0xff]  ;;  %v4637_v26 = vld [vmem:[#allocation63_spill] sm:$0xff] }
 0x1b0   : > { %v1534_v35 = vpop.f32.mrf.mxu0 }
 0x1b1   : > { %4628 = vst [vmem:[#allocation26_spill] sm:$0xff] %v4077_v16 }
 0x1b2   : > { %v1308_v9 = vpop.f32.mrf.mxu2  ;;  %v1421_v39 = vpop.f32.mrf.mxu3 }
 0x1b3   : > { %v1309_v13 = vadd.f32 %v1308_v9, %v1196_v15  ;;  %v1198_v43 = vpop.f32.mrf.mxu1  ;;  %2001 = vmatmul.f32.gmra.mxu0 %v4632_v5  ;;  %v4638_v15 = vld [vmem:[#allocation45_spill] sm:$0xff] }
 0x1b4   : > { %v1199_v16 = vadd.f32 %v1198_v43, %v4637_v26  ;;  %v4643_v26 = vld [vmem:[#allocation47_spill] sm:$0xff] }
 0x1b5   : > { %v1422_v28 = vadd.f32 %v1421_v39, %v1309_v13  ;;  %v4641_v13 = vld [vmem:[#allocation46_spill] sm:$0xff] }
 0x1b6   : > { %1601 = vmatmul.f32.gmra.mxu1 %v4633_v1  ;;  %v4642_v1 = vld [vmem:[#allocation67_spill] sm:$0xff] }
 0x1b7   : > { %v4086_v6 = vadd.f32 %v1534_v35, %v1422_v28  ;;  %1778 = vmatmul.f32.gmra.mxu2 %v4635_v25  ;;  %1891 = vmatmul.f32.gmra.mxu3 %v4636_v19  ;;  %v4640_v35 = vld [vmem:[#allocation34_spill] sm:$0xff] }
 0x1b8   : > { %v1537_v46 = vpop.f32.mrf.mxu0 }
 0x1b9   : > { %4634 = vst [vmem:[#allocation40_spill] sm:$0xff] %v4086_v6 }
 0x1ba   : > { %v1311_v10 = vpop.f32.mrf.mxu2  ;;  %v1424_v4 = vpop.f32.mrf.mxu3 }
 0x1bb   : > { %v1312_v7 = vadd.f32 %v1311_v10, %v1199_v16  ;;  %v1201_v54 = vpop.f32.mrf.mxu1  ;;  %2004 = vmatmul.f32.gmra.mxu0 %v4638_v15 }
 0x1bc   : > { %v1202_v43 = vadd.f32 %v1201_v54, %v4642_v1 }
 0x1bd   : > { %v1425_v9 = vadd.f32 %v1424_v4, %v1312_v7  ;;  %v4646_v7 = vld [vmem:[#allocation48_spill] sm:$0xff] }
 0x1be   : > { %1604 = vmatmul.f32.gmra.mxu1 %v4621_v3 }
 0x1bf   : > { %v4093_v39 = vadd.f32 %v1537_v46, %v1425_v9  ;;  %2573 = vmatmul.msk.f32.gmra.mxu2 %vm3200_vm1, %v4640_v35  ;;  %1894 = vmatmul.f32.gmra.mxu3 %v4641_v13  ;;  %v4645_v46 = vld [vmem:[#allocation36_spill] sm:$0xff]  ;;  %v4647_v35 = vld [vmem:[#allocation71_spill] sm:$0xff] }
 0x1c0   : > { %v1540_v28 = vpop.f32.mrf.mxu0 }
 0x1c1   : > { %4639 = vst [vmem:[#allocation55_spill] sm:$0xff] %v4093_v39 }
 0x1c2   : > { %v1314_v25 = vpop.f32.mrf.mxu2  ;;  %v1427_v19 = vpop.f32.mrf.mxu3 }
 0x1c3   : > { %v1315_v10 = vadd.f32 %v1314_v25, %v1202_v43  ;;  %v1204_v16 = vpop.f32.mrf.mxu1  ;;  %2007 = vmatmul.f32.gmra.mxu0 %v4643_v26  ;;  %v4648_v43 = vld [vmem:[#allocation49_spill] sm:$0xff] }
 0x1c4   : > { %v1205_v13 = vadd.f32 %v1204_v16, %v4647_v35 }
 0x1c5   : > { %v1428_v4 = vadd.f32 %v1427_v19, %v1315_v10 }
 0x1c6   : > { %1607 = vmatmul.f32.gmra.mxu1 %v4626_v33  ;;  %v4650_v33 = vld [vmem:[#allocation22_spill] sm:$0xff] }
 0x1c7   : > { %v4102_v3 = vadd.f32 %v1540_v28, %v1428_v4  ;;  %1784 = vmatmul.f32.gmra.mxu2 %v4645_v46  ;;  %1897 = vmatmul.f32.gmra.mxu3 %v4646_v7  ;;  %v4651_v28 = vld [vmem:[#allocation50_spill] sm:$0xff] }
 0x1c8   : > { %v1543_v9 = vpop.f32.mrf.mxu0  ;;  %v4652_v4 = vld [vmem:[#allocation74_spill] sm:$0xff] }
 0x1c9   : > { %4644 = vst [vmem:[#allocation41_spill] sm:$0xff] %v4102_v3 }
 0x1ca   : > { %v1317_v39 = vpop.f32.mrf.mxu2  ;;  %v1430_v54 = vpop.f32.mrf.mxu3 }
 0x1cb   : > { %v1318_v1 = vadd.f32 %v1317_v39, %v1205_v13  ;;  %v1207_v6 = vpop.f32.mrf.mxu1  ;;  %2010 = vmatmul.f32.gmra.mxu0 %v4648_v43  ;;  %v4653_v13 = vld [vmem:[#allocation51_spill] sm:$0xff] }
 0x1cc   : > { %v1208_v16 = vadd.f32 %v1207_v6, %v4652_v4 }
 0x1cd   : > { %v1431_v25 = vadd.f32 %v1430_v54, %v1318_v1  ;;  %v4656_v1 = vld [vmem:[#allocation53_spill] sm:$0xff] }
 0x1ce   : > { %1610 = vmatmul.f32.gmra.mxu1 %v4632_v5 }
 0x1cf   : > { %v4109_v19 = vadd.f32 %v1543_v9, %v1431_v25  ;;  %2575 = vmatmul.msk.f32.gmra.mxu2 %vm3200_vm1, %v4650_v33  ;;  %1900 = vmatmul.f32.gmra.mxu3 %v4651_v28  ;;  %v4655_v9 = vld [vmem:[#allocation23_spill] sm:$0xff]  ;;  %v4657_v33 = vld [vmem:[#allocation77_spill] sm:$0xff] }
 0x1d0   : > { %v1546_v10 = vpop.f32.mrf.mxu0 }
 0x1d1   : > { %4649 = vst [vmem:[#allocation37_spill] sm:$0xff] %v4109_v19 }
 0x1d2   : > { %v1320_v46 = vpop.f32.mrf.mxu2  ;;  %v1433_v7 = vpop.f32.mrf.mxu3 }
 0x1d3   : > { %v1321_v39 = vadd.f32 %v1320_v46, %v1208_v16  ;;  %v1210_v35 = vpop.f32.mrf.mxu1  ;;  %2013 = vmatmul.f32.gmra.mxu0 %v4653_v13  ;;  %v4658_v16 = vld [vmem:[#allocation54_spill] sm:$0xff] }
 0x1d4   : > { %v1211_v28 = vadd.f32 %v1210_v35, %v4657_v33 }
 0x1d5   : > { %v1434_v54 = vadd.f32 %v1433_v7, %v1321_v39 }
 0x1d6   : > { %1613 = vmatmul.f32.gmra.mxu1 %v4638_v15  ;;  %v4660_v15 = vld [vmem:[#allocation24_spill] sm:$0xff] }
 0x1d7   : > { %v4118_v5 = vadd.f32 %v1546_v10, %v1434_v54  ;;  %1790 = vmatmul.f32.gmra.mxu2 %v4655_v9  ;;  %1903 = vmatmul.f32.gmra.mxu3 %v4656_v1  ;;  %v4661_v10 = vld [vmem:[#allocation57_spill] sm:$0xff]  ;;  %v4662_v54 = vld [vmem:[#allocation52_spill] sm:$0xff] }
 0x1d8   : > { %v1549_v25 = vpop.f32.mrf.mxu0 }
 0x1d9   : > { %4654 = vst [vmem:[#allocation28_spill] sm:$0xff] %v4118_v5 }
 0x1da   : > { %v1323_v19 = vpop.f32.mrf.mxu2  ;;  %v1436_v6 = vpop.f32.mrf.mxu3 }
 0x1db   : > { %v1324_v4 = vadd.f32 %v1323_v19, %v1211_v28  ;;  %v1213_v3 = vpop.f32.mrf.mxu1  ;;  %2016 = vmatmul.f32.gmra.mxu0 %v4658_v16  ;;  %v4663_v28 = vld [vmem:[#allocation58_spill] sm:$0xff] }
 0x1dc   : > { %v1214_v35 = vadd.f32 %v1213_v3, %v4662_v54 }
 0x1dd   : > { %v1437_v46 = vadd.f32 %v1436_v6, %v1324_v4  ;;  %v4666_v4 = vld [vmem:[#allocation61_spill] sm:$0xff] }
 0x1de   : > { %1616 = vmatmul.f32.gmra.mxu1 %v4643_v26 }
 0x1df   : > { %v4125_v7 = vadd.f32 %v1549_v25, %v1437_v46  ;;  %2577 = vmatmul.msk.f32.gmra.mxu2 %vm3200_vm1, %v4660_v15  ;;  %1906 = vmatmul.f32.gmra.mxu3 %v4661_v10  ;;  %v4665_v25 = vld [vmem:[#allocation25_spill] sm:$0xff]  ;;  %v4667_v15 = vld [vmem:[#allocation56_spill] sm:$0xff] }
 0x1e0   : > { %v1552_v39 = vpop.f32.mrf.mxu0 }
 0x1e1   : > { %4659 = vst [vmem:[#allocation42_spill] sm:$0xff] %v4125_v7 }
 0x1e2   : > { %v1326_v9 = vpop.f32.mrf.mxu2  ;;  %v1439_v1 = vpop.f32.mrf.mxu3 }
 0x1e3   : > { %v1327_v19 = vadd.f32 %v1326_v9, %v1214_v35  ;;  %v1216_v33 = vpop.f32.mrf.mxu1  ;;  %2019 = vmatmul.f32.gmra.mxu0 %v4663_v28  ;;  %v4668_v35 = vld [vmem:[#allocation62_spill] sm:$0xff] }
 0x1e4   : > { %v1217_v10 = vadd.f32 %v1216_v33, %v4667_v15 }
 0x1e5   : > { %v1440_v6 = vadd.f32 %v1439_v1, %v1327_v19 }
 0x1e6   : > { %1619 = vmatmul.f32.gmra.mxu1 %v4648_v43  ;;  %v4670_v43 = vld [vmem:[#allocation27_spill] sm:$0xff] }
 0x1e7   : > { %v4134_v26 = vadd.f32 %v1552_v39, %v1440_v6  ;;  %1796 = vmatmul.f32.gmra.mxu2 %v4665_v25  ;;  %1909 = vmatmul.f32.gmra.mxu3 %v4666_v4  ;;  %v4671_v39 = vld [vmem:[#allocation65_spill] sm:$0xff]  ;;  %v4672_v6 = vld [vmem:[#allocation60_spill] sm:$0xff] }
 0x1e8   : > { %v1555_v46 = vpop.f32.mrf.mxu0 }
 0x1e9   : > { %4664 = vst [vmem:[#allocation59_spill] sm:$0xff] %v4134_v26 }
 0x1ea   : > { %v1329_v7 = vpop.f32.mrf.mxu2  ;;  %v1442_v3 = vpop.f32.mrf.mxu3 }
 0x1eb   : > { %v1330_v54 = vadd.f32 %v1329_v7, %v1217_v10  ;;  %v1219_v5 = vpop.f32.mrf.mxu1  ;;  %2022 = vmatmul.f32.gmra.mxu0 %v4668_v35  ;;  %v4673_v10 = vld [vmem:[#allocation66_spill] sm:$0xff] }
 0x1ec   : > { %v1220_v33 = vadd.f32 %v1219_v5, %v4672_v6 }
 0x1ed   : > { %v1443_v9 = vadd.f32 %v1442_v3, %v1330_v54  ;;  %v4675_v54 = vld [vmem:[#allocation69_spill] sm:$0xff] }
 0x1ee   : > { %1622 = vmatmul.f32.gmra.mxu1 %v4653_v13 }
 0x1ef   : > { %v4141_v1 = vadd.f32 %v1555_v46, %v1443_v9  ;;  %2579 = vmatmul.msk.f32.gmra.mxu2 %vm3200_vm1, %v4670_v43  ;;  %1912 = vmatmul.f32.gmra.mxu3 %v4671_v39  ;;  %v4674_v46 = vld [vmem:[#allocation29_spill] sm:$0xff]  ;;  %v4676_v43 = vld [vmem:[#allocation64_spill] sm:$0xff] }
 0x1f0   : > { %v1558_v19 = vpop.f32.mrf.mxu0 }
 0x1f1   : > { %4669 = vst [vmem:[#allocation43_spill] sm:$0xff] %v4141_v1 }
 0x1f2   : > { %v1332_v25 = vpop.f32.mrf.mxu2  ;;  %v1445_v4 = vpop.f32.mrf.mxu3 }
 0x1f3   : > { %v1333_v7 = vadd.f32 %v1332_v25, %v1220_v33  ;;  %v1222_v15 = vpop.f32.mrf.mxu1  ;;  %2025 = vmatmul.f32.gmra.mxu0 %v4673_v10  ;;  %v4677_v33 = vld [vmem:[#allocation70_spill] sm:$0xff] }
 0x1f4   : > { %v1223_v39 = vadd.f32 %v1222_v15, %v4676_v43  ;;  %v4680_v43 = vld [vmem:[#allocation73_spill] sm:$0xff] }
 0x1f5   : > { %v1446_v3 = vadd.f32 %v1445_v4, %v1333_v7  ;;  %v4679_v7 = vld [vmem:[#allocation68_spill] sm:$0xff] }
 0x1f6   : > { %1625 = vmatmul.f32.gmra.mxu1 %v4658_v16  ;;  %v4678_v16 = vld [vmem:[#allocation31_spill] sm:$0xff] }
 0x1f7   : > { %v4150_v13 = vadd.f32 %v1558_v19, %v1446_v3  ;;  %1802 = vmatmul.f32.gmra.mxu2 %v4674_v46  ;;  %1915 = vmatmul.f32.gmra.mxu3 %v4675_v54 }
 0x1f8   : > { %v1561_v9 = vpop.f32.mrf.mxu0 }
 0x1fa   : > { %v1335_v1 = vpop.f32.mrf.mxu2  ;;  %v1448_v5 = vpop.f32.mrf.mxu3 }
 0x1fb   : > { %v1336_v6 = vadd.f32 %v1335_v1, %v1223_v39  ;;  %v1225_v26 = vpop.f32.mrf.mxu1  ;;  %2028 = vmatmul.f32.gmra.mxu0 %v4677_v33 }
 0x1fc   : > { %v1226_v15 = vadd.f32 %v1225_v26, %v4679_v7  ;;  %v4682_v7 = vld [vmem:[#allocation76_spill] sm:$0xff] }
 0x1fd   : > { %v1449_v25 = vadd.f32 %v1448_v5, %v1336_v6 }
 0x1fe   : > { %1628 = vmatmul.f32.gmra.mxu1 %v4663_v28 }
 0x1ff   : > { %v4157_v4 = vadd.f32 %v1561_v9, %v1449_v25  ;;  %2581 = vmatmul.msk.f32.gmra.mxu2 %vm3200_vm1, %v4678_v16  ;;  %1918 = vmatmul.f32.gmra.mxu3 %v3733_v60  ;;  %v4681_v60 = vld [vmem:[#allocation72_spill] sm:$0xff] }
 0x200   : > { %v1564_v19 = vpop.f32.mrf.mxu0 }
 0x202   : > { %v1338_v3 = vpop.f32.mrf.mxu2  ;;  %v1451_v46 = vpop.f32.mrf.mxu3 }
 0x203   : > { %v1339_v1 = vadd.f32 %v1338_v3, %v1226_v15  ;;  %v1228_v54 = vpop.f32.mrf.mxu1  ;;  %2031 = vmatmul.f32.gmra.mxu0 %v4680_v43 }
 0x204   : > { %v1229_v5 = vadd.f32 %v1228_v54, %v4681_v60 }
 0x205   : > { %v1452_v39 = vadd.f32 %v1451_v46, %v1339_v1 }
 0x206   : > { %1631 = vmatmul.f32.gmra.mxu1 %v4668_v35 }
 0x207   : > { %v4166_v28 = vadd.f32 %v1564_v19, %v1452_v39  ;;  %1808 = vmatmul.f32.gmra.mxu2 %v3448_v58  ;;  %1921 = vmatmul.f32.gmra.mxu3 %v3756_v29  ;;  %v4683_v58 = vld [vmem:[#allocation75_spill] sm:$0xff] }
 0x208   : > { %v1567_v9 = vpop.f32.mrf.mxu0  ;;  %v4684_v39 = vld [vmem:[#allocation79_spill] sm:$0xff] }
 0x20a   : > { %v1341_v6 = vpop.f32.mrf.mxu2  ;;  %v1454_v26 = vpop.f32.mrf.mxu3 }
 0x20b   : > { %v1342_v25 = vadd.f32 %v1341_v6, %v1229_v5  ;;  %v1231_v16 = vpop.f32.mrf.mxu1  ;;  %2034 = vmatmul.f32.gmra.mxu0 %v4682_v7 }
 0x20c   : > { %v1232_v35 = vadd.f32 %v1231_v16, %v4683_v58  ;;  %v4686_v16 = vld [vmem:[#allocation80_spill] sm:$0xff] }
 0x20d   : > { %v1455_v15 = vadd.f32 %v1454_v26, %v1342_v25 }
 0x20e   : > { %1634 = vmatmul.f32.gmra.mxu1 %v4673_v10 }
 0x20f   : > { %v4173_v3 = vadd.f32 %v1567_v9, %v1455_v15  ;;  %2583 = vmatmul.msk.f32.gmra.mxu2 %vm3200_vm1, %v3204_v21  ;;  %1924 = vmatmul.f32.gmra.mxu3 %v3776_v57  ;;  %v4685_v57 = vld [vmem:[#allocation78_spill] sm:$0xff] }
 0x210   : > { %v1570_v29 = vpop.f32.mrf.mxu0 }
 0x212   : > { %v1344_v19 = vpop.f32.mrf.mxu2  ;;  %v1457_v46 = vpop.f32.mrf.mxu3 }
 0x213   : > { %v1345_v1 = vadd.f32 %v1344_v19, %v1232_v35  ;;  %v1234_v54 = vpop.f32.mrf.mxu1  ;;  %2037 = vmatmul.f32.gmra.mxu0 %v4684_v39  ;;  %v4687_v19 = vld [vmem:[#allocation81_spill] sm:$0xff] }
 0x214   : > { %v1235_v9 = vadd.f32 %v1234_v54, %v4685_v57  ;;  %v4688_v57 = vld [vmem:[#allocation83_spill] sm:$0xff] }
 0x215   : > { %v1458_v60 = vadd.f32 %v1457_v46, %v1345_v1 }
 0x216   : > { %1637 = vmatmul.f32.gmra.mxu1 %v4677_v33 }
 0x217   : > { %v4182_v10 = vadd.f32 %v1570_v29, %v1458_v60  ;;  %1814 = vmatmul.f32.gmra.mxu2 %v3248_v44  ;;  %1927 = vmatmul.f32.gmra.mxu3 %v3792_v48 }
 0x218   : > { %v1573_v21 = vpop.f32.mrf.mxu0 }
 0x21a   : > { %v1347_v5 = vpop.f32.mrf.mxu2  ;;  %v1460_v6 = vpop.f32.mrf.mxu3 }
 0x21b   : > { %v1348_v26 = vadd.f32 %v1347_v5, %v1235_v9  ;;  %v1593_v25 = vpop.f32.mrf.mxu1  ;;  %2040 = vmatmul.f32.gmra.mxu0 %v4686_v16  ;;  %v4689_v9 = vld [vmem:[#allocation82_spill] sm:$0xff] }
 0x21c   : > { %v1594_v46 = vadd.f32 %v1593_v25, %v4687_v19 }
 0x21d   : > { %v1461_v15 = vadd.f32 %v1460_v6, %v1348_v26 }
 0x21e   : > { %1640 = vmatmul.f32.gmra.mxu1 %v4680_v43 }
 0x21f   : > { %v4189_v58 = vadd.f32 %v1573_v21, %v1461_v15  ;;  %2585 = vmatmul.msk.f32.gmra.mxu2 %vm3200_vm1, %v3272_v63  ;;  %1930 = vmatmul.f32.gmra.mxu3 %v3809_v52 }
 0x220   : > { %v1996_v44 = vpop.f32.mrf.mxu0 }
 0x222   : > { %v1770_v48 = vpop.f32.mrf.mxu2  ;;  %v1883_v33 = vpop.f32.mrf.mxu3 }
 0x223   : > { %v1884_v29 = vadd.f32 %v1883_v33, %v1770_v48  ;;  %v1596_v35 = vpop.f32.mrf.mxu1  ;;  %2043 = vmatmul.f32.gmra.mxu0 %v3813_v37 }
 0x225   : > { %v1997_v1 = vadd.f32 %v1996_v44, %v1884_v29 }
 0x226   : > { %1643 = vmatmul.f32.gmra.mxu1 %v4682_v7  ;;  %v1597_v7 = vadd.f32 %v1596_v35, %v4689_v9  ;;  %v4691_v9 = vld [vmem:[#allocation86_spill] sm:$0xff] }
 0x227   : > { %v2092_v43 = vadd.f32 %v1997_v1, %v1594_v46  ;;  %1820 = vmatmul.f32.gmra.mxu2 %v3316_v31  ;;  %1933 = vmatmul.f32.gmra.mxu3 %v3827_v47 }
 0x228   : > { %v1999_v63 = vpop.f32.mrf.mxu0 }
 0x229   : > { %2124 = vst [vmem:[%s4202_s30] sm:$0xff] %v2092_v43  ;;  %v2193_v6 = vmul.f32 %v2092_v43, %v2092_v43 }
 0x22a   : > { %v1773_v52 = vpop.f32.mrf.mxu2  ;;  %v1886_v54 = vpop.f32.mrf.mxu3 }
 0x22b   : > { %v1887_v60 = vadd.f32 %v1886_v54, %v1773_v52  ;;  %v1599_v21 = vpop.f32.mrf.mxu1  ;;  %2046 = vmatmul.f32.gmra.mxu0 %v4688_v57 }
 0x22d   : > { %v2000_v5 = vadd.f32 %v1999_v63, %v1887_v60 }
 0x22e   : > { %1646 = vmatmul.f32.gmra.mxu1 %v4684_v39  ;;  %v4690_v39 = vld [vmem:[#allocation84_spill] sm:$0xff] }
 0x22f   : > { %v2093_v31 = vadd.f32 %v2000_v5, %v1597_v7  ;;  %2587 = vmatmul.msk.f32.gmra.mxu2 %vm3200_vm1, %v3340_v61  ;;  %1936 = vmatmul.f32.gmra.mxu3 %v3844_v51  ;;  %v1600_v35 = vadd.f32 %v1599_v21, %v4690_v39  ;;  %v4692_v21 = vld [vmem:[#allocation85_spill] sm:$0xff] }
 0x230   : > { %v2002_v47 = vpop.f32.mrf.mxu0 }
 0x231   : > { %2125 = vst [vmem:[%s4202_s30 + $0x8] sm:$0xff] %v2093_v31  ;;  %v2156_v26 = vadd.f32 %v2093_v31, %v2092_v43  ;;  %v2194_v25 = vmul.f32 %v2093_v31, %v2093_v31 }
 0x232   : > { %v1776_v15 = vpop.f32.mrf.mxu2  ;;  %v1889_v44 = vpop.f32.mrf.mxu3 }
 0x233   : > { %v2225_v48 = vadd.f32 %v2194_v25, %v2193_v6  ;;  %v1890_v33 = vadd.f32 %v1889_v44, %v1776_v15  ;;  %v1602_v29 = vpop.f32.mrf.mxu1  ;;  %2049 = vmatmul.f32.gmra.mxu0 %v3848_v11 }
 0x234   : > { %v1603_v7 = vadd.f32 %v1602_v29, %v4692_v21 }
 0x235   : > { %v2003_v19 = vadd.f32 %v2002_v47, %v1890_v33 }
 0x236   : > { %1649 = vmatmul.f32.gmra.mxu1 %v4686_v16 }
 0x237   : > { %v2094_v61 = vadd.f32 %v2003_v19, %v1600_v35  ;;  %1826 = vmatmul.f32.gmra.mxu2 %v3384_v53  ;;  %1939 = vmatmul.f32.gmra.mxu3 %v3862_v50 }
 0x238   : > { %v2005_v51 = vpop.f32.mrf.mxu0 }
 0x239   : > { %2126 = vst [vmem:[%s4202_s30 + $0x10] sm:$0xff] %v2094_v61  ;;  %v2157_v46 = vadd.f32 %v2156_v26, %v2094_v61  ;;  %v2195_v1 = vmul.f32 %v2094_v61, %v2094_v61 }
 0x23a   : > { %v1779_v43 = vpop.f32.mrf.mxu2  ;;  %v1892_v63 = vpop.f32.mrf.mxu3 }
 0x23b   : > { %v2226_v52 = vadd.f32 %v2225_v48, %v2195_v1  ;;  %v1893_v54 = vadd.f32 %v1892_v63, %v1779_v43  ;;  %v1605_v60 = vpop.f32.mrf.mxu1  ;;  %2052 = vmatmul.f32.gmra.mxu0 %v4691_v9  ;;  %v4695_v1 = vld [vmem:[#allocation88_spill] sm:$0xff] }
 0x23d   : > { %v2006_v16 = vadd.f32 %v2005_v51, %v1893_v54 }
 0x23e   : > { %1652 = vmatmul.f32.gmra.mxu1 %v3813_v37  ;;  %v4693_v37 = vld [vmem:[#allocation87_spill] sm:$0xff] }
 0x23f   : > { %v2095_v53 = vadd.f32 %v2006_v16, %v1603_v7  ;;  %2589 = vmatmul.msk.f32.gmra.mxu2 %vm3200_vm1, %v3408_v49  ;;  %1942 = vmatmul.f32.gmra.mxu3 %v3879_v17  ;;  %v1606_v44 = vadd.f32 %v1605_v60, %v4693_v37  ;;  %v4697_v37 = vld [vmem:[#allocation92_spill] sm:$0xff] }
 0x240   : > { %v2008_v50 = vpop.f32.mrf.mxu0 }
 0x241   : > { %2127 = vst [vmem:[%s4202_s30 + $0x18] sm:$0xff] %v2095_v53  ;;  %v2158_v5 = vadd.f32 %v2157_v46, %v2095_v53  ;;  %v2196_v31 = vmul.f32 %v2095_v53, %v2095_v53  ;;  %v4694_v46 = vld [vmem:[#allocation89_spill] sm:$0xff] }
 0x242   : > { %v1782_v47 = vpop.f32.mrf.mxu2  ;;  %v1895_v6 = vpop.f32.mrf.mxu3 }
 0x243   : > { %v2227_v26 = vadd.f32 %v2226_v52, %v2196_v31  ;;  %v1896_v25 = vadd.f32 %v1895_v6, %v1782_v47  ;;  %v1608_v15 = vpop.f32.mrf.mxu1  ;;  %2055 = vmatmul.f32.gmra.mxu0 %v3883_v56 }
 0x244   : > { %v1609_v43 = vadd.f32 %v1608_v15, %v4695_v1 }
 0x245   : > { %v2009_v48 = vadd.f32 %v2008_v50, %v1896_v25 }
 0x246   : > { %1655 = vmatmul.f32.gmra.mxu1 %v4688_v57 }
 0x247   : > { %v2096_v49 = vadd.f32 %v2009_v48, %v1606_v44  ;;  %1832 = vmatmul.f32.gmra.mxu2 %v3454_v24  ;;  %1945 = vmatmul.f32.gmra.mxu3 %v3897_v32  ;;  %v4698_v44 = vld [vmem:[#allocation91_spill] sm:$0xff] }
 0x248   : > { %v2011_v17 = vpop.f32.mrf.mxu0 }
 0x249   : > { %2128 = vst [vmem:[%s4202_s30 + $0x20] sm:$0xff] %v2096_v49  ;;  %v2159_v33 = vadd.f32 %v2158_v5, %v2096_v49  ;;  %v2197_v29 = vmul.f32 %v2096_v49, %v2096_v49 }
 0x24a   : > { %v1785_v39 = vpop.f32.mrf.mxu2  ;;  %v1898_v35 = vpop.f32.mrf.mxu3 }
 0x24b   : > { %v2228_v19 = vadd.f32 %v2227_v26, %v2197_v29  ;;  %v1899_v61 = vadd.f32 %v1898_v35, %v1785_v39  ;;  %v1611_v51 = vpop.f32.mrf.mxu1  ;;  %2058 = vmatmul.f32.gmra.mxu0 %v4694_v46 }
 0x24d   : > { %v2012_v57 = vadd.f32 %v2011_v17, %v1899_v61 }
 0x24e   : > { %1658 = vmatmul.f32.gmra.mxu1 %v3848_v11  ;;  %v4696_v11 = vld [vmem:[#allocation90_spill] sm:$0xff] }
 0x24f   : > { %v2097_v24 = vadd.f32 %v2012_v57, %v1609_v43  ;;  %2591 = vmatmul.msk.f32.gmra.mxu2 %vm3200_vm1, %v3206_v22  ;;  %1948 = vmatmul.f32.gmra.mxu3 %v3914_v30  ;;  %v1612_v53 = vadd.f32 %v1611_v51, %v4696_v11 }
 0x250   : > { %v2014_v32 = vpop.f32.mrf.mxu0 }
 0x251   : > { %2129 = vst [vmem:[%s4202_s30 + $0x28] sm:$0xff] %v2097_v24  ;;  %v2160_v63 = vadd.f32 %v2159_v33, %v2097_v24  ;;  %v2198_v52 = vmul.f32 %v2097_v24, %v2097_v24 }
 0x252   : > { %v1788_v54 = vpop.f32.mrf.mxu2  ;;  %v1901_v60 = vpop.f32.mrf.mxu3 }
 0x253   : > { %v2229_v21 = vadd.f32 %v2228_v19, %v2198_v52  ;;  %v1902_v7 = vadd.f32 %v1901_v60, %v1788_v54  ;;  %v1614_v16 = vpop.f32.mrf.mxu1  ;;  %2061 = vmatmul.f32.gmra.mxu0 %v3918_v14  ;;  %v4700_v54 = vld [vmem:[#allocation95_spill] sm:$0xff]  ;;  %v4701_v60 = vld [vmem:[#allocation94_spill] sm:$0xff] }
 0x254   : > { %v1615_v48 = vadd.f32 %v1614_v16, %v4698_v44  ;;  %v451_v44 = vld [vmem:[%s3188_s29] sm:$0xff] }
 0x255   : > { %v2015_v50 = vadd.f32 %v2014_v32, %v1902_v7 }
 0x256   : > { %1661 = vmatmul.f32.gmra.mxu1 %v4691_v9 }
 0x257   : > { %v2098_v22 = vadd.f32 %v2015_v50, %v1612_v53  ;;  %1838 = vmatmul.f32.gmra.mxu2 %v3254_v45  ;;  %1951 = vmatmul.f32.gmra.mxu3 %v3932_v2 }
 0x258   : > { %v2017_v30 = vpop.f32.mrf.mxu0 }
 0x259   : > { %2130 = vst [vmem:[%s4202_s30 + $0x30] sm:$0xff] %v2098_v22  ;;  %v2161_v5 = vadd.f32 %v2160_v63, %v2098_v22  ;;  %v2199_v31 = vmul.f32 %v2098_v22, %v2098_v22 }
 0x25a   : > { %v1791_v47 = vpop.f32.mrf.mxu2  ;;  %v1904_v6 = vpop.f32.mrf.mxu3 }
 0x25b   : > { %v2230_v26 = vadd.f32 %v2229_v21, %v2199_v31  ;;  %v1905_v25 = vadd.f32 %v1904_v6, %v1791_v47  ;;  %v1617_v15 = vpop.f32.mrf.mxu1  ;;  %2064 = vmatmul.f32.gmra.mxu0 %v4697_v37 }
 0x25d   : > { %v2018_v9 = vadd.f32 %v2017_v30, %v1905_v25 }
 0x25e   : > { %1664 = vmatmul.f32.gmra.mxu1 %v3883_v56  ;;  %v4699_v56 = vld [vmem:[#allocation93_spill] sm:$0xff] }
 0x25f   : > { %v2099_v45 = vadd.f32 %v2018_v9, %v1615_v48  ;;  %2593 = vmatmul.msk.f32.gmra.mxu2 %vm3200_vm1, %v3274_v0  ;;  %1954 = vmatmul.f32.gmra.mxu3 %v3949_v27  ;;  %v1618_v61 = vadd.f32 %v1617_v15, %v4699_v56  ;;  %v452_v48 = vld [vmem:[%s3188_s29 + $0x8] sm:$0xff] }
 0x260   : > { %v2020_v2 = vpop.f32.mrf.mxu0 }
 0x261   : > { %2131 = vst [vmem:[%s4202_s30 + $0x38] sm:$0xff] %v2099_v45  ;;  %v2162_v49 = vadd.f32 %v2161_v5, %v2099_v45  ;;  %v2200_v17 = vmul.f32 %v2099_v45, %v2099_v45  ;;  %v4703_v5 = vld [vmem:[#allocation96_spill] sm:$0xff] }
 0x262   : > { %v1794_v33 = vpop.f32.mrf.mxu2  ;;  %v1907_v29 = vpop.f32.mrf.mxu3 }
 0x263   : > { %v2231_v39 = vadd.f32 %v2230_v26, %v2200_v17  ;;  %v1908_v35 = vadd.f32 %v1907_v29, %v1794_v33  ;;  %v1620_v19 = vpop.f32.mrf.mxu1  ;;  %2067 = vmatmul.f32.gmra.mxu0 %v3953_v12  ;;  %v459_v29 = vmul.f32 0.0, %v452_v48 }
 0x264   : > { %v1621_v21 = vadd.f32 %v1620_v19, %v4701_v60  ;;  %v4708_v60 = vld [vmem:[#allocation35_spill] sm:$0xff] }
 0x265   : > { %v2021_v51 = vadd.f32 %v2020_v2, %v1908_v35 }
 0x266   : > { %1667 = vmatmul.f32.gmra.mxu1 %v4694_v46 }
 0x267   : > { %v2100_v0 = vadd.f32 %v2021_v51, %v1618_v61  ;;  %1844 = vmatmul.f32.gmra.mxu2 %v3322_v36  ;;  %1957 = vmatmul.f32.gmra.mxu3 %v3967_v34  ;;  %v549_v51 = vrot.slane %v459_v29, 7 }
 0x268   : > { %v2023_v27 = vpop.f32.mrf.mxu0 }
 0x269   : > { %2132 = vst [vmem:[%s4202_s30 + $0x40] sm:$0xff] %v2100_v0  ;;  %v2163_v1 = vadd.f32 %v2162_v49, %v2100_v0  ;;  %v2201_v43 = vmul.f32 %v2100_v0, %v2100_v0  ;;  %v4704_v49 = vld [vmem:[#allocation99_spill] sm:$0xff] }
 0x26a   : > { %v1797_v57 = vpop.f32.mrf.mxu2  ;;  %v1910_v24 = vpop.f32.mrf.mxu3 }
 0x26b   : > { %v2232_v32 = vadd.f32 %v2231_v39, %v2201_v43  ;;  %v1911_v63 = vadd.f32 %v1910_v24, %v1797_v57  ;;  %v1623_v52 = vpop.f32.mrf.mxu1  ;;  %2070 = vmatmul.f32.gmra.mxu0 %v4700_v54  ;;  %v4706_v39 = vld [vmem:[#allocation32_spill] sm:$0xff] }
 0x26c   : > { %v1624_v31 = vadd.f32 %v1623_v52, %v4703_v5 }
 0x26d   : > { %v2024_v46 = vadd.f32 %v2023_v27, %v1911_v63 }
 0x26e   : > { %1670 = vmatmul.f32.gmra.mxu1 %v3918_v14  ;;  %v4702_v14 = vld [vmem:[#allocation97_spill] sm:$0xff] }
 0x26f   : > { %v2101_v36 = vadd.f32 %v2024_v46, %v1621_v21  ;;  %2595 = vmatmul.msk.f32.gmra.mxu2 %vm3200_vm1, %v3342_v62  ;;  %1960 = vmatmul.f32.gmra.mxu3 %v3986_v42 }
 0x270   : > { %v2026_v34 = vpop.f32.mrf.mxu0 }
 0x271   : > { %2133 = vst [vmem:[%s4202_s30 + $0x48] sm:$0xff] %v2101_v36  ;;  %v2164_v7 = vadd.f32 %v2163_v1, %v2101_v36  ;;  %v2202_v16 = vmul.f32 %v2101_v36, %v2101_v36 }
 0x272   : > { %v1800_v11 = vpop.f32.mrf.mxu2  ;;  %v1913_v53 = vpop.f32.mrf.mxu3 }
 0x273   : > { %v2233_v50 = vadd.f32 %v2232_v32, %v2202_v16  ;;  %v1914_v22 = vadd.f32 %v1913_v53, %v1800_v11  ;;  %v1626_v30 = vpop.f32.mrf.mxu1  ;;  %2073 = vmatmul.f32.gmra.mxu0 %v4702_v14 }
 0x275   : > { %v2027_v47 = vadd.f32 %v2026_v34, %v1914_v22 }
 0x276   : > { %1673 = vmatmul.f32.gmra.mxu1 %v4697_v37  ;;  %v4705_v37 = vld [vmem:[#allocation98_spill] sm:$0xff] }
 0x277   : > { %v2102_v62 = vadd.f32 %v2027_v47, %v1624_v31  ;;  %1850 = vmatmul.f32.gmra.mxu2 %v3390_v55  ;;  %1963 = vmatmul.f32.gmra.mxu3 %v4009_v59  ;;  %v1627_v17 = vadd.f32 %v1626_v30, %v4705_v37  ;;  %v458_v55 = vmul.f32 0.0, %v451_v44  ;;  %v640_v31 = vsel %vm496_vm0, %v549_v51, 0.0 }
 0x278   : > { %v2029_v42 = vpop.f32.mrf.mxu0 }
 0x279   : > { %2134 = vst [vmem:[%s4202_s30 + $0x50] sm:$0xff] %v2102_v62  ;;  %v2165_v6 = vadd.f32 %v2164_v7, %v2102_v62  ;;  %v2203_v26 = vmul.f32 %v2102_v62, %v2102_v62  ;;  %v548_v61 = vrot.slane %v458_v55, 7 }
 0x27a   : > { %v1803_v25 = vpop.f32.mrf.mxu2  ;;  %v1916_v15 = vpop.f32.mrf.mxu3 }
 0x27b   : > { %v2234_v9 = vadd.f32 %v2233_v50, %v2203_v26  ;;  %v1917_v45 = vadd.f32 %v1916_v15, %v1803_v25  ;;  %v1629_v2 = vpop.f32.mrf.mxu1  ;;  %2076 = vmatmul.f32.gmra.mxu0 %v4704_v49  ;;  %v550_v63 = vsel %vm496_vm0, %v548_v61, %v549_v51 }
 0x27c   : > { %v1692_v36 = vrot.slane %v550_v63, 1  ;;  %v1699_v30 = vrot.slane %v550_v63, 2 }
 0x27d   : > { %v2030_v33 = vadd.f32 %v2029_v42, %v1917_v45  ;;  %v1694_v42 = vrot.slane %v640_v31, 1 }
 0x27e   : > { %1676 = vmatmul.f32.gmra.mxu1 %v3953_v12  ;;  %v4707_v12 = vld [vmem:[#allocation100_spill] sm:$0xff] }
 0x27f   : > { %v2103_v59 = vadd.f32 %v2030_v33, %v1627_v17  ;;  %2597 = vmatmul.msk.f32.gmra.mxu2 %vm3200_vm1, %v4706_v39  ;;  %1966 = vmatmul.f32.gmra.mxu3 %v4026_v40  ;;  %v1630_v24 = vadd.f32 %v1629_v2, %v4707_v12  ;;  %v622_v40 = vsel %vm496_vm0, 0.0, %v548_v61 }
 0x280   : > { %v2032_v35 = vpop.f32.mrf.mxu0  ;;  %v1691_v46 = vrot.slane %v622_v40, 1  ;;  %v1698_v22 = vrot.slane %v622_v40, 2 }
 0x281   : > { %2135 = vst [vmem:[%s4202_s30 + $0x58] sm:$0xff] %v2103_v59  ;;  %v2166_v19 = vadd.f32 %v2165_v6, %v2103_v59  ;;  %v2204_v56 = vmul.f32 %v2103_v59, %v2103_v59 }
 0x282   : > { %v1806_v0 = vpop.f32.mrf.mxu2  ;;  %v1919_v27 = vpop.f32.mrf.mxu3 }
 0x283   : > { %v2235_v1 = vadd.f32 %v2234_v9, %v2204_v56  ;;  %v1920_v43 = vadd.f32 %v1919_v27, %v1806_v0  ;;  %v1632_v57 = vpop.f32.mrf.mxu1  ;;  %2079 = vmatmul.f32.gmra.mxu0 %v4030_v8  ;;  %v1701_v9 = vrot.slane %v640_v31, 2 }
 0x285   : > { %v2033_v32 = vadd.f32 %v2032_v35, %v1920_v43  ;;  %v1702_v17 = vsel %vm786_vm3, %v1699_v30, %v1701_v9 }
 0x286   : > { %1679 = vmatmul.f32.gmra.mxu1 %v4700_v54  ;;  %v1693_v54 = vsel %vm673_vm2, %v1691_v46, %v1692_v36 }
 0x287   : > { %v2104_v52 = vadd.f32 %v2033_v32, %v1630_v24  ;;  %1856 = vmatmul.f32.gmra.mxu2 %v4708_v60  ;;  %1969 = vmatmul.f32.gmra.mxu3 %v4044_v41  ;;  %v1633_v41 = vadd.f32 %v1632_v57, %v4036_v18  ;;  %v4710_v32 = vld [vmem:[#allocation39_spill] sm:$0xff] }
 0x288   : > { %v2035_v21 = vpop.f32.mrf.mxu0 }
 0x289   : > { %2136 = vst [vmem:[%s4202_s30 + $0x60] sm:$0xff] %v2104_v52  ;;  %v2167_v34 = vadd.f32 %v2166_v19, %v2104_v52  ;;  %v2205_v8 = vmul.f32 %v2104_v52, %v2104_v52 }
 0x28a   : > { %v1809_v7 = vpop.f32.mrf.mxu2  ;;  %v1922_v16 = vpop.f32.mrf.mxu3 }
 0x28b   : > { %v2236_v11 = vadd.f32 %v2235_v1, %v2205_v8  ;;  %v1923_v53 = vadd.f32 %v1922_v16, %v1809_v7  ;;  %v1635_v50 = vpop.f32.mrf.mxu1  ;;  %2082 = vmatmul.f32.gmra.mxu0 %v4048_v23  ;;  %v1700_v23 = vsel %vm786_vm3, %v1698_v22, %v1699_v30 }
 0x28c   : > { %v1636_v20 = vadd.f32 %v1635_v50, %v4051_v38  ;;  %v4709_v38 = vld [vmem:[#allocation33_spill] sm:$0xff] }
 0x28d   : > { %v2036_v5 = vadd.f32 %v2035_v21, %v1923_v53 }
 0x28e   : > { %1682 = vmatmul.f32.gmra.mxu1 %v4702_v14  ;;  %v1695_v14 = vsel %vm673_vm2, %v1692_v36, %v1694_v42 }
 0x28f   : > { %v2105_v47 = vadd.f32 %v2036_v5, %v1633_v41  ;;  %2599 = vmatmul.msk.f32.gmra.mxu2 %vm3200_vm1, %v548_v61  ;;  %1972 = vmatmul.f32.gmra.mxu3 %v1693_v54 }
 0x290   : > { %v2038_v62 = vpop.f32.mrf.mxu0 }
 0x291   : > { %2137 = vst [vmem:[%s4202_s30 + $0x68] sm:$0xff] %v2105_v47  ;;  %v2168_v6 = vadd.f32 %v2167_v34, %v2105_v47  ;;  %v2206_v26 = vmul.f32 %v2105_v47, %v2105_v47 }
 0x292   : > { %v1812_v25 = vpop.f32.mrf.mxu2  ;;  %v1925_v18 = vpop.f32.mrf.mxu3 }
 0x293   : > { %v2237_v15 = vadd.f32 %v2236_v11, %v2206_v26  ;;  %v1926_v44 = vadd.f32 %v1925_v18, %v1812_v25  ;;  %v1638_v48 = vpop.f32.mrf.mxu1  ;;  %2085 = vmatmul.f32.gmra.mxu0 %v1700_v23  ;;  %v4711_v11 = vld [vmem:[#allocation26_spill] sm:$0xff]  ;;  %v4712_v23 = vld [vmem:[#allocation40_spill] sm:$0xff] }
 0x294   : > { %v1639_v56 = vadd.f32 %v1638_v48, %v4709_v38 }
 0x295   : > { %v2039_v45 = vadd.f32 %v2038_v62, %v1926_v44 }
 0x296   : > { %1685 = vmatmul.f32.gmra.mxu1 %v4704_v49 }
 0x297   : > { %v2106_v2 = vadd.f32 %v2039_v45, %v1636_v20  ;;  %1862 = vmatmul.f32.gmra.mxu2 %v550_v63  ;;  %1975 = vmatmul.f32.gmra.mxu3 %v1695_v14 }
 0x298   : > { %v2041_v37 = vpop.f32.mrf.mxu0 }
 0x299   : > { %2138 = vst [vmem:[%s4202_s30 + $0x70] sm:$0xff] %v2106_v2  ;;  %v2169_v33 = vadd.f32 %v2168_v6, %v2106_v2  ;;  %v2207_v55 = vmul.f32 %v2106_v2, %v2106_v2  ;;  %v4713_v2 = vld [vmem:[#allocation55_spill] sm:$0xff] }
 0x29a   : > { %v1815_v29 = vpop.f32.mrf.mxu2  ;;  %v1928_v59 = vpop.f32.mrf.mxu3 }
 0x29b   : > { %v2238_v39 = vadd.f32 %v2237_v15, %v2207_v55  ;;  %v1929_v35 = vadd.f32 %v1928_v59, %v1815_v29  ;;  %v1641_v19 = vpop.f32.mrf.mxu1  ;;  %2088 = vmatmul.f32.gmra.mxu0 %v1702_v17 }
 0x29c   : > { %v1642_v63 = vadd.f32 %v1641_v19, %v4710_v32 }
 0x29d   : > { %v2042_v49 = vadd.f32 %v2041_v37, %v1929_v35 }
 0x29f   : > { %v2107_v61 = vadd.f32 %v2042_v49, %v1639_v56  ;;  %v4714_v49 = vld [vmem:[#allocation41_spill] sm:$0xff] }
 0x2a0   : > { %v2044_v51 = vpop.f32.mrf.mxu0 }
 0x2a1   : > { %2139 = vst [vmem:[%s4202_s30 + $0x78] sm:$0xff] %v2107_v61  ;;  %v2170_v0 = vadd.f32 %v2169_v33, %v2107_v61  ;;  %v2208_v27 = vmul.f32 %v2107_v61, %v2107_v61 }
 0x2a2   : > { %v1818_v1 = vpop.f32.mrf.mxu2  ;;  %v1931_v43 = vpop.f32.mrf.mxu3 }
 0x2a3   : > { %v2239_v57 = vadd.f32 %v2238_v39, %v2208_v27  ;;  %v1932_v12 = vadd.f32 %v1931_v43, %v1818_v1  ;;  %v1644_v24 = vpop.f32.mrf.mxu1 }
 0x2a4   : > { %v1645_v53 = vadd.f32 %v1644_v24, %v4711_v11 }
 0x2a5   : > { %v2045_v40 = vadd.f32 %v2044_v51, %v1932_v12 }
 0x2a7   : > { %v2108_v52 = vadd.f32 %v2045_v40, %v1642_v63  ;;  %v4715_v40 = vld [vmem:[#allocation37_spill] sm:$0xff] }
 0x2a8   : > { %v2047_v60 = vpop.f32.mrf.mxu0 }
 0x2a9   : > { %2140 = vst [vmem:[%s4202_s30 + $0x80] sm:$0xff] %v2108_v52  ;;  %v2171_v21 = vadd.f32 %v2170_v0, %v2108_v52  ;;  %v2209_v46 = vmul.f32 %v2108_v52, %v2108_v52 }
 0x2aa   : > { %v1821_v36 = vpop.f32.mrf.mxu2  ;;  %v1934_v34 = vpop.f32.mrf.mxu3 }
 0x2ab   : > { %v2240_v8 = vadd.f32 %v2239_v57, %v2209_v46  ;;  %v1935_v7 = vadd.f32 %v1934_v34, %v1821_v36  ;;  %v1647_v16 = vpop.f32.mrf.mxu1 }
 0x2ac   : > { %v1648_v6 = vadd.f32 %v1647_v16, %v4712_v23 }
 0x2ad   : > { %v2048_v50 = vadd.f32 %v2047_v60, %v1935_v7 }
 0x2af   : > { %v2109_v54 = vadd.f32 %v2048_v50, %v1645_v53  ;;  %v4716_v50 = vld [vmem:[#allocation28_spill] sm:$0xff] }
 0x2b0   : > { %v2050_v22 = vpop.f32.mrf.mxu0 }
 0x2b1   : > { %2141 = vst [vmem:[%s4202_s30 + $0x88] sm:$0xff] %v2109_v54  ;;  %v2172_v30 = vadd.f32 %v2171_v21, %v2109_v54  ;;  %v2210_v41 = vmul.f32 %v2109_v54, %v2109_v54 }
 0x2b2   : > { %v1824_v5 = vpop.f32.mrf.mxu2  ;;  %v1937_v31 = vpop.f32.mrf.mxu3 }
 0x2b3   : > { %v2241_v47 = vadd.f32 %v2240_v8, %v2210_v41  ;;  %v1938_v62 = vadd.f32 %v1937_v31, %v1824_v5  ;;  %v1650_v42 = vpop.f32.mrf.mxu1 }
 0x2b4   : > { %v1651_v37 = vadd.f32 %v1650_v42, %v4713_v2 }
 0x2b5   : > { %v2051_v26 = vadd.f32 %v2050_v22, %v1938_v62 }
 0x2b7   : > { %v2110_v25 = vadd.f32 %v2051_v26, %v1648_v6  ;;  %v4717_v26 = vld [vmem:[#allocation42_spill] sm:$0xff] }
 0x2b8   : > { %v2053_v18 = vpop.f32.mrf.mxu0 }
 0x2b9   : > { %2142 = vst [vmem:[%s4202_s30 + $0x90] sm:$0xff] %v2110_v25  ;;  %v2173_v15 = vadd.f32 %v2172_v30, %v2110_v25  ;;  %v2211_v44 = vmul.f32 %v2110_v25, %v2110_v25 }
 0x2ba   : > { %v1827_v48 = vpop.f32.mrf.mxu2  ;;  %v1940_v14 = vpop.f32.mrf.mxu3 }
 0x2bb   : > { %v2242_v9 = vadd.f32 %v2241_v47, %v2211_v44  ;;  %v1941_v20 = vadd.f32 %v1940_v14, %v1827_v48  ;;  %v1653_v45 = vpop.f32.mrf.mxu1 }
 0x2bc   : > { %v1654_v61 = vadd.f32 %v1653_v45, %v4714_v49 }
 0x2bd   : > { %v2054_v17 = vadd.f32 %v2053_v18, %v1941_v20 }
 0x2bf   : > { %v2111_v33 = vadd.f32 %v2054_v17, %v1651_v37  ;;  %v4718_v17 = vld [vmem:[#allocation59_spill] sm:$0xff] }
 0x2c0   : > { %v2056_v55 = vpop.f32.mrf.mxu0 }
 0x2c1   : > { %2143 = vst [vmem:[%s4202_s30 + $0x98] sm:$0xff] %v2111_v33  ;;  %v2174_v29 = vadd.f32 %v2173_v15, %v2111_v33  ;;  %v2212_v59 = vmul.f32 %v2111_v33, %v2111_v33 }
 0x2c2   : > { %v1830_v39 = vpop.f32.mrf.mxu2  ;;  %v1943_v35 = vpop.f32.mrf.mxu3 }
 0x2c3   : > { %v2243_v19 = vadd.f32 %v2242_v9, %v2212_v59  ;;  %v1944_v38 = vadd.f32 %v1943_v35, %v1830_v39  ;;  %v1656_v56 = vpop.f32.mrf.mxu1 }
 0x2c4   : > { %v1657_v52 = vadd.f32 %v1656_v56, %v4715_v40 }
 0x2c5   : > { %v2057_v51 = vadd.f32 %v2056_v55, %v1944_v38 }
 0x2c7   : > { %v2112_v0 = vadd.f32 %v2057_v51, %v1654_v61  ;;  %v4719_v51 = vld [vmem:[#allocation43_spill] sm:$0xff] }
 0x2c8   : > { %v2059_v27 = vpop.f32.mrf.mxu0 }
 0x2c9   : > { %2144 = vst [vmem:[%s4202_s30 + $0xa0] sm:$0xff] %v2112_v0  ;;  %v2175_v1 = vadd.f32 %v2174_v29, %v2112_v0  ;;  %v2213_v43 = vmul.f32 %v2112_v0, %v2112_v0 }
 0x2ca   : > { %v1833_v57 = vpop.f32.mrf.mxu2  ;;  %v1946_v12 = vpop.f32.mrf.mxu3 }
 0x2cb   : > { %v2244_v24 = vadd.f32 %v2243_v19, %v2213_v43  ;;  %v1947_v32 = vadd.f32 %v1946_v12, %v1833_v57  ;;  %v1659_v63 = vpop.f32.mrf.mxu1 }
 0x2cc   : > { %v1660_v54 = vadd.f32 %v1659_v63, %v4716_v50 }
 0x2cd   : > { %v2060_v60 = vadd.f32 %v2059_v27, %v1947_v32 }
 0x2cf   : > { %v2113_v21 = vadd.f32 %v2060_v60, %v1657_v52 }
 0x2d0   : > { %v2062_v46 = vpop.f32.mrf.mxu0 }
 0x2d1   : > { %2145 = vst [vmem:[%s4202_s30 + $0xa8] sm:$0xff] %v2113_v21  ;;  %v2176_v36 = vadd.f32 %v2175_v1, %v2113_v21  ;;  %v2214_v34 = vmul.f32 %v2113_v21, %v2113_v21 }
 0x2d2   : > { %v1836_v8 = vpop.f32.mrf.mxu2  ;;  %v1949_v7 = vpop.f32.mrf.mxu3 }
 0x2d3   : > { %v2245_v16 = vadd.f32 %v2244_v24, %v2214_v34  ;;  %v1950_v11 = vadd.f32 %v1949_v7, %v1836_v8  ;;  %v1662_v53 = vpop.f32.mrf.mxu1 }
 0x2d4   : > { %v1663_v25 = vadd.f32 %v1662_v53, %v4717_v26 }
 0x2d5   : > { %v2063_v22 = vadd.f32 %v2062_v46, %v1950_v11 }
 0x2d7   : > { %v2114_v30 = vadd.f32 %v2063_v22, %v1660_v54 }
 0x2d8   : > { %v2065_v41 = vpop.f32.mrf.mxu0 }
 0x2d9   : > { %2146 = vst [vmem:[%s4202_s30 + $0xb0] sm:$0xff] %v2114_v30  ;;  %v2177_v5 = vadd.f32 %v2176_v36, %v2114_v30  ;;  %v2215_v31 = vmul.f32 %v2114_v30, %v2114_v30 }
 0x2da   : > { %v1839_v47 = vpop.f32.mrf.mxu2  ;;  %v1952_v62 = vpop.f32.mrf.mxu3 }
 0x2db   : > { %v2246_v42 = vadd.f32 %v2245_v16, %v2215_v31  ;;  %v1953_v23 = vadd.f32 %v1952_v62, %v1839_v47  ;;  %v1665_v6 = vpop.f32.mrf.mxu1 }
 0x2dc   : > { %v1666_v33 = vadd.f32 %v1665_v6, %v4718_v17 }
 0x2dd   : > { %v2066_v18 = vadd.f32 %v2065_v41, %v1953_v23 }
 0x2df   : > { %v2115_v15 = vadd.f32 %v2066_v18, %v1663_v25 }
 0x2e0   : > { %v2068_v44 = vpop.f32.mrf.mxu0 }
 0x2e1   : > { %2147 = vst [vmem:[%s4202_s30 + $0xb8] sm:$0xff] %v2115_v15  ;;  %v2178_v48 = vadd.f32 %v2177_v5, %v2115_v15  ;;  %v2216_v14 = vmul.f32 %v2115_v15, %v2115_v15 }
 0x2e2   : > { %v1842_v9 = vpop.f32.mrf.mxu2  ;;  %v1955_v20 = vpop.f32.mrf.mxu3 }
 0x2e3   : > { %v2247_v45 = vadd.f32 %v2246_v42, %v2216_v14  ;;  %v1956_v2 = vadd.f32 %v1955_v20, %v1842_v9  ;;  %v1668_v37 = vpop.f32.mrf.mxu1 }
 0x2e4   : > { %v1669_v0 = vadd.f32 %v1668_v37, %v4719_v51 }
 0x2e5   : > { %v2069_v55 = vadd.f32 %v2068_v44, %v1956_v2 }
 0x2e7   : > { %v2116_v29 = vadd.f32 %v2069_v55, %v1666_v33 }
 0x2e8   : > { %v2071_v59 = vpop.f32.mrf.mxu0 }
 0x2e9   : > { %2148 = vst [vmem:[%s4202_s30 + $0xc0] sm:$0xff] %v2116_v29  ;;  %v2179_v39 = vadd.f32 %v2178_v48, %v2116_v29  ;;  %v2217_v35 = vmul.f32 %v2116_v29, %v2116_v29 }
 0x2ea   : > { %v1845_v19 = vpop.f32.mrf.mxu2  ;;  %v1958_v38 = vpop.f32.mrf.mxu3 }
 0x2eb   : > { %v2248_v56 = vadd.f32 %v2247_v45, %v2217_v35  ;;  %v1959_v49 = vadd.f32 %v1958_v38, %v1845_v19  ;;  %v1671_v61 = vpop.f32.mrf.mxu1 }
 0x2ec   : > { %v1672_v60 = vadd.f32 %v1671_v61, %v4150_v13 }
 0x2ed   : > { %v2072_v27 = vadd.f32 %v2071_v59, %v1959_v49 }
 0x2ef   : > { %v2117_v1 = vadd.f32 %v2072_v27, %v1669_v0 }
 0x2f0   : > { %v2074_v43 = vpop.f32.mrf.mxu0 }
 0x2f1   : > { %2149 = vst [vmem:[%s4202_s30 + $0xc8] sm:$0xff] %v2117_v1  ;;  %v2180_v57 = vadd.f32 %v2179_v39, %v2117_v1  ;;  %v2218_v12 = vmul.f32 %v2117_v1, %v2117_v1 }
 0x2f2   : > { %v1848_v24 = vpop.f32.mrf.mxu2  ;;  %v1961_v32 = vpop.f32.mrf.mxu3 }
 0x2f3   : > { %v2249_v63 = vadd.f32 %v2248_v56, %v2218_v12  ;;  %v1962_v40 = vadd.f32 %v1961_v32, %v1848_v24  ;;  %v1674_v52 = vpop.f32.mrf.mxu1 }
 0x2f4   : > { %v1675_v54 = vadd.f32 %v1674_v52, %v4157_v4 }
 0x2f5   : > { %v2075_v21 = vadd.f32 %v2074_v43, %v1962_v40 }
 0x2f7   : > { %v2118_v46 = vadd.f32 %v2075_v21, %v1672_v60 }
 0x2f8   : > { %v2077_v36 = vpop.f32.mrf.mxu0 }
 0x2f9   : > { %2150 = vst [vmem:[%s4202_s30 + $0xd0] sm:$0xff] %v2118_v46  ;;  %v2181_v34 = vadd.f32 %v2180_v57, %v2118_v46  ;;  %v2219_v8 = vmul.f32 %v2118_v46, %v2118_v46 }
 0x2fa   : > { %v1851_v7 = vpop.f32.mrf.mxu2  ;;  %v1964_v16 = vpop.f32.mrf.mxu3 }
 0x2fb   : > { %v2250_v11 = vadd.f32 %v2249_v63, %v2219_v8  ;;  %v1965_v53 = vadd.f32 %v1964_v16, %v1851_v7  ;;  %v1677_v50 = vpop.f32.mrf.mxu1 }
 0x2fc   : > { %v1678_v23 = vadd.f32 %v1677_v50, %v4166_v28 }
 0x2fd   : > { %v2078_v22 = vadd.f32 %v2077_v36, %v1965_v53 }
 0x2ff   : > { %v2119_v30 = vadd.f32 %v2078_v22, %v1675_v54 }
 0x300   : > { %v2080_v41 = vpop.f32.mrf.mxu0 }
 0x301   : > { %2151 = vst [vmem:[%s4202_s30 + $0xd8] sm:$0xff] %v2119_v30  ;;  %v2182_v13 = vadd.f32 %v2181_v34, %v2119_v30  ;;  %v2220_v5 = vmul.f32 %v2119_v30, %v2119_v30 }
 0x302   : > { %v1854_v31 = vpop.f32.mrf.mxu2  ;;  %v1967_v47 = vpop.f32.mrf.mxu3 }
 0x303   : > { %v2251_v62 = vadd.f32 %v2250_v11, %v2220_v5  ;;  %v1968_v42 = vadd.f32 %v1967_v47, %v1854_v31  ;;  %v1680_v6 = vpop.f32.mrf.mxu1 }
 0x304   : > { %v1681_v20 = vadd.f32 %v1680_v6, %v4173_v3 }
 0x305   : > { %v2081_v26 = vadd.f32 %v2080_v41, %v1968_v42 }
 0x307   : > { %v2120_v25 = vadd.f32 %v2081_v26, %v1678_v23 }
 0x308   : > { %v2083_v18 = vpop.f32.mrf.mxu0 }
 0x309   : > { %2152 = vst [vmem:[%s4202_s30 + $0xe0] sm:$0xff] %v2120_v25  ;;  %v2183_v4 = vadd.f32 %v2182_v13, %v2120_v25  ;;  %v2221_v15 = vmul.f32 %v2120_v25, %v2120_v25 }
 0x30a   : > { %v1857_v44 = vpop.f32.mrf.mxu2  ;;  %v1970_v48 = vpop.f32.mrf.mxu3 }
 0x30b   : > { %v2252_v14 = vadd.f32 %v2251_v62, %v2221_v15  ;;  %v1971_v9 = vadd.f32 %v1970_v48, %v1857_v44  ;;  %v1683_v2 = vpop.f32.mrf.mxu1 }
 0x30c   : > { %v1684_v35 = vadd.f32 %v1683_v2, %v4182_v10 }
 0x30d   : > { %v2084_v45 = vadd.f32 %v2083_v18, %v1971_v9 }
 0x30f   : > { %v2121_v37 = vadd.f32 %v2084_v45, %v1681_v20 }
 0x310   : > { %v2086_v28 = vpop.f32.mrf.mxu0 }
 0x311   : > { %2153 = vst [vmem:[%s4202_s30 + $0xe8] sm:$0xff] %v2121_v37  ;;  %v2184_v17 = vadd.f32 %v2183_v4, %v2121_v37  ;;  %v2222_v33 = vmul.f32 %v2121_v37, %v2121_v37 }
 0x312   : > { %v1860_v55 = vpop.f32.mrf.mxu2  ;;  %v1973_v29 = vpop.f32.mrf.mxu3 }
 0x313   : > { %v2253_v59 = vadd.f32 %v2252_v14, %v2222_v33  ;;  %v1974_v39 = vadd.f32 %v1973_v29, %v1860_v55  ;;  %v1686_v3 = vpop.f32.mrf.mxu1 }
 0x314   : > { %v1687_v10 = vadd.f32 %v1686_v3, %v4189_v58 }
 0x315   : > { %v2087_v19 = vadd.f32 %v2086_v28, %v1974_v39 }
 0x317   : > { %v2122_v38 = vadd.f32 %v2087_v19, %v1684_v35 }
 0x318   : > { %v2089_v61 = vpop.f32.mrf.mxu0 }
 0x319   : > { %2154 = vst [vmem:[%s4202_s30 + $0xf0] sm:$0xff] %v2122_v38  ;;  %v2185_v56 = vadd.f32 %v2184_v17, %v2122_v38  ;;  %v2223_v49 = vmul.f32 %v2122_v38, %v2122_v38 }
 0x31a   : > { %v1863_v51 = vpop.f32.mrf.mxu2  ;;  %v1976_v0 = vpop.f32.mrf.mxu3 }
 0x31b   : > { %v2254_v27 = vadd.f32 %v2253_v59, %v2223_v49  ;;  %v1977_v1 = vadd.f32 %v1976_v0, %v1863_v51 }
 0x31d   : > { %v2090_v43 = vadd.f32 %v2089_v61, %v1977_v1 }
 0x31f   : > { %v2123_v57 = vadd.f32 %v2090_v43, %v1687_v10 }
 0x321   : > { %2155 = vst [vmem:[%s4202_s30 + $0xf8] sm:$0xff] %v2123_v57  ;;  %v2186_v12 = vadd.f32 %v2185_v56, %v2123_v57  ;;  %v2224_v24 = vmul.f32 %v2123_v57, %v2123_v57 }
 0x322   : > { %2900 = shalt.err (!%p2897_p13)
}
 0x323   : > { %s3000_s20 = smov 128   ;;  %s3001_s22 = smov 8   ;;  %v2187_v58 = vrot.slane %v2186_v12, 4  ;;  %v2255_v32 = vadd.f32 %v2254_v27, %v2224_v24 }
 0x324   : > { %2671 = dma.vmem_to_hbm [thread:$0]  (%p3121_p0), %s2286_s11, 4096, %s2288_s13, %s2265_s25, %s3000_s20, %s3000_s20, %s3001_s22  }
 0x325   : > { %v2188_v63 = vadd.f32 %v2187_v58, %v2186_v12  ;;  %v2256_v40 = vrot.slane %v2255_v32, 4  ;;  %s2503_s24 = sshll.u32 %s3168_s1, 1  ;;  %s2604_s27 = sshll.u32 %s2987_s21, 1 }
 0x326   : > { %s2301_s30 = scalar_lea.hbm %s4402_s5, %s2604_s27  ;;  %s406_s14 = scalar_lea.vmem [#allocation11], %s2503_s24 }
 0x327   : > { %v2189_v52 = vrot.slane %v2188_v63, 2  ;;  %v2257_v60 = vadd.f32 %v2256_v40, %v2255_v32  ;;  %s2303_s17 = sshll.u32 %s406_s14, 4  ;;  %s2305_s26 = sshll.u32 %s2301_s30, 4  ;;  %s2304_s17 = int_to_ptr.vmem [resolvable:$true] %s2303_s17  ;;  %s2306_s26 = int_to_ptr.hbm [resolvable:$true] %s2305_s26 }
 0x328   : > { %s2270_s21 = scalar_lea.sflag [#allocation12], %s3168_s1  ;;  %s2915_s10 = sshra.s32 %s2306_s26, 4  ;;  %s2916_s10 = int_to_ptr.hbm [resolvable:$true] %s2915_s10 }
 0x329   : > { %v2190_v21 = vadd.f32 %v2189_v52, %v2188_v63  ;;  %v2258_v46 = vrot.slane %v2257_v60, 2  ;;  %s2917_s11 = scalar_lea.hbm %s2916_s10, 2  ;;  %s2921_s12 = scalar_lea.hbm %s4402_s5, 4 }
 0x32a   : > { %p2918_p3 = scmp.ne.s32.totalorder %s2916_s10, %s2917_s11  ;;  %p2922_p6 = scmp.lt.s32.totalorder %s2916_s10, %s4402_s5 }
 0x32b   : > { %v2191_v36 = vrot.slane %v2190_v21, 1  ;;  %v2259_v34 = vadd.f32 %v2258_v46, %v2257_v60  ;;  %p2923_p7 = scmp.lt.s32.totalorder %s2921_s12, %s2917_s11 }
 0x32c   : > { %p2919_p5 = pnand %p2918_p3, %p3121_p0 }
 0x32d   : > { %v2260_v8 = vrot.slane %v2259_v34, 1  ;;  %v2192_v7 = vadd.f32 %v2191_v36, %v2190_v21  ;;  %p2924_p8 = por %p2923_p7, %p2922_p6 }
 0x32e   : > { %p2920_p1 = pneg %p2919_p5 }
 0x32f   : > { %v2261_v16 = vadd.f32 %v2260_v8, %v2259_v34 }
 0x330   : > { %p2925_p9 = pnand %p2924_p8, %p2920_p1 }
 0x331   : > { %v2262_v11 = vsel %vm496_vm0, %v2192_v7, %v2261_v16 }
 0x332   : > { %2263 = vst [vmem:[%s406_s14] sm:$0x3] %v2262_v11 }
 0x333   : > { %2928 = shalt.err (!%p2925_p9)
}
 0x334   : > { %2672 = dma.vmem_to_hbm [thread:$0]  (%p3121_p0), %s2304_s17, 32, %s2306_s26, %s2270_s21  }
 0x335 PF: > { %s2317_s1 = sand.u32 1, %s2975_s18   ;;  %p2690_p10 = pnand %p2487_p4, %p3125_p2 }
 0x336   : > { %s2318_s16 = scalar_lea.sflag [#allocation4], %s2317_s1 }
 0x337   : > { %p2691_p11 = pneg %p2690_p10 }
 0x339   : > { %2966 = dma.done.wait (%p2691_p11), %s2318_s16, 4096  }
 0x33a   : > { %2968 = vsyncadd (%p2691_p11), %s2318_s16, 4294963200  ;;  %s2328_s9 = scalar_lea.sflag [#allocation12], %s2317_s1 }
 0x33b   : > { %2970 = dma.done.wait (%p2691_p11), %s2328_s9, 32  }
 0x33c   : > { %2972 = vsyncadd (%p2691_p11), %s2328_s9, 4294967264  ;;  %s29_s23 = sadd.s32 1, %s2995_s23   ;;  %s4720_s6 = sld [smem:[#allocation18_spill]] }
 0x33d   : > { %p26_p12 = scmp.ge.s32.totalorder %s29_s23, 4   ;;  %s4721_s20 = sld [smem:[#allocation21_spill]] }
 0x33e   : > { %s4722_s21 = sld [smem:[#allocation19_spill]]  ;;  %s4724_s18 = smov %s2979_s19 }
 0x33f   : > { %s4723_s22 = sld [smem:[#allocation20_spill]]  ;;  %28 = sbr.rel (!%p26_p12) target bundleno = 15 (0xf), region = 126 }
 0x342   : > { %s4725_s19 = smov %s4720_s6 }
 0x344   :  { %2334 = vsyncpa [#allocation3], 1 }
 0x345   :  { %2336 = vsyncpa [#allocation3 + $0x1], 1 }
 0x346   :  { %2337 = vsyncpa [#allocation6], 1 }
 0x347   :  { %2339 = vsyncpa [#allocation6 + $0x1], 1 }
 0x348   :  { %2340 = vsyncpa [#allocation9], 1 }
 0x349   :  { %2341 = vsyncpa [#allocation4], 1 }
 0x34a   :  { %2343 = vsyncpa [#allocation4 + $0x1], 1 }
 0x34b   :  { %2344 = vsyncpa [#allocation12], 1 }
 0x34c   :  { %2346 = vsyncpa [#allocation12 + $0x1], 1 }

</bundles_post_ra>
